<compile_context>
chip_gen: v7x
topology: tpu7x:2x2x1
jax: 0.10.0
libtpu: 0.0.40
codegen_flags: <defaults>
</compile_context>

<pallas_src>
import numpy as np
import jax
import jax.numpy as jnp
from jax import lax
from jax.experimental import pallas as pl
from jax.experimental.pallas import tpu as pltpu

# ----- model dims -----------------------------------------------------------
H = 12              # hidden size per LSTM direction
H2 = 2 * H          # 24: bidirectional width / packed layer-1 state
G4 = 4 * H          # 48: fused gate width (i|f|g|o) for one direction
G8 = 2 * G4         # 96: fused gate width for both layer-1 directions
LATENT = 12         # embedding (Linear) output dim
XC = 8              # augmented input columns: [x_t, x_{T-1-t}, 1, 0, 0, 0, 0, 0]

# ----- weight slab row offsets (static, 8-aligned where it matters) ---------
# slab_a: lane width G8 = 96
OFF_A1 = 0          # 8 rows reserved (3 used): layer-1 input/bias affine
OFF_WHH1 = 8        # 24 rows: block-diagonal layer-1 recurrent weight
ROWS_A = 32
# slab_b: lane width G4 = 48
OFF_WIH2F = 0       # 24 rows: layer-2 fwd input weight (rows 0:12 <- y1f, 12:24 <- y1b)
OFF_WHH2F = 24      # 12 rows: layer-2 fwd recurrent weight
OFF_WIH2B = 40      # 24 rows: layer-2 bwd input weight
OFF_WEMB = 64       # 24 rows: embedding weight (lanes 0:LATENT used)
OFF_B2F = 88        # 1 row : layer-2 fwd bias
OFF_B2B = 96        # 1 row : layer-2 bwd bias
OFF_BEMB = 104      # 1 row : embedding bias (lanes 0:LATENT)
ROWS_B = 112

_UNROLL_T = 16      # static full unroll up to this T; fori_loop(unroll=4) above
_DEFAULT_BB = 128   # per-gen tunable: ~128 (v5e/v7x), up to 256 (v6e)


def _round_up(n, m):
    return ((n + m - 1) // m) * m


# --------------------------------------------------------------------------
# Kernel
# --------------------------------------------------------------------------
def _encoder_kernel(
    x_ref,                 # (T*BB, XC)  augmented input rows (row = t*BB + b)
    wa_ref,                # (ROWS_A, 96) layer-1 slab
    wb_ref,                # (ROWS_B, 48) layer-2 / embedding slab
    out_ref,               # (BB, LATENT)
    gx1_ref,               # (T*BB, 96) scratch: fused layer-1 preactivations
    y1f_ref, y1b_ref,      # (T*BB, H)  scratch: layer-1 outputs per direction
    gx2_ref,               # (T*BB, 48) scratch: layer-2 fwd preactivations
):
    Bb = out_ref.shape[0]
    T = x_ref.shape[0] // Bb

    def cell(gx, h, c, w_hh, nh):
        # One fused gate tile: a single MXU dot + a single sigmoid pass.
        # g-gate columns were pre-scaled by 2, so tanh(z) = 2*sigmoid(2z) - 1.
        gates = gx + jnp.dot(h, w_hh, preferred_element_type=jnp.float32)
        s = jax.nn.sigmoid(gates)
        i = s[:, 0 * nh:1 * nh]
        f = s[:, 1 * nh:2 * nh]
        g = 2.0 * s[:, 2 * nh:3 * nh] - 1.0
        o = s[:, 3 * nh:4 * nh]
        c_new = f * c + i * g
        h_new = o * jnp.tanh(c_new)
        return h_new, c_new

    # ---- Layer 1: all input-side preactivations (both directions) in ONE
    #      bulk GEMM against the augmented input (bias folded into A1).
    a1 = wa_ref[OFF_A1:OFF_A1 + XC, :]                       # (8, 96)
    gx1_ref[...] = jnp.dot(x_ref[...], a1,
                           preferred_element_type=jnp.float32)

    # ---- Layer 1: fused fwd+bwd recurrence (block-diagonal W_hh).
    whh1 = wa_ref[OFF_WHH1:OFF_WHH1 + H2, :]                 # (24, 96)
    z2 = jnp.zeros((Bb, H2), jnp.float32)

    def step1(rf, rb, h, c):
        h, c = cell(gx1_ref[pl.ds(rf, Bb), :], h, c, whh1, H2)
        y1f_ref[pl.ds(rf, Bb), :] = h[:, 0:H]                # fwd hidden @ time t
        y1b_ref[pl.ds(rb, Bb), :] = h[:, H:H2]               # bwd hidden @ time T-1-t
        return h, c

    if T <= _UNROLL_T:
        h1, c1 = z2, z2
        for t in range(T):                                   # static unroll
            h1, c1 = step1(t * Bb, (T - 1 - t) * Bb, h1, c1)
    else:
        def body1(t, hc):
            rf = pl.multiple_of(t * Bb, 8)
            rb = pl.multiple_of((T - 1 - t) * Bb, 8)
            return step1(rf, rb, *hc)
        h1, c1 = lax.fori_loop(0, T, body1, (z2, z2), unroll=4)

    # ---- Layer 2: hoist the input-gate matmuls into bulk GEMMs.
    wih2f_a = wb_ref[OFF_WIH2F:OFF_WIH2F + H, :]             # (12, 48)
    wih2f_b = wb_ref[OFF_WIH2F + H:OFF_WIH2F + H2, :]        # (12, 48)
    b2f = wb_ref[OFF_B2F:OFF_B2F + 1, :]                     # (1, 48)
    gx2_ref[...] = (
        jnp.dot(y1f_ref[...], wih2f_a, preferred_element_type=jnp.float32)
        + jnp.dot(y1b_ref[...], wih2f_b, preferred_element_type=jnp.float32)
        + b2f)

    # ---- Layer 2, forward recurrence (only the final hidden is needed).
    whh2 = wb_ref[OFF_WHH2F:OFF_WHH2F + H, :]                # (12, 48)
    z1 = jnp.zeros((Bb, H), jnp.float32)

    def step2(r, h, c):
        return cell(gx2_ref[pl.ds(r, Bb), :], h, c, whh2, H)

    if T <= _UNROLL_T:
        h2, c2 = z1, z1
        for t in range(T):
            h2, c2 = step2(t * Bb, h2, c2)
    else:
        def body2(t, hc):
            return step2(pl.multiple_of(t * Bb, 8), *hc)
        h2, c2 = lax.fori_loop(0, T, body2, (z1, z1), unroll=4)

    # ---- Layer 2, backward direction: x[:, -1, :] only needs the FIRST
    #      reverse step (zero initial state -> c = i*g, forget gate unused).
    rlast = (T - 1) * Bb
    wih2b_a = wb_ref[OFF_WIH2B:OFF_WIH2B + H, :]
    wih2b_b = wb_ref[OFF_WIH2B + H:OFF_WIH2B + H2, :]
    b2b = wb_ref[OFF_B2B:OFF_B2B + 1, :]
    gxb = (jnp.dot(y1f_ref[rlast:rlast + Bb, :], wih2b_a,
                   preferred_element_type=jnp.float32)
           + jnp.dot(y1b_ref[rlast:rlast + Bb, :], wih2b_b,
                     preferred_element_type=jnp.float32)
           + b2b)
    sb = jax.nn.sigmoid(gxb)
    i_b = sb[:, 0:H]
    g_b = 2.0 * sb[:, 2 * H:3 * H] - 1.0
    o_b = sb[:, 3 * H:4 * H]
    h2b = o_b * jnp.tanh(i_b * g_b)

    # ---- Embedding: Linear(24 -> LATENT), split over the two halves.
    wemb_f = wb_ref[OFF_WEMB:OFF_WEMB + H, 0:LATENT]
    wemb_b = wb_ref[OFF_WEMB + H:OFF_WEMB + H2, 0:LATENT]
    bemb = wb_ref[OFF_BEMB:OFF_BEMB + 1, 0:LATENT]
    out = (jnp.dot(h2, wemb_f, preferred_element_type=jnp.float32)
           + jnp.dot(h2b, wemb_b, preferred_element_type=jnp.float32)
           + bemb)
    out_ref[...] = out.astype(out_ref.dtype)


# --------------------------------------------------------------------------
# Parameter init (deterministic, PyTorch shapes) and packing into two slabs
# --------------------------------------------------------------------------
def init_raw_params(key):
    """PyTorch-shaped parameters, uniform(-1/sqrt(H), 1/sqrt(H))."""
    ks = jax.random.split(key, 18)
    s = 1.0 / float(np.sqrt(H))
    u = lambda k, shape: jax.random.uniform(k, shape, jnp.float32, -s, s)
    p = {}
    p["W_ih1f"], p["W_hh1f"] = u(ks[0], (4 * H, 1)),  u(ks[1], (4 * H, H))
    p["b_ih1f"], p["b_hh1f"] = u(ks[2], (4 * H,)),    u(ks[3], (4 * H,))
    p["W_ih1b"], p["W_hh1b"] = u(ks[4], (4 * H, 1)),  u(ks[5], (4 * H, H))
    p["b_ih1b"], p["b_hh1b"] = u(ks[6], (4 * H,)),    u(ks[7], (4 * H,))
    p["W_ih2f"], p["W_hh2f"] = u(ks[8],  (4 * H, 2 * H)), u(ks[9],  (4 * H, H))
    p["b_ih2f"], p["b_hh2f"] = u(ks[10], (4 * H,)),       u(ks[11], (4 * H,))
    p["W_ih2b"], p["W_hh2b"] = u(ks[12], (4 * H, 2 * H)), u(ks[13], (4 * H, H))
    p["b_ih2b"], p["b_hh2b"] = u(ks[14], (4 * H,)),       u(ks[15], (4 * H,))
    p["W_emb"], p["b_emb"] = u(ks[16], (LATENT, 2 * H)), u(ks[17], (LATENT,))
    return p


def pack_params(p):
    """Pack PyTorch-shaped weights into two fused, kernel-friendly slabs.

    Layer-1 gate layout is gate-major with directions interleaved:
    [i_f i_b | f_f f_b | g_f g_b | o_f o_b] (96 lanes).  All g-gate columns
    (input, recurrent, bias) are pre-scaled by 2 so the kernel can use the
    identity tanh(z) = 2*sigmoid(2z) - 1 with a single sigmoid pass.
    """
    n = lambda a: np.asarray(a, np.float32)

    # ---- slab_a: layer-1 affine (A1) + block-diagonal recurrent weight.
    A1 = np.zeros((XC, G8), np.float32)        # rows: [x_t, x_rev, 1, pad...]
    Whh1 = np.zeros((H2, G8), np.float32)
    bf = n(p["b_ih1f"]) + n(p["b_hh1f"])
    bb = n(p["b_ih1b"]) + n(p["b_hh1b"])
    for k in range(4):                          # gate order i, f, g, o
        cf = slice(k * H2, k * H2 + H)          # forward columns of gate k
        cb = slice(k * H2 + H, (k + 1) * H2)    # backward columns of gate k
        rg = slice(k * H, (k + 1) * H)          # PyTorch rows of gate k
        A1[0, cf] = n(p["W_ih1f"])[rg, 0]
        A1[1, cb] = n(p["W_ih1b"])[rg, 0]
        A1[2, cf] = bf[rg]
        A1[2, cb] = bb[rg]
        Whh1[0:H, cf] = n(p["W_hh1f"])[rg, :].T
        Whh1[H:H2, cb] = n(p["W_hh1b"])[rg, :].T
    gcols = slice(2 * H2, 3 * H2)               # g-gate columns (both dirs)
    A1[:, gcols] *= 2.0
    Whh1[:, gcols] *= 2.0

    slab_a = np.zeros((ROWS_A, G8), np.float32)
    slab_a[OFF_A1:OFF_A1 + XC] = A1
    slab_a[OFF_WHH1:OFF_WHH1 + H2] = Whh1

    # ---- slab_b: layer-2 weights/biases + embedding (standard i|f|g|o, 48 lanes).
    gscale = np.ones((G4,), np.float32)
    gscale[2 * H:3 * H] = 2.0
    t_ih = lambda W: n(W).T * gscale            # (4H, in) -> (in, 4H), g cols *2
    slab_b = np.zeros((ROWS_B, G4), np.float32)
    slab_b[OFF_WIH2F:OFF_WIH2F + H2] = t_ih(p["W_ih2f"])
    slab_b[OFF_WHH2F:OFF_WHH2F + H] = t_ih(p["W_hh2f"])
    slab_b[OFF_WIH2B:OFF_WIH2B + H2] = t_ih(p["W_ih2b"])
    slab_b[OFF_WEMB:OFF_WEMB + H2, 0:LATENT] = n(p["W_emb"]).T
    slab_b[OFF_B2F, :] = (n(p["b_ih2f"]) + n(p["b_hh2f"])) * gscale
    slab_b[OFF_B2B, :] = (n(p["b_ih2b"]) + n(p["b_hh2b"])) * gscale
    slab_b[OFF_BEMB, 0:LATENT] = n(p["b_emb"])
    # NOTE: W_hh2b is intentionally dropped (layer-2 backward at the last time
    # index is its first reverse step with zero state, so h @ W_hh is 0).
    return jnp.asarray(slab_a), jnp.asarray(slab_b)


# --------------------------------------------------------------------------
# Wrapper
# --------------------------------------------------------------------------
def encoder_forward(x, packed, block_batch=_DEFAULT_BB):
    """x: (B, T, 1) float32, batch-first like the PyTorch module."""
    slab_a, slab_b = packed
    B, T, _ = x.shape
    # Batch block: as large as requested but never bigger than the (8-aligned)
    # batch.  Keep block_batch such that cdiv(B, BB) >= 2 on v7x if B allows.
    BB = max(8, (min(int(block_batch), _round_up(B, 8)) // 8) * 8)
    nb = (B + BB - 1) // BB
    Bp = nb * BB
    rows = T * BB

    # (B,T,1) -> pad batch -> per-block time-major rows; augment each row with
    # [x_t, x_{T-1-t}, 1, 0...] so layer-1 preacts are a single in-kernel GEMM.
    xp = jnp.zeros((Bp, T), jnp.float32).at[:B].set(x[..., 0].astype(jnp.float32))
    xf = xp.reshape(nb, BB, T).transpose(0, 2, 1)            # (nb, T, BB)
    xcols = jnp.zeros((nb, T, BB, XC), jnp.float32)
    xcols = xcols.at[..., 0].set(xf)
    xcols = xcols.at[..., 1].set(xf[:, ::-1, :])
    xcols = xcols.at[..., 2].set(1.0)
    xk = xcols.reshape(nb, rows, XC)

    # Scoped-VMEM budget: 4 scratch bufs + double-buffered x block + weight
    # slabs + output (all padded to 128 lanes), plus headroom.
    est = (4 * rows + 2 * rows + 2 * (ROWS_A + ROWS_B) + 2 * BB) * 128 * 4
    vmem_limit = int(min(max(est + (4 << 20), 32 << 20), 100 << 20))

    out = pl.pallas_call(
        _encoder_kernel,
        out_shape=jax.ShapeDtypeStruct((Bp, LATENT), jnp.float32),
        grid=(nb,),
        in_specs=[
            pl.BlockSpec((None, rows, XC), lambda i: (i, 0, 0)),
            pl.BlockSpec((ROWS_A, G8), lambda i: (0, 0)),
            pl.BlockSpec((ROWS_B, G4), lambda i: (0, 0)),
        ],
        out_specs=pl.BlockSpec((BB, LATENT), lambda i: (i, 0)),
        scratch_shapes=[
            pltpu.VMEM((rows, G8), jnp.float32),   # fused layer-1 preacts
            pltpu.VMEM((rows, H), jnp.float32),    # layer-1 fwd outputs
            pltpu.VMEM((rows, H), jnp.float32),    # layer-1 bwd outputs
            pltpu.VMEM((rows, G4), jnp.float32),   # layer-2 fwd preacts
        ],
        compiler_params=pltpu.CompilerParams(
            dimension_semantics=("parallel",),     # batch blocks -> 2 TCs on v7x
            vmem_limit_bytes=vmem_limit),
    )(xk, slab_a, slab_b)
    return out[:B]


# --------------------------------------------------------------------------
# Pure-JAX reference (same math as torch.nn.LSTM / Linear) for validation
# --------------------------------------------------------------------------
def _lstm_dir_ref(x, W_ih, W_hh, b_ih, b_hh, reverse=False):
    B = x.shape[0]

    def step(carry, x_t):
        h, c = carry
        gates = x_t @ W_ih.T + h @ W_hh.T + b_ih + b_hh
        i, f, g, o = jnp.split(gates, 4, axis=-1)
        i, f, o = jax.nn.sigmoid(i), jax.nn.sigmoid(f), jax.nn.sigmoid(o)
        g = jnp.tanh(g)
        c = f * c + i * g
        h = o * jnp.tanh(c)
        return (h, c), h

    xs = jnp.transpose(x, (1, 0, 2))
    if reverse:
        xs = xs[::-1]
    init = (jnp.zeros((B, H), jnp.float32), jnp.zeros((B, H), jnp.float32))
    _, hs = lax.scan(step, init, xs)
    hs = jnp.transpose(hs, (1, 0, 2))
    if reverse:
        hs = hs[:, ::-1, :]
    return hs


def encoder_ref(x, p):
    y1 = jnp.concatenate(
        [_lstm_dir_ref(x, p["W_ih1f"], p["W_hh1f"], p["b_ih1f"], p["b_hh1f"]),
         _lstm_dir_ref(x, p["W_ih1b"], p["W_hh1b"], p["b_ih1b"], p["b_hh1b"],
                       reverse=True)], axis=-1)
    y2 = jnp.concatenate(
        [_lstm_dir_ref(y1, p["W_ih2f"], p["W_hh2f"], p["b_ih2f"], p["b_hh2f"]),
         _lstm_dir_ref(y1, p["W_ih2b"], p["W_hh2b"], p["b_ih2b"], p["b_hh2b"],
                       reverse=True)], axis=-1)
    last = y2[:, -1, :]
    return last @ p["W_emb"].T + p["b_emb"]


# --------------------------------------------------------------------------
if __name__ == "__main__":
    # Pin matmul precision so the XLA reference and the Pallas kernel are
    # numerically comparable at a tight tolerance.
    jax.config.update("jax_default_matmul_precision", "highest")

    key = jax.random.PRNGKey(0)
    k_x, k_p, k_x2 = jax.random.split(key, 3)

    raw = init_raw_params(k_p)
    packed = pack_params(raw)
    ref_fn = jax.jit(encoder_ref)

    # --- config 1: module-scale shapes (static-unroll path) ---
    B, T = 2, 8
    x = jax.random.normal(k_x, (B, T, 1), jnp.float32)
    out = jax.block_until_ready(encoder_forward(x, packed))
    ref = jax.block_until_ready(ref_fn(x, raw))
    assert out.shape == (B, LATENT)
    assert jnp.allclose(out, ref, atol=2e-4, rtol=2e-4), (out, ref)

    # --- config 2: longer sequence / multi-block grid (fori_loop path) ---
    B2, T2 = 20, 40
    x2 = jax.random.normal(k_x2, (B2, T2, 1), jnp.float32)
    out2 = jax.block_until_ready(encoder_forward(x2, packed, block_batch=16))
    ref2 = jax.block_until_ready(ref_fn(x2, raw))
    assert out2.shape == (B2, LATENT)
    assert jnp.allclose(out2, ref2, atol=2e-4, rtol=2e-4), (out2, ref2)

    print("KERNEL_OK")
</pallas_src>

<mosaic_0001>
module attributes {stable_mosaic.version = 11 : i64} {
  func.func @_encoder_kernel(%arg0: i32, %arg1: memref<1x64x8xf32, #tpu.memory_space<vmem>>, %arg2: memref<32x96xf32, #tpu.memory_space<vmem>>, %arg3: memref<112x48xf32, #tpu.memory_space<vmem>>, %arg4: memref<8x12xf32, #tpu.memory_space<vmem>>, %arg5: memref<64x96xf32, #tpu.memory_space<vmem>>, %arg6: memref<64x12xf32, #tpu.memory_space<vmem>>, %arg7: memref<64x12xf32, #tpu.memory_space<vmem>>, %arg8: memref<64x48xf32, #tpu.memory_space<vmem>>) attributes {dimension_semantics = [#tpu.dimension_semantics<parallel>], iteration_bounds = array<i64: 1>, scalar_prefetch = 0 : i64, scratch_operands = 4 : i64, tpu.core_type = #tpu.core_type<tc>, window_params = [{transform_indices = @transform_0, window_bounds = array<i64: 1, 64, 8>}, {pipeline_mode = #tpu.pipeline_mode<synchronous>, transform_indices = @transform_1, window_bounds = array<i64: 32, 96>}, {pipeline_mode = #tpu.pipeline_mode<synchronous>, transform_indices = @transform_2, window_bounds = array<i64: 112, 48>}, {transform_indices = @transform_3, window_bounds = array<i64: 8, 12>}]} {
    %c0 = arith.constant 0 : index
    %c0_0 = arith.constant 0 : index
    %0 = vector.load %arg2[%c0, %c0_0] : memref<32x96xf32, #tpu.memory_space<vmem>>, vector<8x96xf32>
    %c0_1 = arith.constant 0 : index
    %c0_2 = arith.constant 0 : index
    %c0_3 = arith.constant 0 : index
    %1 = vector.load %arg1[%c0_1, %c0_2, %c0_3] : memref<1x64x8xf32, #tpu.memory_space<vmem>>, vector<1x64x8xf32>
    %2 = vector.shape_cast %1 : vector<1x64x8xf32> to vector<64x8xf32>
    %cst = arith.constant dense<0.000000e+00> : vector<64x96xf32>
    %3 = tpu.matmul %2, %0, %cst {dimension_numbers = #tpu.dot_dimension_numbers<[1], [0], [0], [1], [0, 0, 1, 1], [], []>, precision = #tpu.contract_precision<fp32>} : vector<64x8xf32>, vector<8x96xf32>, vector<64x96xf32> -> vector<64x96xf32>
    %c0_4 = arith.constant 0 : index
    %c0_5 = arith.constant 0 : index
    %4 = vector.load %arg5[%c0_4, %c0_5] : memref<64x96xf32, #tpu.memory_space<vmem>>, vector<64x96xf32>
    tpu.vector_store %arg5[%c0_4, %c0_5], %3 {strides = array<i32>} : memref<64x96xf32, #tpu.memory_space<vmem>>, vector<64x96xf32>,
    %c8 = arith.constant 8 : index
    %c0_6 = arith.constant 0 : index
    %5 = vector.load %arg2[%c8, %c0_6] : memref<32x96xf32, #tpu.memory_space<vmem>>, vector<24x96xf32>
    %cst_7 = arith.constant 0.000000e+00 : f32
    %6 = vector.broadcast %cst_7 : f32 to vector<8x24xf32>
    %c0_8 = arith.constant 0 : index
    %c0_9 = arith.constant 0 : index
    %7 = vector.load %arg5[%c0_8, %c0_9] : memref<64x96xf32, #tpu.memory_space<vmem>>, vector<8x96xf32>
    %cst_10 = arith.constant dense<0.000000e+00> : vector<8x96xf32>
    %8 = tpu.matmul %6, %5, %cst_10 {dimension_numbers = #tpu.dot_dimension_numbers<[1], [0], [0], [1], [0, 0, 1, 1], [], []>, precision = #tpu.contract_precision<fp32>} : vector<8x24xf32>, vector<24x96xf32>, vector<8x96xf32> -> vector<8x96xf32>
    %9 = arith.addf %7, %8 : vector<8x96xf32>
    %10 = arith.negf %9 : vector<8x96xf32>
    %11 = math.exp %10 : vector<8x96xf32>
    %cst_11 = arith.constant 1.000000e+00 : f32
    %12 = vector.broadcast %cst_11 : f32 to vector<8x96xf32>
    %13 = arith.addf %12, %11 : vector<8x96xf32>
    %14 = arith.divf %12, %13 : vector<8x96xf32>
    %15 = vector.extract_strided_slice %14 {offsets = [0, 0], sizes = [8, 24], strides = [1, 1]} : vector<8x96xf32> to vector<8x24xf32>
    %16 = vector.extract_strided_slice %14 {offsets = [0, 24], sizes = [8, 24], strides = [1, 1]} : vector<8x96xf32> to vector<8x24xf32>
    %17 = vector.extract_strided_slice %14 {offsets = [0, 48], sizes = [8, 24], strides = [1, 1]} : vector<8x96xf32> to vector<8x24xf32>
    %cst_12 = arith.constant 2.000000e+00 : f32
    %18 = vector.broadcast %cst_12 : f32 to vector<8x24xf32>
    %19 = arith.mulf %18, %17 : vector<8x24xf32>
    %cst_13 = arith.constant 1.000000e+00 : f32
    %20 = vector.broadcast %cst_13 : f32 to vector<8x24xf32>
    %21 = arith.subf %19, %20 : vector<8x24xf32>
    %22 = vector.extract_strided_slice %14 {offsets = [0, 72], sizes = [8, 24], strides = [1, 1]} : vector<8x96xf32> to vector<8x24xf32>
    %23 = arith.mulf %16, %6 : vector<8x24xf32>
    %24 = arith.mulf %15, %21 : vector<8x24xf32>
    %25 = arith.addf %23, %24 : vector<8x24xf32>
    %26 = math.tanh %25 : vector<8x24xf32>
    %27 = arith.mulf %22, %26 : vector<8x24xf32>
    %28 = vector.extract_strided_slice %27 {offsets = [0, 0], sizes = [8, 12], strides = [1, 1]} : vector<8x24xf32> to vector<8x12xf32>
    %c0_14 = arith.constant 0 : index
    %c0_15 = arith.constant 0 : index
    %29 = vector.load %arg6[%c0_14, %c0_15] : memref<64x12xf32, #tpu.memory_space<vmem>>, vector<8x12xf32>
    tpu.vector_store %arg6[%c0_14, %c0_15], %28 {strides = array<i32>} : memref<64x12xf32, #tpu.memory_space<vmem>>, vector<8x12xf32>,
    %30 = vector.extract_strided_slice %27 {offsets = [0, 12], sizes = [8, 12], strides = [1, 1]} : vector<8x24xf32> to vector<8x12xf32>
    %c56 = arith.constant 56 : index
    %c0_16 = arith.constant 0 : index
    %31 = vector.load %arg7[%c56, %c0_16] : memref<64x12xf32, #tpu.memory_space<vmem>>, vector<8x12xf32>
    tpu.vector_store %arg7[%c56, %c0_16], %30 {strides = array<i32>} : memref<64x12xf32, #tpu.memory_space<vmem>>, vector<8x12xf32>,
    %c8_17 = arith.constant 8 : index
    %c0_18 = arith.constant 0 : index
    %32 = vector.load %arg5[%c8_17, %c0_18] : memref<64x96xf32, #tpu.memory_space<vmem>>, vector<8x96xf32>
    %cst_19 = arith.constant dense<0.000000e+00> : vector<8x96xf32>
    %33 = tpu.matmul %27, %5, %cst_19 {dimension_numbers = #tpu.dot_dimension_numbers<[1], [0], [0], [1], [0, 0, 1, 1], [], []>, precision = #tpu.contract_precision<fp32>} : vector<8x24xf32>, vector<24x96xf32>, vector<8x96xf32> -> vector<8x96xf32>
    %34 = arith.addf %32, %33 : vector<8x96xf32>
    %35 = arith.negf %34 : vector<8x96xf32>
    %36 = math.exp %35 : vector<8x96xf32>
    %cst_20 = arith.constant 1.000000e+00 : f32
    %37 = vector.broadcast %cst_20 : f32 to vector<8x96xf32>
    %38 = arith.addf %37, %36 : vector<8x96xf32>
    %39 = arith.divf %37, %38 : vector<8x96xf32>
    %40 = vector.extract_strided_slice %39 {offsets = [0, 0], sizes = [8, 24], strides = [1, 1]} : vector<8x96xf32> to vector<8x24xf32>
    %41 = vector.extract_strided_slice %39 {offsets = [0, 24], sizes = [8, 24], strides = [1, 1]} : vector<8x96xf32> to vector<8x24xf32>
    %42 = vector.extract_strided_slice %39 {offsets = [0, 48], sizes = [8, 24], strides = [1, 1]} : vector<8x96xf32> to vector<8x24xf32>
    %cst_21 = arith.constant 2.000000e+00 : f32
    %43 = vector.broadcast %cst_21 : f32 to vector<8x24xf32>
    %44 = arith.mulf %43, %42 : vector<8x24xf32>
    %cst_22 = arith.constant 1.000000e+00 : f32
    %45 = vector.broadcast %cst_22 : f32 to vector<8x24xf32>
    %46 = arith.subf %44, %45 : vector<8x24xf32>
    %47 = vector.extract_strided_slice %39 {offsets = [0, 72], sizes = [8, 24], strides = [1, 1]} : vector<8x96xf32> to vector<8x24xf32>
    %48 = arith.mulf %41, %25 : vector<8x24xf32>
    %49 = arith.mulf %40, %46 : vector<8x24xf32>
    %50 = arith.addf %48, %49 : vector<8x24xf32>
    %51 = math.tanh %50 : vector<8x24xf32>
    %52 = arith.mulf %47, %51 : vector<8x24xf32>
    %53 = vector.extract_strided_slice %52 {offsets = [0, 0], sizes = [8, 12], strides = [1, 1]} : vector<8x24xf32> to vector<8x12xf32>
    %c8_23 = arith.constant 8 : index
    %c0_24 = arith.constant 0 : index
    %54 = vector.load %arg6[%c8_23, %c0_24] : memref<64x12xf32, #tpu.memory_space<vmem>>, vector<8x12xf32>
    tpu.vector_store %arg6[%c8_23, %c0_24], %53 {strides = array<i32>} : memref<64x12xf32, #tpu.memory_space<vmem>>, vector<8x12xf32>,
    %55 = vector.extract_strided_slice %52 {offsets = [0, 12], sizes = [8, 12], strides = [1, 1]} : vector<8x24xf32> to vector<8x12xf32>
    %c48 = arith.constant 48 : index
    %c0_25 = arith.constant 0 : index
    %56 = vector.load %arg7[%c48, %c0_25] : memref<64x12xf32, #tpu.memory_space<vmem>>, vector<8x12xf32>
    tpu.vector_store %arg7[%c48, %c0_25], %55 {strides = array<i32>} : memref<64x12xf32, #tpu.memory_space<vmem>>, vector<8x12xf32>,
    %c16 = arith.constant 16 : index
    %c0_26 = arith.constant 0 : index
    %57 = vector.load %arg5[%c16, %c0_26] : memref<64x96xf32, #tpu.memory_space<vmem>>, vector<8x96xf32>
    %cst_27 = arith.constant dense<0.000000e+00> : vector<8x96xf32>
    %58 = tpu.matmul %52, %5, %cst_27 {dimension_numbers = #tpu.dot_dimension_numbers<[1], [0], [0], [1], [0, 0, 1, 1], [], []>, precision = #tpu.contract_precision<fp32>} : vector<8x24xf32>, vector<24x96xf32>, vector<8x96xf32> -> vector<8x96xf32>
    %59 = arith.addf %57, %58 : vector<8x96xf32>
    %60 = arith.negf %59 : vector<8x96xf32>
    %61 = math.exp %60 : vector<8x96xf32>
    %cst_28 = arith.constant 1.000000e+00 : f32
    %62 = vector.broadcast %cst_28 : f32 to vector<8x96xf32>
    %63 = arith.addf %62, %61 : vector<8x96xf32>
    %64 = arith.divf %62, %63 : vector<8x96xf32>
    %65 = vector.extract_strided_slice %64 {offsets = [0, 0], sizes = [8, 24], strides = [1, 1]} : vector<8x96xf32> to vector<8x24xf32>
    %66 = vector.extract_strided_slice %64 {offsets = [0, 24], sizes = [8, 24], strides = [1, 1]} : vector<8x96xf32> to vector<8x24xf32>
    %67 = vector.extract_strided_slice %64 {offsets = [0, 48], sizes = [8, 24], strides = [1, 1]} : vector<8x96xf32> to vector<8x24xf32>
    %cst_29 = arith.constant 2.000000e+00 : f32
    %68 = vector.broadcast %cst_29 : f32 to vector<8x24xf32>
    %69 = arith.mulf %68, %67 : vector<8x24xf32>
    %cst_30 = arith.constant 1.000000e+00 : f32
    %70 = vector.broadcast %cst_30 : f32 to vector<8x24xf32>
    %71 = arith.subf %69, %70 : vector<8x24xf32>
    %72 = vector.extract_strided_slice %64 {offsets = [0, 72], sizes = [8, 24], strides = [1, 1]} : vector<8x96xf32> to vector<8x24xf32>
    %73 = arith.mulf %66, %50 : vector<8x24xf32>
    %74 = arith.mulf %65, %71 : vector<8x24xf32>
    %75 = arith.addf %73, %74 : vector<8x24xf32>
    %76 = math.tanh %75 : vector<8x24xf32>
    %77 = arith.mulf %72, %76 : vector<8x24xf32>
    %78 = vector.extract_strided_slice %77 {offsets = [0, 0], sizes = [8, 12], strides = [1, 1]} : vector<8x24xf32> to vector<8x12xf32>
    %c16_31 = arith.constant 16 : index
    %c0_32 = arith.constant 0 : index
    %79 = vector.load %arg6[%c16_31, %c0_32] : memref<64x12xf32, #tpu.memory_space<vmem>>, vector<8x12xf32>
    tpu.vector_store %arg6[%c16_31, %c0_32], %78 {strides = array<i32>} : memref<64x12xf32, #tpu.memory_space<vmem>>, vector<8x12xf32>,
    %80 = vector.extract_strided_slice %77 {offsets = [0, 12], sizes = [8, 12], strides = [1, 1]} : vector<8x24xf32> to vector<8x12xf32>
    %c40 = arith.constant 40 : index
    %c0_33 = arith.constant 0 : index
    %81 = vector.load %arg7[%c40, %c0_33] : memref<64x12xf32, #tpu.memory_space<vmem>>, vector<8x12xf32>
    tpu.vector_store %arg7[%c40, %c0_33], %80 {strides = array<i32>} : memref<64x12xf32, #tpu.memory_space<vmem>>, vector<8x12xf32>,
    %c24 = arith.constant 24 : index
    %c0_34 = arith.constant 0 : index
    %82 = vector.load %arg5[%c24, %c0_34] : memref<64x96xf32, #tpu.memory_space<vmem>>, vector<8x96xf32>
    %cst_35 = arith.constant dense<0.000000e+00> : vector<8x96xf32>
    %83 = tpu.matmul %77, %5, %cst_35 {dimension_numbers = #tpu.dot_dimension_numbers<[1], [0], [0], [1], [0, 0, 1, 1], [], []>, precision = #tpu.contract_precision<fp32>} : vector<8x24xf32>, vector<24x96xf32>, vector<8x96xf32> -> vector<8x96xf32>
    %84 = arith.addf %82, %83 : vector<8x96xf32>
    %85 = arith.negf %84 : vector<8x96xf32>
    %86 = math.exp %85 : vector<8x96xf32>
    %cst_36 = arith.constant 1.000000e+00 : f32
    %87 = vector.broadcast %cst_36 : f32 to vector<8x96xf32>
    %88 = arith.addf %87, %86 : vector<8x96xf32>
    %89 = arith.divf %87, %88 : vector<8x96xf32>
    %90 = vector.extract_strided_slice %89 {offsets = [0, 0], sizes = [8, 24], strides = [1, 1]} : vector<8x96xf32> to vector<8x24xf32>
    %91 = vector.extract_strided_slice %89 {offsets = [0, 24], sizes = [8, 24], strides = [1, 1]} : vector<8x96xf32> to vector<8x24xf32>
    %92 = vector.extract_strided_slice %89 {offsets = [0, 48], sizes = [8, 24], strides = [1, 1]} : vector<8x96xf32> to vector<8x24xf32>
    %cst_37 = arith.constant 2.000000e+00 : f32
    %93 = vector.broadcast %cst_37 : f32 to vector<8x24xf32>
    %94 = arith.mulf %93, %92 : vector<8x24xf32>
    %cst_38 = arith.constant 1.000000e+00 : f32
    %95 = vector.broadcast %cst_38 : f32 to vector<8x24xf32>
    %96 = arith.subf %94, %95 : vector<8x24xf32>
    %97 = vector.extract_strided_slice %89 {offsets = [0, 72], sizes = [8, 24], strides = [1, 1]} : vector<8x96xf32> to vector<8x24xf32>
    %98 = arith.mulf %91, %75 : vector<8x24xf32>
    %99 = arith.mulf %90, %96 : vector<8x24xf32>
    %100 = arith.addf %98, %99 : vector<8x24xf32>
    %101 = math.tanh %100 : vector<8x24xf32>
    %102 = arith.mulf %97, %101 : vector<8x24xf32>
    %103 = vector.extract_strided_slice %102 {offsets = [0, 0], sizes = [8, 12], strides = [1, 1]} : vector<8x24xf32> to vector<8x12xf32>
    %c24_39 = arith.constant 24 : index
    %c0_40 = arith.constant 0 : index
    %104 = vector.load %arg6[%c24_39, %c0_40] : memref<64x12xf32, #tpu.memory_space<vmem>>, vector<8x12xf32>
    tpu.vector_store %arg6[%c24_39, %c0_40], %103 {strides = array<i32>} : memref<64x12xf32, #tpu.memory_space<vmem>>, vector<8x12xf32>,
    %105 = vector.extract_strided_slice %102 {offsets = [0, 12], sizes = [8, 12], strides = [1, 1]} : vector<8x24xf32> to vector<8x12xf32>
    %c32 = arith.constant 32 : index
    %c0_41 = arith.constant 0 : index
    %106 = vector.load %arg7[%c32, %c0_41] : memref<64x12xf32, #tpu.memory_space<vmem>>, vector<8x12xf32>
    tpu.vector_store %arg7[%c32, %c0_41], %105 {strides = array<i32>} : memref<64x12xf32, #tpu.memory_space<vmem>>, vector<8x12xf32>,
    %c32_42 = arith.constant 32 : index
    %c0_43 = arith.constant 0 : index
    %107 = vector.load %arg5[%c32_42, %c0_43] : memref<64x96xf32, #tpu.memory_space<vmem>>, vector<8x96xf32>
    %cst_44 = arith.constant dense<0.000000e+00> : vector<8x96xf32>
    %108 = tpu.matmul %102, %5, %cst_44 {dimension_numbers = #tpu.dot_dimension_numbers<[1], [0], [0], [1], [0, 0, 1, 1], [], []>, precision = #tpu.contract_precision<fp32>} : vector<8x24xf32>, vector<24x96xf32>, vector<8x96xf32> -> vector<8x96xf32>
    %109 = arith.addf %107, %108 : vector<8x96xf32>
    %110 = arith.negf %109 : vector<8x96xf32>
    %111 = math.exp %110 : vector<8x96xf32>
    %cst_45 = arith.constant 1.000000e+00 : f32
    %112 = vector.broadcast %cst_45 : f32 to vector<8x96xf32>
    %113 = arith.addf %112, %111 : vector<8x96xf32>
    %114 = arith.divf %112, %113 : vector<8x96xf32>
    %115 = vector.extract_strided_slice %114 {offsets = [0, 0], sizes = [8, 24], strides = [1, 1]} : vector<8x96xf32> to vector<8x24xf32>
    %116 = vector.extract_strided_slice %114 {offsets = [0, 24], sizes = [8, 24], strides = [1, 1]} : vector<8x96xf32> to vector<8x24xf32>
    %117 = vector.extract_strided_slice %114 {offsets = [0, 48], sizes = [8, 24], strides = [1, 1]} : vector<8x96xf32> to vector<8x24xf32>
    %cst_46 = arith.constant 2.000000e+00 : f32
    %118 = vector.broadcast %cst_46 : f32 to vector<8x24xf32>
    %119 = arith.mulf %118, %117 : vector<8x24xf32>
    %cst_47 = arith.constant 1.000000e+00 : f32
    %120 = vector.broadcast %cst_47 : f32 to vector<8x24xf32>
    %121 = arith.subf %119, %120 : vector<8x24xf32>
    %122 = vector.extract_strided_slice %114 {offsets = [0, 72], sizes = [8, 24], strides = [1, 1]} : vector<8x96xf32> to vector<8x24xf32>
    %123 = arith.mulf %116, %100 : vector<8x24xf32>
    %124 = arith.mulf %115, %121 : vector<8x24xf32>
    %125 = arith.addf %123, %124 : vector<8x24xf32>
    %126 = math.tanh %125 : vector<8x24xf32>
    %127 = arith.mulf %122, %126 : vector<8x24xf32>
    %128 = vector.extract_strided_slice %127 {offsets = [0, 0], sizes = [8, 12], strides = [1, 1]} : vector<8x24xf32> to vector<8x12xf32>
    %c32_48 = arith.constant 32 : index
    %c0_49 = arith.constant 0 : index
    %129 = vector.load %arg6[%c32_48, %c0_49] : memref<64x12xf32, #tpu.memory_space<vmem>>, vector<8x12xf32>
    tpu.vector_store %arg6[%c32_48, %c0_49], %128 {strides = array<i32>} : memref<64x12xf32, #tpu.memory_space<vmem>>, vector<8x12xf32>,
    %130 = vector.extract_strided_slice %127 {offsets = [0, 12], sizes = [8, 12], strides = [1, 1]} : vector<8x24xf32> to vector<8x12xf32>
    %c24_50 = arith.constant 24 : index
    %c0_51 = arith.constant 0 : index
    %131 = vector.load %arg7[%c24_50, %c0_51] : memref<64x12xf32, #tpu.memory_space<vmem>>, vector<8x12xf32>
    tpu.vector_store %arg7[%c24_50, %c0_51], %130 {strides = array<i32>} : memref<64x12xf32, #tpu.memory_space<vmem>>, vector<8x12xf32>,
    %c40_52 = arith.constant 40 : index
    %c0_53 = arith.constant 0 : index
    %132 = vector.load %arg5[%c40_52, %c0_53] : memref<64x96xf32, #tpu.memory_space<vmem>>, vector<8x96xf32>
    %cst_54 = arith.constant dense<0.000000e+00> : vector<8x96xf32>
    %133 = tpu.matmul %127, %5, %cst_54 {dimension_numbers = #tpu.dot_dimension_numbers<[1], [0], [0], [1], [0, 0, 1, 1], [], []>, precision = #tpu.contract_precision<fp32>} : vector<8x24xf32>, vector<24x96xf32>, vector<8x96xf32> -> vector<8x96xf32>
    %134 = arith.addf %132, %133 : vector<8x96xf32>
    %135 = arith.negf %134 : vector<8x96xf32>
    %136 = math.exp %135 : vector<8x96xf32>
    %cst_55 = arith.constant 1.000000e+00 : f32
    %137 = vector.broadcast %cst_55 : f32 to vector<8x96xf32>
    %138 = arith.addf %137, %136 : vector<8x96xf32>
    %139 = arith.divf %137, %138 : vector<8x96xf32>
    %140 = vector.extract_strided_slice %139 {offsets = [0, 0], sizes = [8, 24], strides = [1, 1]} : vector<8x96xf32> to vector<8x24xf32>
    %141 = vector.extract_strided_slice %139 {offsets = [0, 24], sizes = [8, 24], strides = [1, 1]} : vector<8x96xf32> to vector<8x24xf32>
    %142 = vector.extract_strided_slice %139 {offsets = [0, 48], sizes = [8, 24], strides = [1, 1]} : vector<8x96xf32> to vector<8x24xf32>
    %cst_56 = arith.constant 2.000000e+00 : f32
    %143 = vector.broadcast %cst_56 : f32 to vector<8x24xf32>
    %144 = arith.mulf %143, %142 : vector<8x24xf32>
    %cst_57 = arith.constant 1.000000e+00 : f32
    %145 = vector.broadcast %cst_57 : f32 to vector<8x24xf32>
    %146 = arith.subf %144, %145 : vector<8x24xf32>
    %147 = vector.extract_strided_slice %139 {offsets = [0, 72], sizes = [8, 24], strides = [1, 1]} : vector<8x96xf32> to vector<8x24xf32>
    %148 = arith.mulf %141, %125 : vector<8x24xf32>
    %149 = arith.mulf %140, %146 : vector<8x24xf32>
    %150 = arith.addf %148, %149 : vector<8x24xf32>
    %151 = math.tanh %150 : vector<8x24xf32>
    %152 = arith.mulf %147, %151 : vector<8x24xf32>
    %153 = vector.extract_strided_slice %152 {offsets = [0, 0], sizes = [8, 12], strides = [1, 1]} : vector<8x24xf32> to vector<8x12xf32>
    %c40_58 = arith.constant 40 : index
    %c0_59 = arith.constant 0 : index
    %154 = vector.load %arg6[%c40_58, %c0_59] : memref<64x12xf32, #tpu.memory_space<vmem>>, vector<8x12xf32>
    tpu.vector_store %arg6[%c40_58, %c0_59], %153 {strides = array<i32>} : memref<64x12xf32, #tpu.memory_space<vmem>>, vector<8x12xf32>,
    %155 = vector.extract_strided_slice %152 {offsets = [0, 12], sizes = [8, 12], strides = [1, 1]} : vector<8x24xf32> to vector<8x12xf32>
    %c16_60 = arith.constant 16 : index
    %c0_61 = arith.constant 0 : index
    %156 = vector.load %arg7[%c16_60, %c0_61] : memref<64x12xf32, #tpu.memory_space<vmem>>, vector<8x12xf32>
    tpu.vector_store %arg7[%c16_60, %c0_61], %155 {strides = array<i32>} : memref<64x12xf32, #tpu.memory_space<vmem>>, vector<8x12xf32>,
    %c48_62 = arith.constant 48 : index
    %c0_63 = arith.constant 0 : index
    %157 = vector.load %arg5[%c48_62, %c0_63] : memref<64x96xf32, #tpu.memory_space<vmem>>, vector<8x96xf32>
    %cst_64 = arith.constant dense<0.000000e+00> : vector<8x96xf32>
    %158 = tpu.matmul %152, %5, %cst_64 {dimension_numbers = #tpu.dot_dimension_numbers<[1], [0], [0], [1], [0, 0, 1, 1], [], []>, precision = #tpu.contract_precision<fp32>} : vector<8x24xf32>, vector<24x96xf32>, vector<8x96xf32> -> vector<8x96xf32>
    %159 = arith.addf %157, %158 : vector<8x96xf32>
    %160 = arith.negf %159 : vector<8x96xf32>
    %161 = math.exp %160 : vector<8x96xf32>
    %cst_65 = arith.constant 1.000000e+00 : f32
    %162 = vector.broadcast %cst_65 : f32 to vector<8x96xf32>
    %163 = arith.addf %162, %161 : vector<8x96xf32>
    %164 = arith.divf %162, %163 : vector<8x96xf32>
    %165 = vector.extract_strided_slice %164 {offsets = [0, 0], sizes = [8, 24], strides = [1, 1]} : vector<8x96xf32> to vector<8x24xf32>
    %166 = vector.extract_strided_slice %164 {offsets = [0, 24], sizes = [8, 24], strides = [1, 1]} : vector<8x96xf32> to vector<8x24xf32>
    %167 = vector.extract_strided_slice %164 {offsets = [0, 48], sizes = [8, 24], strides = [1, 1]} : vector<8x96xf32> to vector<8x24xf32>
    %cst_66 = arith.constant 2.000000e+00 : f32
    %168 = vector.broadcast %cst_66 : f32 to vector<8x24xf32>
    %169 = arith.mulf %168, %167 : vector<8x24xf32>
    %cst_67 = arith.constant 1.000000e+00 : f32
    %170 = vector.broadcast %cst_67 : f32 to vector<8x24xf32>
    %171 = arith.subf %169, %170 : vector<8x24xf32>
    %172 = vector.extract_strided_slice %164 {offsets = [0, 72], sizes = [8, 24], strides = [1, 1]} : vector<8x96xf32> to vector<8x24xf32>
    %173 = arith.mulf %166, %150 : vector<8x24xf32>
    %174 = arith.mulf %165, %171 : vector<8x24xf32>
    %175 = arith.addf %173, %174 : vector<8x24xf32>
    %176 = math.tanh %175 : vector<8x24xf32>
    %177 = arith.mulf %172, %176 : vector<8x24xf32>
    %178 = vector.extract_strided_slice %177 {offsets = [0, 0], sizes = [8, 12], strides = [1, 1]} : vector<8x24xf32> to vector<8x12xf32>
    %c48_68 = arith.constant 48 : index
    %c0_69 = arith.constant 0 : index
    %179 = vector.load %arg6[%c48_68, %c0_69] : memref<64x12xf32, #tpu.memory_space<vmem>>, vector<8x12xf32>
    tpu.vector_store %arg6[%c48_68, %c0_69], %178 {strides = array<i32>} : memref<64x12xf32, #tpu.memory_space<vmem>>, vector<8x12xf32>,
    %180 = vector.extract_strided_slice %177 {offsets = [0, 12], sizes = [8, 12], strides = [1, 1]} : vector<8x24xf32> to vector<8x12xf32>
    %c8_70 = arith.constant 8 : index
    %c0_71 = arith.constant 0 : index
    %181 = vector.load %arg7[%c8_70, %c0_71] : memref<64x12xf32, #tpu.memory_space<vmem>>, vector<8x12xf32>
    tpu.vector_store %arg7[%c8_70, %c0_71], %180 {strides = array<i32>} : memref<64x12xf32, #tpu.memory_space<vmem>>, vector<8x12xf32>,
    %c56_72 = arith.constant 56 : index
    %c0_73 = arith.constant 0 : index
    %182 = vector.load %arg5[%c56_72, %c0_73] : memref<64x96xf32, #tpu.memory_space<vmem>>, vector<8x96xf32>
    %cst_74 = arith.constant dense<0.000000e+00> : vector<8x96xf32>
    %183 = tpu.matmul %177, %5, %cst_74 {dimension_numbers = #tpu.dot_dimension_numbers<[1], [0], [0], [1], [0, 0, 1, 1], [], []>, precision = #tpu.contract_precision<fp32>} : vector<8x24xf32>, vector<24x96xf32>, vector<8x96xf32> -> vector<8x96xf32>
    %184 = arith.addf %182, %183 : vector<8x96xf32>
    %185 = arith.negf %184 : vector<8x96xf32>
    %186 = math.exp %185 : vector<8x96xf32>
    %cst_75 = arith.constant 1.000000e+00 : f32
    %187 = vector.broadcast %cst_75 : f32 to vector<8x96xf32>
    %188 = arith.addf %187, %186 : vector<8x96xf32>
    %189 = arith.divf %187, %188 : vector<8x96xf32>
    %190 = vector.extract_strided_slice %189 {offsets = [0, 0], sizes = [8, 24], strides = [1, 1]} : vector<8x96xf32> to vector<8x24xf32>
    %191 = vector.extract_strided_slice %189 {offsets = [0, 24], sizes = [8, 24], strides = [1, 1]} : vector<8x96xf32> to vector<8x24xf32>
    %192 = vector.extract_strided_slice %189 {offsets = [0, 48], sizes = [8, 24], strides = [1, 1]} : vector<8x96xf32> to vector<8x24xf32>
    %cst_76 = arith.constant 2.000000e+00 : f32
    %193 = vector.broadcast %cst_76 : f32 to vector<8x24xf32>
    %194 = arith.mulf %193, %192 : vector<8x24xf32>
    %cst_77 = arith.constant 1.000000e+00 : f32
    %195 = vector.broadcast %cst_77 : f32 to vector<8x24xf32>
    %196 = arith.subf %194, %195 : vector<8x24xf32>
    %197 = vector.extract_strided_slice %189 {offsets = [0, 72], sizes = [8, 24], strides = [1, 1]} : vector<8x96xf32> to vector<8x24xf32>
    %198 = arith.mulf %191, %175 : vector<8x24xf32>
    %199 = arith.mulf %190, %196 : vector<8x24xf32>
    %200 = arith.addf %198, %199 : vector<8x24xf32>
    %201 = math.tanh %200 : vector<8x24xf32>
    %202 = arith.mulf %197, %201 : vector<8x24xf32>
    %203 = vector.extract_strided_slice %202 {offsets = [0, 0], sizes = [8, 12], strides = [1, 1]} : vector<8x24xf32> to vector<8x12xf32>
    %c56_78 = arith.constant 56 : index
    %c0_79 = arith.constant 0 : index
    %204 = vector.load %arg6[%c56_78, %c0_79] : memref<64x12xf32, #tpu.memory_space<vmem>>, vector<8x12xf32>
    tpu.vector_store %arg6[%c56_78, %c0_79], %203 {strides = array<i32>} : memref<64x12xf32, #tpu.memory_space<vmem>>, vector<8x12xf32>,
    %205 = vector.extract_strided_slice %202 {offsets = [0, 12], sizes = [8, 12], strides = [1, 1]} : vector<8x24xf32> to vector<8x12xf32>
    %c0_80 = arith.constant 0 : index
    %c0_81 = arith.constant 0 : index
    %206 = vector.load %arg7[%c0_80, %c0_81] : memref<64x12xf32, #tpu.memory_space<vmem>>, vector<8x12xf32>
    tpu.vector_store %arg7[%c0_80, %c0_81], %205 {strides = array<i32>} : memref<64x12xf32, #tpu.memory_space<vmem>>, vector<8x12xf32>,
    %c0_82 = arith.constant 0 : index
    %c0_83 = arith.constant 0 : index
    %207 = vector.load %arg3[%c0_82, %c0_83] : memref<112x48xf32, #tpu.memory_space<vmem>>, vector<12x48xf32>
    %c12 = arith.constant 12 : index
    %c0_84 = arith.constant 0 : index
    %208 = vector.load %arg3[%c12, %c0_84] : memref<112x48xf32, #tpu.memory_space<vmem>>, vector<12x48xf32>
    %c88 = arith.constant 88 : index
    %c0_85 = arith.constant 0 : index
    %209 = vector.load %arg3[%c88, %c0_85] : memref<112x48xf32, #tpu.memory_space<vmem>>, vector<1x48xf32>
    %c0_86 = arith.constant 0 : index
    %c0_87 = arith.constant 0 : index
    %210 = vector.load %arg6[%c0_86, %c0_87] : memref<64x12xf32, #tpu.memory_space<vmem>>, vector<64x12xf32>
    %cst_88 = arith.constant dense<0.000000e+00> : vector<64x48xf32>
    %211 = tpu.matmul %210, %207, %cst_88 {dimension_numbers = #tpu.dot_dimension_numbers<[1], [0], [0], [1], [0, 0, 1, 1], [], []>, precision = #tpu.contract_precision<fp32>} : vector<64x12xf32>, vector<12x48xf32>, vector<64x48xf32> -> vector<64x48xf32>
    %c0_89 = arith.constant 0 : index
    %c0_90 = arith.constant 0 : index
    %212 = vector.load %arg7[%c0_89, %c0_90] : memref<64x12xf32, #tpu.memory_space<vmem>>, vector<64x12xf32>
    %cst_91 = arith.constant dense<0.000000e+00> : vector<64x48xf32>
    %213 = tpu.matmul %212, %208, %cst_91 {dimension_numbers = #tpu.dot_dimension_numbers<[1], [0], [0], [1], [0, 0, 1, 1], [], []>, precision = #tpu.contract_precision<fp32>} : vector<64x12xf32>, vector<12x48xf32>, vector<64x48xf32> -> vector<64x48xf32>
    %214 = arith.addf %211, %213 : vector<64x48xf32>
    %215 = vector.broadcast %209 : vector<1x48xf32> to vector<64x48xf32>
    %216 = arith.addf %214, %215 : vector<64x48xf32>
    %c0_92 = arith.constant 0 : index
    %c0_93 = arith.constant 0 : index
    %217 = vector.load %arg8[%c0_92, %c0_93] : memref<64x48xf32, #tpu.memory_space<vmem>>, vector<64x48xf32>
    tpu.vector_store %arg8[%c0_92, %c0_93], %216 {strides = array<i32>} : memref<64x48xf32, #tpu.memory_space<vmem>>, vector<64x48xf32>,
    %c24_94 = arith.constant 24 : index
    %c0_95 = arith.constant 0 : index
    %218 = vector.load %arg3[%c24_94, %c0_95] : memref<112x48xf32, #tpu.memory_space<vmem>>, vector<12x48xf32>
    %cst_96 = arith.constant 0.000000e+00 : f32
    %219 = vector.broadcast %cst_96 : f32 to vector<8x12xf32>
    %c0_97 = arith.constant 0 : index
    %c0_98 = arith.constant 0 : index
    %220 = vector.load %arg8[%c0_97, %c0_98] : memref<64x48xf32, #tpu.memory_space<vmem>>, vector<8x48xf32>
    %cst_99 = arith.constant dense<0.000000e+00> : vector<8x48xf32>
    %221 = tpu.matmul %219, %218, %cst_99 {dimension_numbers = #tpu.dot_dimension_numbers<[1], [0], [0], [1], [0, 0, 1, 1], [], []>, precision = #tpu.contract_precision<fp32>} : vector<8x12xf32>, vector<12x48xf32>, vector<8x48xf32> -> vector<8x48xf32>
    %222 = arith.addf %220, %221 : vector<8x48xf32>
    %223 = arith.negf %222 : vector<8x48xf32>
    %224 = math.exp %223 : vector<8x48xf32>
    %cst_100 = arith.constant 1.000000e+00 : f32
    %225 = vector.broadcast %cst_100 : f32 to vector<8x48xf32>
    %226 = arith.addf %225, %224 : vector<8x48xf32>
    %227 = arith.divf %225, %226 : vector<8x48xf32>
    %228 = vector.extract_strided_slice %227 {offsets = [0, 0], sizes = [8, 12], strides = [1, 1]} : vector<8x48xf32> to vector<8x12xf32>
    %229 = vector.extract_strided_slice %227 {offsets = [0, 12], sizes = [8, 12], strides = [1, 1]} : vector<8x48xf32> to vector<8x12xf32>
    %230 = vector.extract_strided_slice %227 {offsets = [0, 24], sizes = [8, 12], strides = [1, 1]} : vector<8x48xf32> to vector<8x12xf32>
    %cst_101 = arith.constant 2.000000e+00 : f32
    %231 = vector.broadcast %cst_101 : f32 to vector<8x12xf32>
    %232 = arith.mulf %231, %230 : vector<8x12xf32>
    %cst_102 = arith.constant 1.000000e+00 : f32
    %233 = vector.broadcast %cst_102 : f32 to vector<8x12xf32>
    %234 = arith.subf %232, %233 : vector<8x12xf32>
    %235 = vector.extract_strided_slice %227 {offsets = [0, 36], sizes = [8, 12], strides = [1, 1]} : vector<8x48xf32> to vector<8x12xf32>
    %236 = arith.mulf %229, %219 : vector<8x12xf32>
    %237 = arith.mulf %228, %234 : vector<8x12xf32>
    %238 = arith.addf %236, %237 : vector<8x12xf32>
    %239 = math.tanh %238 : vector<8x12xf32>
    %240 = arith.mulf %235, %239 : vector<8x12xf32>
    %c8_103 = arith.constant 8 : index
    %c0_104 = arith.constant 0 : index
    %241 = vector.load %arg8[%c8_103, %c0_104] : memref<64x48xf32, #tpu.memory_space<vmem>>, vector<8x48xf32>
    %cst_105 = arith.constant dense<0.000000e+00> : vector<8x48xf32>
    %242 = tpu.matmul %240, %218, %cst_105 {dimension_numbers = #tpu.dot_dimension_numbers<[1], [0], [0], [1], [0, 0, 1, 1], [], []>, precision = #tpu.contract_precision<fp32>} : vector<8x12xf32>, vector<12x48xf32>, vector<8x48xf32> -> vector<8x48xf32>
    %243 = arith.addf %241, %242 : vector<8x48xf32>
    %244 = arith.negf %243 : vector<8x48xf32>
    %245 = math.exp %244 : vector<8x48xf32>
    %cst_106 = arith.constant 1.000000e+00 : f32
    %246 = vector.broadcast %cst_106 : f32 to vector<8x48xf32>
    %247 = arith.addf %246, %245 : vector<8x48xf32>
    %248 = arith.divf %246, %247 : vector<8x48xf32>
    %249 = vector.extract_strided_slice %248 {offsets = [0, 0], sizes = [8, 12], strides = [1, 1]} : vector<8x48xf32> to vector<8x12xf32>
    %250 = vector.extract_strided_slice %248 {offsets = [0, 12], sizes = [8, 12], strides = [1, 1]} : vector<8x48xf32> to vector<8x12xf32>
    %251 = vector.extract_strided_slice %248 {offsets = [0, 24], sizes = [8, 12], strides = [1, 1]} : vector<8x48xf32> to vector<8x12xf32>
    %cst_107 = arith.constant 2.000000e+00 : f32
    %252 = vector.broadcast %cst_107 : f32 to vector<8x12xf32>
    %253 = arith.mulf %252, %251 : vector<8x12xf32>
    %cst_108 = arith.constant 1.000000e+00 : f32
    %254 = vector.broadcast %cst_108 : f32 to vector<8x12xf32>
    %255 = arith.subf %253, %254 : vector<8x12xf32>
    %256 = vector.extract_strided_slice %248 {offsets = [0, 36], sizes = [8, 12], strides = [1, 1]} : vector<8x48xf32> to vector<8x12xf32>
    %257 = arith.mulf %250, %238 : vector<8x12xf32>
    %258 = arith.mulf %249, %255 : vector<8x12xf32>
    %259 = arith.addf %257, %258 : vector<8x12xf32>
    %260 = math.tanh %259 : vector<8x12xf32>
    %261 = arith.mulf %256, %260 : vector<8x12xf32>
    %c16_109 = arith.constant 16 : index
    %c0_110 = arith.constant 0 : index
    %262 = vector.load %arg8[%c16_109, %c0_110] : memref<64x48xf32, #tpu.memory_space<vmem>>, vector<8x48xf32>
    %cst_111 = arith.constant dense<0.000000e+00> : vector<8x48xf32>
    %263 = tpu.matmul %261, %218, %cst_111 {dimension_numbers = #tpu.dot_dimension_numbers<[1], [0], [0], [1], [0, 0, 1, 1], [], []>, precision = #tpu.contract_precision<fp32>} : vector<8x12xf32>, vector<12x48xf32>, vector<8x48xf32> -> vector<8x48xf32>
    %264 = arith.addf %262, %263 : vector<8x48xf32>
    %265 = arith.negf %264 : vector<8x48xf32>
    %266 = math.exp %265 : vector<8x48xf32>
    %cst_112 = arith.constant 1.000000e+00 : f32
    %267 = vector.broadcast %cst_112 : f32 to vector<8x48xf32>
    %268 = arith.addf %267, %266 : vector<8x48xf32>
    %269 = arith.divf %267, %268 : vector<8x48xf32>
    %270 = vector.extract_strided_slice %269 {offsets = [0, 0], sizes = [8, 12], strides = [1, 1]} : vector<8x48xf32> to vector<8x12xf32>
    %271 = vector.extract_strided_slice %269 {offsets = [0, 12], sizes = [8, 12], strides = [1, 1]} : vector<8x48xf32> to vector<8x12xf32>
    %272 = vector.extract_strided_slice %269 {offsets = [0, 24], sizes = [8, 12], strides = [1, 1]} : vector<8x48xf32> to vector<8x12xf32>
    %cst_113 = arith.constant 2.000000e+00 : f32
    %273 = vector.broadcast %cst_113 : f32 to vector<8x12xf32>
    %274 = arith.mulf %273, %272 : vector<8x12xf32>
    %cst_114 = arith.constant 1.000000e+00 : f32
    %275 = vector.broadcast %cst_114 : f32 to vector<8x12xf32>
    %276 = arith.subf %274, %275 : vector<8x12xf32>
    %277 = vector.extract_strided_slice %269 {offsets = [0, 36], sizes = [8, 12], strides = [1, 1]} : vector<8x48xf32> to vector<8x12xf32>
    %278 = arith.mulf %271, %259 : vector<8x12xf32>
    %279 = arith.mulf %270, %276 : vector<8x12xf32>
    %280 = arith.addf %278, %279 : vector<8x12xf32>
    %281 = math.tanh %280 : vector<8x12xf32>
    %282 = arith.mulf %277, %281 : vector<8x12xf32>
    %c24_115 = arith.constant 24 : index
    %c0_116 = arith.constant 0 : index
    %283 = vector.load %arg8[%c24_115, %c0_116] : memref<64x48xf32, #tpu.memory_space<vmem>>, vector<8x48xf32>
    %cst_117 = arith.constant dense<0.000000e+00> : vector<8x48xf32>
    %284 = tpu.matmul %282, %218, %cst_117 {dimension_numbers = #tpu.dot_dimension_numbers<[1], [0], [0], [1], [0, 0, 1, 1], [], []>, precision = #tpu.contract_precision<fp32>} : vector<8x12xf32>, vector<12x48xf32>, vector<8x48xf32> -> vector<8x48xf32>
    %285 = arith.addf %283, %284 : vector<8x48xf32>
    %286 = arith.negf %285 : vector<8x48xf32>
    %287 = math.exp %286 : vector<8x48xf32>
    %cst_118 = arith.constant 1.000000e+00 : f32
    %288 = vector.broadcast %cst_118 : f32 to vector<8x48xf32>
    %289 = arith.addf %288, %287 : vector<8x48xf32>
    %290 = arith.divf %288, %289 : vector<8x48xf32>
    %291 = vector.extract_strided_slice %290 {offsets = [0, 0], sizes = [8, 12], strides = [1, 1]} : vector<8x48xf32> to vector<8x12xf32>
    %292 = vector.extract_strided_slice %290 {offsets = [0, 12], sizes = [8, 12], strides = [1, 1]} : vector<8x48xf32> to vector<8x12xf32>
    %293 = vector.extract_strided_slice %290 {offsets = [0, 24], sizes = [8, 12], strides = [1, 1]} : vector<8x48xf32> to vector<8x12xf32>
    %cst_119 = arith.constant 2.000000e+00 : f32
    %294 = vector.broadcast %cst_119 : f32 to vector<8x12xf32>
    %295 = arith.mulf %294, %293 : vector<8x12xf32>
    %cst_120 = arith.constant 1.000000e+00 : f32
    %296 = vector.broadcast %cst_120 : f32 to vector<8x12xf32>
    %297 = arith.subf %295, %296 : vector<8x12xf32>
    %298 = vector.extract_strided_slice %290 {offsets = [0, 36], sizes = [8, 12], strides = [1, 1]} : vector<8x48xf32> to vector<8x12xf32>
    %299 = arith.mulf %292, %280 : vector<8x12xf32>
    %300 = arith.mulf %291, %297 : vector<8x12xf32>
    %301 = arith.addf %299, %300 : vector<8x12xf32>
    %302 = math.tanh %301 : vector<8x12xf32>
    %303 = arith.mulf %298, %302 : vector<8x12xf32>
    %c32_121 = arith.constant 32 : index
    %c0_122 = arith.constant 0 : index
    %304 = vector.load %arg8[%c32_121, %c0_122] : memref<64x48xf32, #tpu.memory_space<vmem>>, vector<8x48xf32>
    %cst_123 = arith.constant dense<0.000000e+00> : vector<8x48xf32>
    %305 = tpu.matmul %303, %218, %cst_123 {dimension_numbers = #tpu.dot_dimension_numbers<[1], [0], [0], [1], [0, 0, 1, 1], [], []>, precision = #tpu.contract_precision<fp32>} : vector<8x12xf32>, vector<12x48xf32>, vector<8x48xf32> -> vector<8x48xf32>
    %306 = arith.addf %304, %305 : vector<8x48xf32>
    %307 = arith.negf %306 : vector<8x48xf32>
    %308 = math.exp %307 : vector<8x48xf32>
    %cst_124 = arith.constant 1.000000e+00 : f32
    %309 = vector.broadcast %cst_124 : f32 to vector<8x48xf32>
    %310 = arith.addf %309, %308 : vector<8x48xf32>
    %311 = arith.divf %309, %310 : vector<8x48xf32>
    %312 = vector.extract_strided_slice %311 {offsets = [0, 0], sizes = [8, 12], strides = [1, 1]} : vector<8x48xf32> to vector<8x12xf32>
    %313 = vector.extract_strided_slice %311 {offsets = [0, 12], sizes = [8, 12], strides = [1, 1]} : vector<8x48xf32> to vector<8x12xf32>
    %314 = vector.extract_strided_slice %311 {offsets = [0, 24], sizes = [8, 12], strides = [1, 1]} : vector<8x48xf32> to vector<8x12xf32>
    %cst_125 = arith.constant 2.000000e+00 : f32
    %315 = vector.broadcast %cst_125 : f32 to vector<8x12xf32>
    %316 = arith.mulf %315, %314 : vector<8x12xf32>
    %cst_126 = arith.constant 1.000000e+00 : f32
    %317 = vector.broadcast %cst_126 : f32 to vector<8x12xf32>
    %318 = arith.subf %316, %317 : vector<8x12xf32>
    %319 = vector.extract_strided_slice %311 {offsets = [0, 36], sizes = [8, 12], strides = [1, 1]} : vector<8x48xf32> to vector<8x12xf32>
    %320 = arith.mulf %313, %301 : vector<8x12xf32>
    %321 = arith.mulf %312, %318 : vector<8x12xf32>
    %322 = arith.addf %320, %321 : vector<8x12xf32>
    %323 = math.tanh %322 : vector<8x12xf32>
    %324 = arith.mulf %319, %323 : vector<8x12xf32>
    %c40_127 = arith.constant 40 : index
    %c0_128 = arith.constant 0 : index
    %325 = vector.load %arg8[%c40_127, %c0_128] : memref<64x48xf32, #tpu.memory_space<vmem>>, vector<8x48xf32>
    %cst_129 = arith.constant dense<0.000000e+00> : vector<8x48xf32>
    %326 = tpu.matmul %324, %218, %cst_129 {dimension_numbers = #tpu.dot_dimension_numbers<[1], [0], [0], [1], [0, 0, 1, 1], [], []>, precision = #tpu.contract_precision<fp32>} : vector<8x12xf32>, vector<12x48xf32>, vector<8x48xf32> -> vector<8x48xf32>
    %327 = arith.addf %325, %326 : vector<8x48xf32>
    %328 = arith.negf %327 : vector<8x48xf32>
    %329 = math.exp %328 : vector<8x48xf32>
    %cst_130 = arith.constant 1.000000e+00 : f32
    %330 = vector.broadcast %cst_130 : f32 to vector<8x48xf32>
    %331 = arith.addf %330, %329 : vector<8x48xf32>
    %332 = arith.divf %330, %331 : vector<8x48xf32>
    %333 = vector.extract_strided_slice %332 {offsets = [0, 0], sizes = [8, 12], strides = [1, 1]} : vector<8x48xf32> to vector<8x12xf32>
    %334 = vector.extract_strided_slice %332 {offsets = [0, 12], sizes = [8, 12], strides = [1, 1]} : vector<8x48xf32> to vector<8x12xf32>
    %335 = vector.extract_strided_slice %332 {offsets = [0, 24], sizes = [8, 12], strides = [1, 1]} : vector<8x48xf32> to vector<8x12xf32>
    %cst_131 = arith.constant 2.000000e+00 : f32
    %336 = vector.broadcast %cst_131 : f32 to vector<8x12xf32>
    %337 = arith.mulf %336, %335 : vector<8x12xf32>
    %cst_132 = arith.constant 1.000000e+00 : f32
    %338 = vector.broadcast %cst_132 : f32 to vector<8x12xf32>
    %339 = arith.subf %337, %338 : vector<8x12xf32>
    %340 = vector.extract_strided_slice %332 {offsets = [0, 36], sizes = [8, 12], strides = [1, 1]} : vector<8x48xf32> to vector<8x12xf32>
    %341 = arith.mulf %334, %322 : vector<8x12xf32>
    %342 = arith.mulf %333, %339 : vector<8x12xf32>
    %343 = arith.addf %341, %342 : vector<8x12xf32>
    %344 = math.tanh %343 : vector<8x12xf32>
    %345 = arith.mulf %340, %344 : vector<8x12xf32>
    %c48_133 = arith.constant 48 : index
    %c0_134 = arith.constant 0 : index
    %346 = vector.load %arg8[%c48_133, %c0_134] : memref<64x48xf32, #tpu.memory_space<vmem>>, vector<8x48xf32>
    %cst_135 = arith.constant dense<0.000000e+00> : vector<8x48xf32>
    %347 = tpu.matmul %345, %218, %cst_135 {dimension_numbers = #tpu.dot_dimension_numbers<[1], [0], [0], [1], [0, 0, 1, 1], [], []>, precision = #tpu.contract_precision<fp32>} : vector<8x12xf32>, vector<12x48xf32>, vector<8x48xf32> -> vector<8x48xf32>
    %348 = arith.addf %346, %347 : vector<8x48xf32>
    %349 = arith.negf %348 : vector<8x48xf32>
    %350 = math.exp %349 : vector<8x48xf32>
    %cst_136 = arith.constant 1.000000e+00 : f32
    %351 = vector.broadcast %cst_136 : f32 to vector<8x48xf32>
    %352 = arith.addf %351, %350 : vector<8x48xf32>
    %353 = arith.divf %351, %352 : vector<8x48xf32>
    %354 = vector.extract_strided_slice %353 {offsets = [0, 0], sizes = [8, 12], strides = [1, 1]} : vector<8x48xf32> to vector<8x12xf32>
    %355 = vector.extract_strided_slice %353 {offsets = [0, 12], sizes = [8, 12], strides = [1, 1]} : vector<8x48xf32> to vector<8x12xf32>
    %356 = vector.extract_strided_slice %353 {offsets = [0, 24], sizes = [8, 12], strides = [1, 1]} : vector<8x48xf32> to vector<8x12xf32>
    %cst_137 = arith.constant 2.000000e+00 : f32
    %357 = vector.broadcast %cst_137 : f32 to vector<8x12xf32>
    %358 = arith.mulf %357, %356 : vector<8x12xf32>
    %cst_138 = arith.constant 1.000000e+00 : f32
    %359 = vector.broadcast %cst_138 : f32 to vector<8x12xf32>
    %360 = arith.subf %358, %359 : vector<8x12xf32>
    %361 = vector.extract_strided_slice %353 {offsets = [0, 36], sizes = [8, 12], strides = [1, 1]} : vector<8x48xf32> to vector<8x12xf32>
    %362 = arith.mulf %355, %343 : vector<8x12xf32>
    %363 = arith.mulf %354, %360 : vector<8x12xf32>
    %364 = arith.addf %362, %363 : vector<8x12xf32>
    %365 = math.tanh %364 : vector<8x12xf32>
    %366 = arith.mulf %361, %365 : vector<8x12xf32>
    %c56_139 = arith.constant 56 : index
    %c0_140 = arith.constant 0 : index
    %367 = vector.load %arg8[%c56_139, %c0_140] : memref<64x48xf32, #tpu.memory_space<vmem>>, vector<8x48xf32>
    %cst_141 = arith.constant dense<0.000000e+00> : vector<8x48xf32>
    %368 = tpu.matmul %366, %218, %cst_141 {dimension_numbers = #tpu.dot_dimension_numbers<[1], [0], [0], [1], [0, 0, 1, 1], [], []>, precision = #tpu.contract_precision<fp32>} : vector<8x12xf32>, vector<12x48xf32>, vector<8x48xf32> -> vector<8x48xf32>
    %369 = arith.addf %367, %368 : vector<8x48xf32>
    %370 = arith.negf %369 : vector<8x48xf32>
    %371 = math.exp %370 : vector<8x48xf32>
    %cst_142 = arith.constant 1.000000e+00 : f32
    %372 = vector.broadcast %cst_142 : f32 to vector<8x48xf32>
    %373 = arith.addf %372, %371 : vector<8x48xf32>
    %374 = arith.divf %372, %373 : vector<8x48xf32>
    %375 = vector.extract_strided_slice %374 {offsets = [0, 0], sizes = [8, 12], strides = [1, 1]} : vector<8x48xf32> to vector<8x12xf32>
    %376 = vector.extract_strided_slice %374 {offsets = [0, 12], sizes = [8, 12], strides = [1, 1]} : vector<8x48xf32> to vector<8x12xf32>
    %377 = vector.extract_strided_slice %374 {offsets = [0, 24], sizes = [8, 12], strides = [1, 1]} : vector<8x48xf32> to vector<8x12xf32>
    %cst_143 = arith.constant 2.000000e+00 : f32
    %378 = vector.broadcast %cst_143 : f32 to vector<8x12xf32>
    %379 = arith.mulf %378, %377 : vector<8x12xf32>
    %cst_144 = arith.constant 1.000000e+00 : f32
    %380 = vector.broadcast %cst_144 : f32 to vector<8x12xf32>
    %381 = arith.subf %379, %380 : vector<8x12xf32>
    %382 = vector.extract_strided_slice %374 {offsets = [0, 36], sizes = [8, 12], strides = [1, 1]} : vector<8x48xf32> to vector<8x12xf32>
    %383 = arith.mulf %376, %364 : vector<8x12xf32>
    %384 = arith.mulf %375, %381 : vector<8x12xf32>
    %385 = arith.addf %383, %384 : vector<8x12xf32>
    %386 = math.tanh %385 : vector<8x12xf32>
    %387 = arith.mulf %382, %386 : vector<8x12xf32>
    %c40_145 = arith.constant 40 : index
    %c0_146 = arith.constant 0 : index
    %388 = vector.load %arg3[%c40_145, %c0_146] : memref<112x48xf32, #tpu.memory_space<vmem>>, vector<12x48xf32>
    %c52 = arith.constant 52 : index
    %c0_147 = arith.constant 0 : index
    %389 = vector.load %arg3[%c52, %c0_147] : memref<112x48xf32, #tpu.memory_space<vmem>>, vector<12x48xf32>
    %c96 = arith.constant 96 : index
    %c0_148 = arith.constant 0 : index
    %390 = vector.load %arg3[%c96, %c0_148] : memref<112x48xf32, #tpu.memory_space<vmem>>, vector<1x48xf32>
    %c56_149 = arith.constant 56 : index
    %c0_150 = arith.constant 0 : index
    %391 = vector.load %arg6[%c56_149, %c0_150] : memref<64x12xf32, #tpu.memory_space<vmem>>, vector<8x12xf32>
    %cst_151 = arith.constant dense<0.000000e+00> : vector<8x48xf32>
    %392 = tpu.matmul %391, %388, %cst_151 {dimension_numbers = #tpu.dot_dimension_numbers<[1], [0], [0], [1], [0, 0, 1, 1], [], []>, precision = #tpu.contract_precision<fp32>} : vector<8x12xf32>, vector<12x48xf32>, vector<8x48xf32> -> vector<8x48xf32>
    %c56_152 = arith.constant 56 : index
    %c0_153 = arith.constant 0 : index
    %393 = vector.load %arg7[%c56_152, %c0_153] : memref<64x12xf32, #tpu.memory_space<vmem>>, vector<8x12xf32>
    %cst_154 = arith.constant dense<0.000000e+00> : vector<8x48xf32>
    %394 = tpu.matmul %393, %389, %cst_154 {dimension_numbers = #tpu.dot_dimension_numbers<[1], [0], [0], [1], [0, 0, 1, 1], [], []>, precision = #tpu.contract_precision<fp32>} : vector<8x12xf32>, vector<12x48xf32>, vector<8x48xf32> -> vector<8x48xf32>
    %395 = arith.addf %392, %394 : vector<8x48xf32>
    %396 = vector.broadcast %390 : vector<1x48xf32> to vector<8x48xf32>
    %397 = arith.addf %395, %396 : vector<8x48xf32>
    %398 = arith.negf %397 : vector<8x48xf32>
    %399 = math.exp %398 : vector<8x48xf32>
    %cst_155 = arith.constant 1.000000e+00 : f32
    %400 = vector.broadcast %cst_155 : f32 to vector<8x48xf32>
    %401 = arith.addf %400, %399 : vector<8x48xf32>
    %402 = arith.divf %400, %401 : vector<8x48xf32>
    %403 = vector.extract_strided_slice %402 {offsets = [0, 0], sizes = [8, 12], strides = [1, 1]} : vector<8x48xf32> to vector<8x12xf32>
    %404 = vector.extract_strided_slice %402 {offsets = [0, 24], sizes = [8, 12], strides = [1, 1]} : vector<8x48xf32> to vector<8x12xf32>
    %cst_156 = arith.constant 2.000000e+00 : f32
    %405 = vector.broadcast %cst_156 : f32 to vector<8x12xf32>
    %406 = arith.mulf %405, %404 : vector<8x12xf32>
    %cst_157 = arith.constant 1.000000e+00 : f32
    %407 = vector.broadcast %cst_157 : f32 to vector<8x12xf32>
    %408 = arith.subf %406, %407 : vector<8x12xf32>
    %409 = vector.extract_strided_slice %402 {offsets = [0, 36], sizes = [8, 12], strides = [1, 1]} : vector<8x48xf32> to vector<8x12xf32>
    %410 = arith.mulf %403, %408 : vector<8x12xf32>
    %411 = math.tanh %410 : vector<8x12xf32>
    %412 = arith.mulf %409, %411 : vector<8x12xf32>
    %c64 = arith.constant 64 : index
    %c0_158 = arith.constant 0 : index
    %413 = vector.load %arg3[%c64, %c0_158] : memref<112x48xf32, #tpu.memory_space<vmem>>, vector<12x12xf32>
    %c76 = arith.constant 76 : index
    %c0_159 = arith.constant 0 : index
    %414 = vector.load %arg3[%c76, %c0_159] : memref<112x48xf32, #tpu.memory_space<vmem>>, vector<12x12xf32>
    %c104 = arith.constant 104 : index
    %c0_160 = arith.constant 0 : index
    %415 = vector.load %arg3[%c104, %c0_160] : memref<112x48xf32, #tpu.memory_space<vmem>>, vector<1x12xf32>
    %cst_161 = arith.constant dense<0.000000e+00> : vector<8x12xf32>
    %416 = tpu.matmul %387, %413, %cst_161 {dimension_numbers = #tpu.dot_dimension_numbers<[1], [0], [0], [1], [0, 0, 1, 1], [], []>, precision = #tpu.contract_precision<fp32>} : vector<8x12xf32>, vector<12x12xf32>, vector<8x12xf32> -> vector<8x12xf32>
    %cst_162 = arith.constant dense<0.000000e+00> : vector<8x12xf32>
    %417 = tpu.matmul %412, %414, %cst_162 {dimension_numbers = #tpu.dot_dimension_numbers<[1], [0], [0], [1], [0, 0, 1, 1], [], []>, precision = #tpu.contract_precision<fp32>} : vector<8x12xf32>, vector<12x12xf32>, vector<8x12xf32> -> vector<8x12xf32>
    %418 = arith.addf %416, %417 : vector<8x12xf32>
    %419 = vector.broadcast %415 : vector<1x12xf32> to vector<8x12xf32>
    %420 = arith.addf %418, %419 : vector<8x12xf32>
    %c0_163 = arith.constant 0 : index
    %c0_164 = arith.constant 0 : index
    %421 = vector.load %arg4[%c0_163, %c0_164] : memref<8x12xf32, #tpu.memory_space<vmem>>, vector<8x12xf32>
    tpu.vector_store %arg4[%c0_163, %c0_164], %420 {strides = array<i32>} : memref<8x12xf32, #tpu.memory_space<vmem>>, vector<8x12xf32>,
    return
  }
  func.func @transform_0(%arg0: i32) -> (i32, i32, i32) {
    %c0_i32 = arith.constant 0 : i32
    %c0_i32_0 = arith.constant 0 : i32
    %c0_i32_1 = arith.constant 0 : i32
    return %arg0, %c0_i32, %c0_i32_0 : i32, i32, i32
  }
  func.func @transform_1(%arg0: i32) -> (i32, i32) {
    %c0_i32 = arith.constant 0 : i32
    %c0_i32_0 = arith.constant 0 : i32
    %c0_i32_1 = arith.constant 0 : i32
    return %c0_i32, %c0_i32_0 : i32, i32
  }
  func.func @transform_2(%arg0: i32) -> (i32, i32) {
    %c0_i32 = arith.constant 0 : i32
    %c0_i32_0 = arith.constant 0 : i32
    %c0_i32_1 = arith.constant 0 : i32
    return %c0_i32, %c0_i32_0 : i32, i32
  }
  func.func @transform_3(%arg0: i32) -> (i32, i32) {
    %c0_i32 = arith.constant 0 : i32
    %c0_i32_0 = arith.constant 0 : i32
    return %arg0, %c0_i32 : i32, i32
  }
}

</mosaic_0001>

<bundles_post_ra>
// kernel: tpu_custom_call.1
= control target key start
LH: loop header
LB: loop body
LE: loop exit
PB: predicated region body
PF: predicated region fallthrough
CT: control target
= control target key end

     0   :  { %vm24_vm0 = vcmask 64512   ;;  %v14864_v9 = vmov 0.0|0.0   ;;  %s16287_s0 = inlined_call_operand.vmem [shape: f32[1,64,8], index: 0, kind: input, shape index: {}]   ;;  %s16288_s1 = inlined_call_operand.vmem [shape: f32[32,96], index: 1, kind: input, shape index: {}]   ;;  %s16289_s2 = inlined_call_operand.vmem [shape: f32[112,48], index: 2, kind: input, shape index: {}]   ;;  %s16290_s3 = inlined_call_operand.hbm [shape: f32[8,12], index: 3, kind: output, shape index: {}]  }
   0x1   :  { %v15_v0 = vld [vmem:[%s16288_s1] sm:$0xff]  ;;  %v17_v2 = vld [vmem:[%s16287_s0 + $0x8] sm:$0xff]  ;;  %v18_v6 = vld [vmem:[%s16287_s0 + $0x10] sm:$0xff]  ;;  %14189 = vmatprep.subr.bf16.mxu1 %v14864_v9 }
   0x2   :  { %v16_v1 = vld [vmem:[%s16287_s0] sm:$0xff]  ;;  %v14906_v3 = vand.u32 4294901760, %v15_v0  ;;  %v29_v5 = vsel %vm24_vm0, %v17_v2, 0  ;;  %v19_v7 = vld [vmem:[%s16287_s0 + $0x18] sm:$0xff]  ;;  %v32_v12 = vsel %vm24_vm0, %v18_v6, 0  ;;  %v21_v14 = vld [vmem:[%s16287_s0 + $0x28] sm:$0xff] }
   0x3   :  { %v26_v4 = vsel %vm24_vm0, %v16_v1, 0  ;;  %v20_v8 = vld [vmem:[%s16287_s0 + $0x20] sm:$0xff]  ;;  %v14922_v11 = vand.u32 4294901760, %v29_v5  ;;  %v35_v13 = vsel %vm24_vm0, %v19_v7, 0  ;;  %v14933_v16 = vand.u32 4294901760, %v32_v12  ;;  %v22_v19 = vld [vmem:[%s16287_s0 + $0x30] sm:$0xff] }
   0x4   :  { %v14920_v10 = vand.u32 4294901760, %v26_v4  ;;  %12977 = vmatprep.subr.mxu0 %v14906_v3  ;;  %v14931_v15 = vsub.f32 %v15_v0, %v14906_v3  ;;  %v14935_v17 = vand.u32 4294901760, %v35_v13  ;;  %v38_v18 = vsel %vm24_vm0, %v20_v8, 0 }
   0x5   :  { %12978 = vmatpush3.msra.mxu0 %v14906_v3  ;;  %v14946_v21 = vsub.f32 %v29_v5, %v14922_v11  ;;  %v14948_v22 = vand.u32 4294901760, %v38_v18  ;;  %v41_v23 = vsel %vm24_vm0, %v21_v14, 0 }
   0x6   :  { %v14943_v20 = vsub.f32 %v26_v4, %v14920_v10 }
   0x7   :  { %8 = vsyncpa [#allocation7], 0  ;;  %v14952_v24 = vand.u32 4294901760, %v14931_v15  ;;  %v14955_v25 = vsub.f32 %v32_v12, %v14933_v16  ;;  %v14958_v26 = vsub.f32 %v35_v13, %v14935_v17  ;;  %v14960_v27 = vand.u32 4294901760, %v41_v23  ;;  %v23_v40 = vld [vmem:[%s16287_s0 + $0x38] sm:$0xff]  ;;  %v805_v45 = vld [vmem:[%s16288_s1 + $0x8] sm:$0xff] }
   0x8   :  { %v117_v28 = vand.u32 4294901760, %v14943_v20  ;;  %v127_v29 = vand.u32 4294901760, %v14946_v21  ;;  %v14965_v30 = vsub.f32 %v38_v18, %v14948_v22  ;;  %v44_v31 = vsel %vm24_vm0, %v22_v19, 0  ;;  %v806_v50 = vld [vmem:[%s16288_s1 + $0x10] sm:$0xff]  ;;  %v807_v51 = vld [vmem:[%s16288_s1 + $0x18] sm:$0xff]  ;;  %s14867_s1 = smov 80  }
   0x9   :  { %v199_v32 = vsub.f32 %v14931_v15, %v14952_v24  ;;  %v137_v33 = vand.u32 4294901760, %v14955_v25  ;;  %v147_v34 = vand.u32 4294901760, %v14958_v26  ;;  %v14973_v35 = vsub.f32 %v41_v23, %v14960_v27  ;;  %s14868_s8 = smov 24   ;;  %s14869_s9 = smov 48  }
   0xa   :  { %v118_v36 = vsub.f32 %v14943_v20, %v117_v28  ;;  %v128_v37 = vsub.f32 %v14946_v21, %v127_v29  ;;  %v157_v38 = vand.u32 4294901760, %v14965_v30  ;;  %v14982_v39 = vand.u32 4294901760, %v44_v31  ;;  %s14870_s10 = smov 56   ;;  %s14871_s11 = smov 44  }
   0xb   :  { %v200_v41 = vand.u32 4294901760, %v199_v32  ;;  %v138_v42 = vsub.f32 %v14955_v25, %v137_v33  ;;  %v148_v43 = vsub.f32 %v14958_v26, %v147_v34  ;;  %v167_v44 = vand.u32 4294901760, %v14973_v35  ;;  %s14872_s26 = smov 104   ;;  %s14873_s27 = smov 12  }
   0xc   :  { %v119_v46 = vand.u32 4294901760, %v118_v36  ;;  %v129_v47 = vand.u32 4294901760, %v128_v37  ;;  %v158_v48 = vsub.f32 %v14965_v30, %v157_v38  ;;  %v15001_v49 = vsub.f32 %v44_v31, %v14982_v39  ;;  %s14874_s28 = smov 92   ;;  %s14876_s21 = smov [#allocation6]  }
   0xd   :  { %12991 = vmatprep.subr.mxu0 %v200_v41  ;;  %v139_v52 = vand.u32 4294901760, %v138_v42  ;;  %v47_v53 = vsel %vm24_vm0, %v23_v40, 0  ;;  %v149_v54 = vand.u32 4294901760, %v148_v43  ;;  %v814_v57 = vand.u32 4294901760, %v805_v45  ;;  %s12350_s22 = sshll.u32 %s14876_s21, 4  ;;  %s12351_s22 = int_to_ptr.vmem [resolvable:$true] %s12350_s22 }
   0xe   :  { %12979 = vmatprep.mubr.f32.mxu0 %v119_v46  ;;  %v177_v55 = vand.u32 4294901760, %v15001_v49  ;;  %v15011_v56 = vand.u32 4294901760, %v47_v53  ;;  %v168_v58 = vsub.f32 %v14973_v35, %v167_v44  ;;  %v817_v59 = vand.u32 4294901760, %v806_v50  ;;  %s14840_s23 = scalar_lea.vmem %s12351_s22, 128  ;;  %p14845_p1 = scmp.lt.s32.totalorder %s12351_s22, %s12351_s22 }
   0xf   :  { %12980 = vmatmul.mubr.f32.vlgmr.msra.gmra.mrb[0].mxu0 %v129_v47  ;;  %v15016_v60 = vand.u32 4294901760, %v807_v51  ;;  %v159_v61 = vand.u32 4294901760, %v158_v48  ;;  %v893_v0 = vsub.f32 %v805_v45, %v814_v57  ;;  %vm14865_vm1 = vmmov 0   ;;  %p14841_p0 = scmp.ne.s32.totalorder %s12351_s22, %s14840_s23  ;;  %p14846_p2 = scmp.lt.s32.totalorder %s14840_s23, %s14840_s23 }
  0x10   :  { %12992 = vmatpush3.msra.mxu0 %v200_v41  ;;  %12982 = vmatprep.mubr.f32.mxu0 %v139_v52  ;;  %v178_v62 = vsub.f32 %v15001_v49, %v177_v55  ;;  %v15022_v63 = vsub.f32 %v47_v53, %v15011_v56  ;;  %v15025_v1 = vpack.c.bf16 %v817_v59, %v814_v57  ;;  %v14866_v2 = vmov 0.0  }
  0x11   :  { %13005 = vmatprep.subr.mxu0 %v14931_v15  ;;  %13067 = vmatprep.mubr.msk.f32.mxu1 %vm14865_vm1, %v14866_v2  ;;  %v900_v4 = vsub.f32 %v806_v50, %v817_v59  ;;  %v15030_v5 = vsub.f32 %v807_v51, %v15016_v60  ;;  %v894_v7 = vand.u32 4294901760, %v893_v0  ;;  %v169_v8 = vand.u32 4294901760, %v168_v58  ;;  %p14847_p3 = por %p14846_p2, %p14845_p1 }
  0x12   :  { %v187_v6 = vand.u32 4294901760, %v15022_v63  ;;  %14191 = vmatpush3.bf16.msra.mxu1 %v15025_v1  ;;  %v179_v14 = vand.u32 4294901760, %v178_v62  ;;  %vm796_vm2 = vcmask 785408   ;;  %vm809_vm3 = vcmask 195584  }
  0x13   :  { %12983 = vmatmul.mubr.f32.gmra.mrb[2].mxu0 %v149_v54  ;;  %v901_v12 = vand.u32 4294901760, %v900_v4  ;;  %v15035_v13 = vand.u32 4294901760, %v15030_v5  ;;  %13065 = vmatprep.subr.mxu1 %v14866_v2  ;;  %v895_v19 = vsub.f32 %v893_v0, %v894_v7  ;;  %v15057_v42 = vpack.c.bf16 %v900_v4, %v893_v0  ;;  %p14848_p4 = pnand %p14847_p3, %p14841_p0 }
  0x14   :  { %12985 = vmatprep.mubr.f32.mxu0 %v159_v61  ;;  %v188_v18 = vsub.f32 %v15022_v63, %v187_v6  ;;  %vm1315_vm4 = vcmask 97280   ;;  %vm4936_vm5 = vcmask 1043456   ;;  %vm6499_vm6 = vcmask 392192  }
  0x15   :  { %v902_v23 = vsub.f32 %v900_v4, %v901_v12  ;;  %v896_v31 = vand.u32 4294901760, %v895_v19  ;;  %v909_v37 = vsub.f32 %v15030_v5, %v15035_v13 }
  0x16   :  { %v189_v32 = vand.u32 4294901760, %v188_v18  ;;  %13066 = vmatpush3.msra.mxu1 %v15016_v60 }
  0x17   :  { %12986 = vmatmul.mubr.f32.gmra.mrb[4].mxu0 %v169_v8  ;;  %v903_v36 = vand.u32 4294901760, %v902_v23  ;;  %14192 = vmatprep.subr.bf16.mxu1 %v14864_v9  ;;  %v15051_v41 = vand.u32 4294901760, %v909_v37 }
  0x18   :  { %12988 = vmatprep.mubr.f32.mxu0 %v179_v14  ;;  %13068 = vmatmul.mubr.f32.vlgmr.msra.gmra.mrb[0].mxu1 %v14866_v2 }
  0x19   :  { %v15046_v40 = vpack.c.bf16 %v903_v36, %v896_v31  ;;  %13076 = vmatprep.mubr.msk.f32.mxu1 %vm14865_vm1, %v14866_v2 }
  0x1b   :  { %12989 = vmatmul.mubr.f32.gmra.mrb[6].mxu0 %v189_v32  ;;  %14194 = vmatpush3.bf16.msra.mxu1 %v15046_v40 }
  0x1c   :  { %12993 = vmatprep.mubr.f32.mxu0 %v14920_v10  ;;  %13074 = vmatprep.subr.mxu1 %v14866_v2 }
  0x1f   :  { %12994 = vmatmul.mubr.f32.vlgmr.msra.gmra.mrb[0].mxu0 %v14922_v11  ;;  %13075 = vmatpush3.msra.mxu1 %v15051_v41 }
  0x20   :  { %13006 = vmatpush3.msra.mxu0 %v14931_v15  ;;  %12996 = vmatprep.mubr.f32.mxu0 %v14933_v16  ;;  %v15082_v15 = vpack.c.bf16 %v901_v12, %v894_v7 }
  0x21   :  { %13019 = vmatprep.subr.mxu0 %v14906_v3  ;;  %14195 = vmatprep.subr.bf16.mxu1 %v14864_v9 }
  0x22   :  { %13077 = vmatmul.mubr.f32.vlgmr.msra.gmra.mrb[2].mxu1 %v14866_v2 }
  0x23   :  { %12997 = vmatmul.mubr.f32.gmra.mrb[2].mxu0 %v14935_v17  ;;  %14197 = vmatpush3.bf16.msra.mxu1 %v15057_v42 }
  0x24   :  { %12999 = vmatprep.mubr.f32.mxu0 %v14948_v22  ;;  %13083 = vmatprep.subr.mxu1 %v14866_v2 }
  0x25   :  { %13085 = vmatprep.mubr.msk.f32.mxu1 %vm14865_vm1, %v14866_v2 }
  0x27   :  { %13000 = vmatmul.mubr.f32.gmra.mrb[4].mxu0 %v14960_v27  ;;  %13084 = vmatpush3.msra.mxu1 %v15030_v5 }
  0x28   :  { %13002 = vmatprep.mubr.f32.mxu0 %v14982_v39  ;;  %14198 = vmatprep.subr.bf16.mxu1 %v14864_v9 }
  0x29   :  { %13086 = vmatmul.mubr.f32.vlgmr.msra.gmra.mrb[4].mxu1 %v14866_v2 }
  0x2a   :  { %14200 = vmatpush3.bf16.msra.mxu1 %v15025_v1  ;;  %13094 = vmatprep.mubr.msk.f32.mxu1 %vm14865_vm1, %v14866_v2 }
  0x2b   :  { %13003 = vmatmul.mubr.f32.gmra.mrb[6].mxu0 %v15011_v56  ;;  %13092 = vmatprep.subr.mxu1 %v14866_v2 }
  0x2c   :  { %13007 = vmatprep.mubr.f32.mxu0 %v14943_v20 }
  0x2e   :  { %13093 = vmatpush3.msra.mxu1 %v15016_v60 }
  0x2f   :  { %13008 = vmatmul.mubr.f32.vlgmr.msra.gmra.mrb[0].mxu0 %v14946_v21  ;;  %14201 = vmatprep.subr.bf16.mxu1 %v14864_v9 }
  0x30   :  { %13020 = vmatpush3.msra.mxu0 %v14906_v3  ;;  %13010 = vmatprep.mubr.f32.mxu0 %v14955_v25 }
  0x31   :  { %13033 = vmatprep.subr.mxu0 %v14952_v24  ;;  %13095 = vmatmul.mubr.f32.vlgmr.msra.gmra.mrb[6].mxu1 %v14866_v2 }
  0x32   :  { %14203 = vmatpush3.bf16.msra.mxu1 %v15082_v15  ;;  %13103 = vmatprep.mubr.msk.f32.mxu1 %vm14865_vm1, %v14866_v2 }
  0x33   :  { %13011 = vmatmul.mubr.f32.gmra.mrb[2].mxu0 %v14958_v26  ;;  %13101 = vmatprep.subr.mxu1 %v14866_v2 }
  0x34   :  { %13013 = vmatprep.mubr.f32.mxu0 %v14965_v30 }
  0x36   :  { %13102 = vmatpush3.msra.mxu1 %v15035_v13 }
  0x37   :  { %13014 = vmatmul.mubr.f32.gmra.mrb[4].mxu0 %v14973_v35  ;;  %14204 = vmatprep.subr.bf16.mxu1 %v14864_v9 }
  0x38   :  { %13016 = vmatprep.mubr.f32.mxu0 %v15001_v49  ;;  %13104 = vmatmul.mubr.f32.vlgmr.msra.gmra.mrb[8].mxu1 %v14866_v2 }
  0x39   :  { %14206 = vmatpush3.bf16.msra.mxu1 %v15025_v1  ;;  %13112 = vmatprep.mubr.msk.f32.mxu1 %vm14865_vm1, %v14866_v2 }
  0x3a   :  { %13110 = vmatprep.subr.mxu1 %v14866_v2 }
  0x3b   :  { %13017 = vmatmul.mubr.f32.gmra.mrb[6].mxu0 %v15022_v63 }
  0x3c   :  { %13021 = vmatprep.mubr.f32.mxu0 %v117_v28 }
  0x3d   :  { %13111 = vmatpush3.msra.mxu1 %v15016_v60 }
  0x3e   :  { %13113 = vmatmul.mubr.f32.vlgmr.msra.gmra.mrb[10].mxu1 %v14866_v2  ;;  %14207 = vmatprep.subr.bf16.mxu1 %v14864_v9 }
  0x3f   :  { %13022 = vmatmul.mubr.f32.vlgmr.msra.gmra.mrb[0].mxu0 %v127_v29  ;;  %14209 = vmatpush3.bf16.msra.mxu1 %v15025_v1 }
  0x40   :  { %13034 = vmatpush3.msra.mxu0 %v14952_v24  ;;  %13024 = vmatprep.mubr.f32.mxu0 %v137_v33 }
  0x41   :  { %13047 = vmatprep.subr.mxu0 %v14906_v3  ;;  %13119 = vmatprep.subr.mxu1 %v14866_v2 }
  0x42   :  { %13121 = vmatprep.mubr.msk.f32.mxu1 %vm14865_vm1, %v14866_v2 }
  0x43   :  { %13025 = vmatmul.mubr.f32.gmra.mrb[2].mxu0 %v147_v34  ;;  %13120 = vmatpush3.msra.mxu1 %v15016_v60 }
  0x44   :  { %13027 = vmatprep.mubr.f32.mxu0 %v157_v38  ;;  %14210 = vmatprep.subr.bf16.mxu1 %v14864_v9 }
  0x47   :  { %13028 = vmatmul.mubr.f32.gmra.mrb[4].mxu0 %v167_v44 }
  0x48   :  { %13030 = vmatprep.mubr.f32.mxu0 %v177_v55 }
  0x4b   :  { %13031 = vmatmul.mubr.f32.gmra.mrb[6].mxu0 %v187_v6 }
  0x4c   :  { %13035 = vmatprep.mubr.f32.mxu0 %v14920_v10 }
  0x4f   :  { %13036 = vmatmul.mubr.f32.vlgmr.msra.gmra.mrb[0].mxu0 %v14922_v11 }
  0x50   :  { %13048 = vmatpush3.msra.mxu0 %v14906_v3  ;;  %13038 = vmatprep.mubr.f32.mxu0 %v14933_v16 }
  0x51   :  { %14237 = vmatprep.subr.bf16.mxu0 %v14864_v9 }
  0x53   :  { %13039 = vmatmul.mubr.f32.gmra.mrb[2].mxu0 %v14935_v17 }
  0x54   :  { %13041 = vmatprep.mubr.f32.mxu0 %v14948_v22 }
  0x57   :  { %13042 = vmatmul.mubr.f32.gmra.mrb[4].mxu0 %v14960_v27 }
  0x58   :  { %13044 = vmatprep.mubr.f32.mxu0 %v14982_v39 }
  0x5b   :  { %13045 = vmatmul.mubr.f32.gmra.mrb[6].mxu0 %v15011_v56 }
  0x5c   :  { %13049 = vmatprep.mubr.f32.mxu0 %v14920_v10 }
  0x5f   :  { %13050 = vmatmul.mubr.f32.vlgmr.msra.gmra.mrb[0].mxu0 %v14922_v11 }
  0x60   :  { %13052 = vmatprep.mubr.f32.mxu0 %v14933_v16  ;;  %14239 = vmatpush3.bf16.msra.mxu0 %v15082_v15 }
  0x61   :  { %13209 = vmatprep.subr.mxu0 %v14866_v2 }
  0x63   :  { %13053 = vmatmul.mubr.f32.gmra.mrb[2].mxu0 %v14935_v17 }
  0x64   :  { %13055 = vmatprep.mubr.f32.mxu0 %v14948_v22  ;;  %13210 = vmatpush3.msra.mxu0 %v15035_v13 }
  0x65   :  { %14243 = vmatprep.subr.bf16.mxu0 %v14864_v9 }
  0x67   :  { %13056 = vmatmul.mubr.f32.gmra.mrb[4].mxu0 %v14960_v27 }
  0x68   :  { %13058 = vmatprep.mubr.f32.mxu0 %v14982_v39 }
  0x6b   :  { %13059 = vmatmul.mubr.f32.gmra.mrb[6].mxu0 %v15011_v56 }
  0x6c   :  { %13211 = vmatprep.mubr.msk.f32.mxu0 %vm14865_vm1, %v14866_v2 }
  0xeb   :  { %v887_v3 = vpop.f32.mrb[0].mxu1 }
  0xec   :  { %v13069_v10 = vpop.f32.mrb[1].mxu1 }
  0xf5   :  { %v973_v11 = vpop.f32.mrb[2].mxu1 }
  0xf6   :  { %v974_v16 = vadd.f32 %v973_v11, %v887_v3  ;;  %v13078_v17 = vpop.f32.mrb[3].mxu1 }
  0xfc   :  { %v1051_v20 = vpop.f32.mrb[4].mxu1 }
  0xfd   :  { %v1052_v21 = vadd.f32 %v1051_v20, %v974_v16  ;;  %v13087_v22 = vpop.f32.mrb[5].mxu1 }
 0x104   :  { %v1127_v24 = vpop.f32.mrb[6].mxu1 }
 0x105   :  { %v1128_v25 = vadd.f32 %v1127_v24, %v1052_v21  ;;  %v13096_v26 = vpop.f32.mrb[7].mxu1 }
 0x10b   :  { %v1207_v28 = vpop.f32.mrb[8].mxu1 }
 0x10c   :  { %v1208_v27 = vadd.f32 %v1207_v28, %v1128_v25  ;;  %v13105_v29 = vpop.f32.mrb[9].mxu1 }
 0x111   :  { %v1281_v30 = vpop.f32.mrb[10].mxu1 }
 0x112   :  { %v1282_v33 = vadd.f32 %v1281_v30, %v1208_v27  ;;  %v13114_v34 = vpop.f32.mrb[11].mxu1 }
 0x132   :  { %v13051_v35 = vpop.f32.mrb[0].mxu0 }
 0x133   :  { %798 = vst.msk [vmem:[#allocation2 + $0x8] sm:$0xff] %vm796_vm2, %v13051_v35  ;;  %v750_v38 = vpop.f32.mrb[1].mxu0 }
 0x134   :  { %797 = vst.msk [vmem:[#allocation2] sm:$0xff] %vm796_vm2, %v750_v38 }
 0x136   :  { %v13054_v39 = vpop.f32.mrb[2].mxu0 }
 0x137   :  { %800 = vst.msk [vmem:[#allocation2 + $0x18] sm:$0xff] %vm796_vm2, %v13054_v39  ;;  %v762_v43 = vpop.f32.mrb[3].mxu0 }
 0x138   :  { %799 = vst.msk [vmem:[#allocation2 + $0x10] sm:$0xff] %vm796_vm2, %v762_v43 }
 0x13a   :  { %v13057_v44 = vpop.f32.mrb[4].mxu0  ;;  %v1321_v28 = vld [vmem:[#allocation2 + $0x8] sm:$0xff] }
 0x13b   :  { %v808_v45 = vld [vmem:[#allocation2] sm:$0xff]  ;;  %802 = vst.msk [vmem:[#allocation2 + $0x28] sm:$0xff] %vm796_vm2, %v13057_v44  ;;  %v774_v46 = vpop.f32.mrb[5].mxu0 }
 0x13c   :  { %v1285_v47 = vadd.f32 %v1282_v33, %v808_v45  ;;  %801 = vst.msk [vmem:[#allocation2 + $0x20] sm:$0xff] %vm796_vm2, %v774_v46 }
 0x13e   :  { %v12358_v48 = vmul.f32 -1.442695, %v1285_v47  ;;  %v13060_v49 = vpop.f32.mrb[6].mxu0 }
 0x13f   :  { %804 = vst.msk [vmem:[#allocation2 + $0x38] sm:$0xff] %vm796_vm2, %v13060_v49  ;;  %v786_v50 = vpop.f32.mrb[7].mxu0 }
 0x140   :  { %14738 = vpow2.f32 %v12358_v48  ;;  %803 = vst.msk [vmem:[#allocation2 + $0x30] sm:$0xff] %vm796_vm2, %v786_v50 }
 0x14a   :  { %v14739_v51 = vpop.eup %14738 }
 0x14b   :  { %v1289_v52 = vadd.f32 1.0, %v14739_v51 }
 0x14d   :  { %14740 = vrcp.f32 %v1289_v52 }
 0x157   :  { %v14741_v53 = vpop.eup %14740 }
 0x158   :  { %v1292_v54 = vmul.f32 2.0, %v14741_v53  ;;  %v1294_v58 = vmul.f32 0.0, %v14741_v53 }
 0x15a   :  { %v12359_v55 = vadd.f32 -1.0, %v1292_v54 }
 0x15c   :  { %1296 = vrot.lane.b32.xlu0 %v12359_v55, %s14867_s1 }
 0x1ce   :  { %v1297_v56 = vpop.permute.xlu0 %1296 }
 0x1cf   :  { %v1299_v57 = vmul.f32 %v14741_v53, %v1297_v56 }
 0x1d1   :  { %1301 = vrot.lane.b32.xlu0 %v1299_v57, %s14868_s8 }
 0x243   :  { %v1302_v59 = vpop.permute.xlu0 %1301 }
 0x244   :  { %v15167_v61 = vadd.f32 %v1302_v59, %v1294_v58 }
 0x246   :  { %14742 = vtanh.f32 %v15167_v61 }
 0x250   :  { %v14743_v62 = vpop.eup %14742 }
 0x251   :  { %1307 = vrot.lane.b32.xlu1 %v14743_v62, %s14869_s9 }
 0x2c3   :  { %v1308_v63 = vpop.permute.xlu1 %1307 }
 0x2c4   :  { %v15171_v0 = vmul.f32 %v14741_v53, %v1308_v63 }
 0x2c6   :  { %1312 = vrot.lane.b32.xlu1 %v15171_v0, %s14870_s10 }
 0x338   :  { %v1313_v4 = vpop.permute.xlu1 %1312 }
 0x339   :  { %1316 = vst.msk [vmem:[#allocation3] sm:$0xff] %vm1315_vm4, %v1313_v4  ;;  %v1322_v6 = vsel %vm809_vm3, %v1313_v4, 0 }
 0x33a   :  { %v1392_v7 = vand.u32 4294901760, %v1322_v6 }
 0x33c   :  { %v1393_v8 = vsub.f32 %v1322_v6, %v1392_v7 }
 0x33e   :  { %v1394_v12 = vand.u32 4294901760, %v1393_v8 }
 0x340   :  { %v1395_v14 = vsub.f32 %v1393_v8, %v1394_v12 }
 0x342   :  { %v1396_v18 = vand.u32 4294901760, %v1395_v14 }
 0x344   :  { %13122 = vmatmul.mubr.f32.vlgmr.msra.gmra.mrb[12].mxu1 %v1396_v18 }
 0x345   :  { %14212 = vmatpush3.bf16.msra.mxu1 %v15046_v40  ;;  %13130 = vmatprep.mubr.msk.f32.mxu1 %vm14865_vm1, %v14866_v2 }
 0x346   :  { %13128 = vmatprep.subr.mxu1 %v14866_v2 }
 0x349   :  { %13129 = vmatpush3.msra.mxu1 %v15051_v41 }
 0x34a   :  { %13131 = vmatmul.mubr.f32.vlgmr.msra.gmra.mrb[14].mxu1 %v1392_v7  ;;  %14213 = vmatprep.subr.bf16.mxu1 %v14864_v9 }
 0x34b   :  { %14215 = vmatpush3.bf16.msra.mxu1 %v15057_v42  ;;  %13139 = vmatprep.mubr.msk.f32.mxu1 %vm14865_vm1, %v14866_v2 }
 0x34c   :  { %13137 = vmatprep.subr.mxu1 %v14866_v2 }
 0x34f   :  { %13138 = vmatpush3.msra.mxu1 %v15030_v5 }
 0x350   :  { %13140 = vmatmul.mubr.f32.vlgmr.msra.gmra.mrb[16].mxu1 %v1393_v8  ;;  %14216 = vmatprep.subr.bf16.mxu1 %v14864_v9 }
 0x351   :  { %14218 = vmatpush3.bf16.msra.mxu1 %v15025_v1  ;;  %13148 = vmatprep.mubr.msk.f32.mxu1 %vm14865_vm1, %v14866_v2 }
 0x352   :  { %13146 = vmatprep.subr.mxu1 %v14866_v2 }
 0x355   :  { %13147 = vmatpush3.msra.mxu1 %v15016_v60 }
 0x356   :  { %13149 = vmatmul.mubr.f32.vlgmr.msra.gmra.mrb[18].mxu1 %v1394_v12  ;;  %14219 = vmatprep.subr.bf16.mxu1 %v14864_v9 }
 0x357   :  { %14221 = vmatpush3.bf16.msra.mxu1 %v15082_v15  ;;  %13157 = vmatprep.mubr.msk.f32.mxu1 %vm14865_vm1, %v14866_v2 }
 0x358   :  { %13155 = vmatprep.subr.mxu1 %v14866_v2 }
 0x35b   :  { %13156 = vmatpush3.msra.mxu1 %v15035_v13 }
 0x35c   :  { %13158 = vmatmul.mubr.f32.vlgmr.msra.gmra.mrb[20].mxu1 %v1392_v7  ;;  %14222 = vmatprep.subr.bf16.mxu1 %v14864_v9 }
 0x35d   :  { %14224 = vmatpush3.bf16.msra.mxu1 %v15025_v1  ;;  %13166 = vmatprep.mubr.msk.f32.mxu1 %vm14865_vm1, %v14866_v2 }
 0x35e   :  { %13164 = vmatprep.subr.mxu1 %v14866_v2 }
 0x361   :  { %13165 = vmatpush3.msra.mxu1 %v15016_v60 }
 0x362   :  { %13167 = vmatmul.mubr.f32.vlgmr.msra.gmra.mrb[22].mxu1 %v1392_v7  ;;  %14225 = vmatprep.subr.bf16.mxu1 %v14864_v9 }
 0x363   :  { %14227 = vmatpush3.bf16.msra.mxu1 %v15025_v1  ;;  %13175 = vmatprep.mubr.msk.f32.mxu1 %vm14865_vm1, %v14866_v2 }
 0x364   :  { %13173 = vmatprep.subr.mxu1 %v14866_v2 }
 0x367   :  { %13174 = vmatpush3.msra.mxu1 %v15016_v60 }
 0x368   :  { %14228 = vmatprep.subr.bf16.mxu1 %v14864_v9 }
 0x417   :  { %v1398_v19 = vpop.f32.mrb[12].mxu1 }
 0x418   :  { %v13123_v23 = vpop.f32.mrb[13].mxu1 }
 0x41d   :  { %v1484_v31 = vpop.f32.mrb[14].mxu1 }
 0x41e   :  { %v1485_v32 = vadd.f32 %v1484_v31, %v1398_v19  ;;  %v13132_v36 = vpop.f32.mrb[15].mxu1 }
 0x41f   :  { %v1831_v36 = vld [vmem:[#allocation2 + $0x10] sm:$0xff] }
 0x423   :  { %v1562_v37 = vpop.f32.mrb[16].mxu1 }
 0x424   :  { %v1563_v3 = vadd.f32 %v1562_v37, %v1485_v32  ;;  %v13141_v10 = vpop.f32.mrb[17].mxu1 }
 0x429   :  { %v1638_v11 = vpop.f32.mrb[18].mxu1 }
 0x42a   :  { %v1639_v16 = vadd.f32 %v1638_v11, %v1563_v3  ;;  %v13150_v17 = vpop.f32.mrb[19].mxu1 }
 0x42f   :  { %v1718_v20 = vpop.f32.mrb[20].mxu1 }
 0x430   :  { %v1719_v21 = vadd.f32 %v1718_v20, %v1639_v16  ;;  %v13159_v22 = vpop.f32.mrb[21].mxu1 }
 0x435   :  { %v1792_v24 = vpop.f32.mrb[22].mxu1 }
 0x436   :  { %v1793_v25 = vadd.f32 %v1792_v24, %v1719_v21  ;;  %v13168_v26 = vpop.f32.mrb[23].mxu1 }
 0x438   :  { %v1796_v27 = vadd.f32 %v1793_v25, %v1321_v28 }
 0x43a   :  { %v12360_v29 = vmul.f32 -1.442695, %v1796_v27 }
 0x43c   :  { %14744 = vpow2.f32 %v12360_v29 }
 0x446   :  { %v14745_v30 = vpop.eup %14744 }
 0x447   :  { %v1800_v33 = vadd.f32 1.0, %v14745_v30 }
 0x449   :  { %14746 = vrcp.f32 %v1800_v33 }
 0x453   :  { %v14747_v34 = vpop.eup %14746 }
 0x454   :  { %v1803_v35 = vmul.f32 2.0, %v14747_v34  ;;  %v1805_v44 = vmul.f32 %v14747_v34, %v15167_v61 }
 0x456   :  { %v12361_v38 = vadd.f32 -1.0, %v1803_v35 }
 0x458   :  { %1807 = vrot.lane.b32.xlu0 %v12361_v38, %s14867_s1 }
 0x4ca   :  { %v1808_v39 = vpop.permute.xlu0 %1807 }
 0x4cb   :  { %v1810_v43 = vmul.f32 %v14747_v34, %v1808_v39 }
 0x4cd   :  { %1812 = vrot.lane.b32.xlu1 %v1810_v43, %s14868_s8 }
 0x53f   :  { %v1813_v45 = vpop.permute.xlu1 %1812 }
 0x540   :  { %v15216_v46 = vadd.f32 %v1813_v45, %v1805_v44 }
 0x542   :  { %14748 = vtanh.f32 %v15216_v46 }
 0x54c   :  { %v14749_v47 = vpop.eup %14748 }
 0x54d   :  { %1818 = vrot.lane.b32.xlu0 %v14749_v47, %s14869_s9 }
 0x5bf   :  { %v1819_v48 = vpop.permute.xlu0 %1818 }
 0x5c0   :  { %v15220_v49 = vmul.f32 %v14747_v34, %v1819_v48 }
 0x5c2   :  { %1823 = vrot.lane.b32.xlu1 %v15220_v49, %s14870_s10 }
 0x634   :  { %v1824_v50 = vpop.permute.xlu1 %1823 }
 0x635   :  { %1826 = vst.msk [vmem:[#allocation3 + $0x8] sm:$0xff] %vm1315_vm4, %v1824_v50  ;;  %v1832_v51 = vsel %vm809_vm3, %v1824_v50, 0 }
 0x636   :  { %v1902_v52 = vand.u32 4294901760, %v1832_v51 }
 0x638   :  { %v1903_v53 = vsub.f32 %v1832_v51, %v1902_v52  ;;  %13212 = vmatmul.mubr.f32.vlgmr.msra.gmra.mrb[8].mxu0 %v1902_v52 }
 0x639   :  { %14245 = vmatpush3.bf16.msra.mxu0 %v15025_v1  ;;  %13229 = vmatprep.mubr.msk.f32.mxu0 %vm14865_vm1, %v14866_v2 }
 0x63a   :  { %v1904_v54 = vand.u32 4294901760, %v1903_v53  ;;  %13227 = vmatprep.subr.mxu0 %v14866_v2 }
 0x63c   :  { %v1905_v55 = vsub.f32 %v1903_v53, %v1904_v54 }
 0x63d   :  { %13228 = vmatpush3.msra.mxu0 %v15016_v60 }
 0x63e   :  { %v1906_v56 = vand.u32 4294901760, %v1905_v55  ;;  %14249 = vmatprep.subr.bf16.mxu0 %v14864_v9 }
 0x640   :  { %13176 = vmatmul.mubr.f32.vlgmr.msra.gmra.mrb[24].mxu1 %v1906_v56 }
 0x641   :  { %14230 = vmatpush3.bf16.msra.mxu1 %v15046_v40  ;;  %13184 = vmatprep.mubr.msk.f32.mxu1 %vm14865_vm1, %v14866_v2 }
 0x642   :  { %13182 = vmatprep.subr.mxu1 %v14866_v2 }
 0x645   :  { %13183 = vmatpush3.msra.mxu1 %v15051_v41 }
 0x646   :  { %13185 = vmatmul.mubr.f32.vlgmr.msra.gmra.mrb[26].mxu1 %v1902_v52  ;;  %14231 = vmatprep.subr.bf16.mxu1 %v14864_v9 }
 0x647   :  { %14233 = vmatpush3.bf16.msra.mxu1 %v15057_v42  ;;  %13193 = vmatprep.mubr.msk.f32.mxu1 %vm14865_vm1, %v14866_v2 }
 0x648   :  { %13191 = vmatprep.subr.mxu1 %v14866_v2 }
 0x64b   :  { %13192 = vmatpush3.msra.mxu1 %v15030_v5 }
 0x64c   :  { %13194 = vmatmul.mubr.f32.vlgmr.msra.gmra.mrb[28].mxu1 %v1903_v53  ;;  %14234 = vmatprep.subr.bf16.mxu1 %v14864_v9 }
 0x64d   :  { %14236 = vmatpush3.bf16.msra.mxu1 %v15025_v1  ;;  %13202 = vmatprep.mubr.msk.f32.mxu1 %vm14865_vm1, %v14866_v2 }
 0x64e   :  { %13200 = vmatprep.subr.mxu1 %v14866_v2 }
 0x651   :  { %13201 = vmatpush3.msra.mxu1 %v15016_v60 }
 0x652   :  { %13203 = vmatmul.mubr.f32.vlgmr.msra.gmra.mrb[30].mxu1 %v1904_v54  ;;  %14240 = vmatprep.subr.bf16.mxu1 %v14864_v9 }
 0x653   :  { %14242 = vmatpush3.bf16.msra.mxu1 %v15025_v1  ;;  %13220 = vmatprep.mubr.msk.f32.mxu1 %vm14865_vm1, %v14866_v2 }
 0x654   :  { %13218 = vmatprep.subr.mxu1 %v14866_v2 }
 0x657   :  { %13219 = vmatpush3.msra.mxu1 %v15016_v60 }
 0x658   :  { %13221 = vmatmul.mubr.f32.vlgmr.msra.gmra.mrb[32].mxu1 %v1902_v52  ;;  %14246 = vmatprep.subr.bf16.mxu1 %v14864_v9 }
 0x659   :  { %14248 = vmatpush3.bf16.msra.mxu1 %v15046_v40  ;;  %13238 = vmatprep.mubr.msk.f32.mxu1 %vm14865_vm1, %v14866_v2 }
 0x65a   :  { %13236 = vmatprep.subr.mxu1 %v14866_v2 }
 0x65d   :  { %13237 = vmatpush3.msra.mxu1 %v15051_v41 }
 0x65e   :  { %14252 = vmatprep.subr.bf16.mxu1 %v14864_v9 }
 0x70b   :  { %v2228_v57 = vpop.f32.mrb[8].mxu0 }
 0x70c   :  { %v13213_v58 = vpop.f32.mrb[9].mxu0 }
 0x713   :  { %v1908_v59 = vpop.f32.mrb[24].mxu1 }
 0x714   :  { %v13177_v61 = vpop.f32.mrb[25].mxu1 }
 0x719   :  { %v1994_v62 = vpop.f32.mrb[26].mxu1 }
 0x71a   :  { %v1995_v63 = vadd.f32 %v1994_v62, %v1908_v59  ;;  %v13186_v4 = vpop.f32.mrb[27].mxu1 }
 0x71f   :  { %v2072_v6 = vpop.f32.mrb[28].mxu1 }
 0x720   :  { %v2073_v7 = vadd.f32 %v2072_v6, %v1995_v63  ;;  %v13195_v8 = vpop.f32.mrb[29].mxu1  ;;  %v2341_v63 = vld [vmem:[#allocation2 + $0x18] sm:$0xff] }
 0x725   :  { %v2148_v12 = vpop.f32.mrb[30].mxu1 }
 0x726   :  { %v2149_v14 = vadd.f32 %v2148_v12, %v2073_v7  ;;  %v13204_v18 = vpop.f32.mrb[31].mxu1 }
 0x728   :  { %v2229_v19 = vadd.f32 %v2228_v57, %v2149_v14 }
 0x72b   :  { %v2302_v23 = vpop.f32.mrb[32].mxu1 }
 0x72c   :  { %v2303_v31 = vadd.f32 %v2302_v23, %v2229_v19  ;;  %v13222_v32 = vpop.f32.mrb[33].mxu1 }
 0x72e   :  { %v2306_v37 = vadd.f32 %v2303_v31, %v1831_v36 }
 0x730   :  { %v12362_v3 = vmul.f32 -1.442695, %v2306_v37 }
 0x732   :  { %14750 = vpow2.f32 %v12362_v3 }
 0x73c   :  { %v14751_v10 = vpop.eup %14750 }
 0x73d   :  { %v2310_v11 = vadd.f32 1.0, %v14751_v10 }
 0x73f   :  { %14752 = vrcp.f32 %v2310_v11 }
 0x749   :  { %v14753_v16 = vpop.eup %14752 }
 0x74a   :  { %v2313_v17 = vmul.f32 2.0, %v14753_v16  ;;  %v2315_v24 = vmul.f32 %v14753_v16, %v15216_v46 }
 0x74c   :  { %v12363_v20 = vadd.f32 -1.0, %v2313_v17 }
 0x74e   :  { %2317 = vrot.lane.b32.xlu0 %v12363_v20, %s14867_s1 }
 0x7c0   :  { %v2318_v21 = vpop.permute.xlu0 %2317 }
 0x7c1   :  { %v2320_v22 = vmul.f32 %v14753_v16, %v2318_v21 }
 0x7c3   :  { %2322 = vrot.lane.b32.xlu1 %v2320_v22, %s14868_s8 }
 0x835   :  { %v2323_v25 = vpop.permute.xlu1 %2322 }
 0x836   :  { %v15265_v26 = vadd.f32 %v2323_v25, %v2315_v24 }
 0x838   :  { %14754 = vtanh.f32 %v15265_v26 }
 0x842   :  { %v14755_v28 = vpop.eup %14754 }
 0x843   :  { %2328 = vrot.lane.b32.xlu0 %v14755_v28, %s14869_s9 }
 0x8b5   :  { %v2329_v27 = vpop.permute.xlu0 %2328 }
 0x8b6   :  { %v15269_v29 = vmul.f32 %v14753_v16, %v2329_v27 }
 0x8b8   :  { %2333 = vrot.lane.b32.xlu1 %v15269_v29, %s14870_s10 }
 0x92a   :  { %v2334_v30 = vpop.permute.xlu1 %2333 }
 0x92b   :  { %2336 = vst.msk [vmem:[#allocation3 + $0x10] sm:$0xff] %vm1315_vm4, %v2334_v30  ;;  %v2342_v33 = vsel %vm809_vm3, %v2334_v30, 0 }
 0x92c   :  { %v2412_v34 = vand.u32 4294901760, %v2342_v33 }
 0x92e   :  { %v2413_v35 = vsub.f32 %v2342_v33, %v2412_v34  ;;  %13239 = vmatmul.mubr.f32.vlgmr.msra.gmra.mrb[34].mxu1 %v2412_v34 }
 0x92f   :  { %14254 = vmatpush3.bf16.msra.mxu1 %v15025_v1  ;;  %13256 = vmatprep.mubr.msk.f32.mxu1 %vm14865_vm1, %v14866_v2 }
 0x930   :  { %v2414_v38 = vand.u32 4294901760, %v2413_v35  ;;  %13254 = vmatprep.subr.mxu1 %v14866_v2 }
 0x932   :  { %v2415_v39 = vsub.f32 %v2413_v35, %v2414_v38 }
 0x933   :  { %13255 = vmatpush3.msra.mxu1 %v15016_v60 }
 0x934   :  { %13257 = vmatmul.mubr.f32.vlgmr.msra.gmra.mrb[36].mxu1 %v2414_v38  ;;  %14258 = vmatprep.subr.bf16.mxu1 %v14864_v9  ;;  %v2416_v43 = vand.u32 4294901760, %v2415_v39 }
 0x935   :  { %14260 = vmatpush3.bf16.msra.mxu1 %v15025_v1  ;;  %13274 = vmatprep.mubr.msk.f32.mxu1 %vm14865_vm1, %v14866_v2 }
 0x936   :  { %13230 = vmatmul.mubr.f32.vlgmr.msra.gmra.mrb[10].mxu0 %v2416_v43  ;;  %13272 = vmatprep.subr.mxu1 %v14866_v2 }
 0x937   :  { %14251 = vmatpush3.bf16.msra.mxu0 %v15057_v42  ;;  %13247 = vmatprep.mubr.msk.f32.mxu0 %vm14865_vm1, %v14866_v2 }
 0x938   :  { %13245 = vmatprep.subr.mxu0 %v14866_v2 }
 0x939   :  { %13273 = vmatpush3.msra.mxu1 %v15016_v60 }
 0x93a   :  { %13275 = vmatmul.mubr.f32.vlgmr.msra.gmra.mrb[38].mxu1 %v2412_v34  ;;  %14264 = vmatprep.subr.bf16.mxu1 %v14864_v9 }
 0x93b   :  { %13246 = vmatpush3.msra.mxu0 %v15030_v5  ;;  %14266 = vmatpush3.bf16.msra.mxu1 %v15046_v40 }
 0x93c   :  { %13248 = vmatmul.mubr.f32.vlgmr.msra.gmra.mrb[12].mxu0 %v2413_v35  ;;  %14255 = vmatprep.subr.bf16.mxu0 %v14864_v9 }
 0x93d   :  { %14257 = vmatpush3.bf16.msra.mxu0 %v15082_v15  ;;  %13265 = vmatprep.mubr.msk.f32.mxu0 %vm14865_vm1, %v14866_v2 }
 0x93e   :  { %13263 = vmatprep.subr.mxu0 %v14866_v2  ;;  %13290 = vmatprep.subr.mxu1 %v14866_v2 }
 0x93f   :  { %13291 = vmatpush3.msra.mxu1 %v15051_v41  ;;  %13292 = vmatprep.mubr.msk.f32.mxu1 %vm14865_vm1, %v14866_v2 }
 0x940   :  { %14270 = vmatprep.subr.bf16.mxu1 %v14864_v9 }
 0x941   :  { %13264 = vmatpush3.msra.mxu0 %v15035_v13 }
 0x942   :  { %13266 = vmatmul.mubr.f32.vlgmr.msra.gmra.mrb[14].mxu0 %v2412_v34  ;;  %14261 = vmatprep.subr.bf16.mxu0 %v14864_v9 }
 0x943   :  { %14263 = vmatpush3.bf16.msra.mxu0 %v15025_v1  ;;  %13283 = vmatprep.mubr.msk.f32.mxu0 %vm14865_vm1, %v14866_v2 }
 0x944   :  { %13281 = vmatprep.subr.mxu0 %v14866_v2 }
 0x947   :  { %13282 = vmatpush3.msra.mxu0 %v15016_v60 }
 0x948   :  { %14267 = vmatprep.subr.bf16.mxu0 %v14864_v9 }
 0xa01   :  { %v2504_v44 = vpop.f32.mrb[34].mxu1 }
 0xa02   :  { %v13240_v45 = vpop.f32.mrb[35].mxu1 }
 0xa07   :  { %v2658_v46 = vpop.f32.mrb[36].mxu1 }
 0xa08   :  { %v13258_v47 = vpop.f32.mrb[37].mxu1 }
 0xa09   :  { %v2418_v48 = vpop.f32.mrb[10].mxu0 }
 0xa0a   :  { %v2505_v50 = vadd.f32 %v2504_v44, %v2418_v48  ;;  %v13231_v51 = vpop.f32.mrb[11].mxu0 }
 0xa0b   :  { %v2851_v51 = vld [vmem:[#allocation2 + $0x20] sm:$0xff] }
 0xa0d   :  { %v2812_v52 = vpop.f32.mrb[38].mxu1 }
 0xa0e   :  { %v13276_v53 = vpop.f32.mrb[39].mxu1 }
 0xa0f   :  { %v2582_v54 = vpop.f32.mrb[12].mxu0 }
 0xa10   :  { %v2583_v55 = vadd.f32 %v2582_v54, %v2505_v50  ;;  %v13249_v56 = vpop.f32.mrb[13].mxu0 }
 0xa12   :  { %v2659_v57 = vadd.f32 %v2658_v46, %v2583_v55 }
 0xa15   :  { %v2738_v58 = vpop.f32.mrb[14].mxu0 }
 0xa16   :  { %v2739_v59 = vadd.f32 %v2738_v58, %v2659_v57  ;;  %v13267_v61 = vpop.f32.mrb[15].mxu0 }
 0xa18   :  { %v2813_v62 = vadd.f32 %v2812_v52, %v2739_v59 }
 0xa1a   :  { %v2816_v4 = vadd.f32 %v2813_v62, %v2341_v63 }
 0xa1c   :  { %v12364_v6 = vmul.f32 -1.442695, %v2816_v4 }
 0xa1e   :  { %14756 = vpow2.f32 %v12364_v6 }
 0xa28   :  { %v14757_v7 = vpop.eup %14756 }
 0xa29   :  { %v2820_v8 = vadd.f32 1.0, %v14757_v7 }
 0xa2b   :  { %14758 = vrcp.f32 %v2820_v8 }
 0xa35   :  { %v14759_v12 = vpop.eup %14758 }
 0xa36   :  { %v2823_v14 = vmul.f32 2.0, %v14759_v12  ;;  %v2825_v31 = vmul.f32 %v14759_v12, %v15265_v26 }
 0xa38   :  { %v12365_v18 = vadd.f32 -1.0, %v2823_v14 }
 0xa3a   :  { %2827 = vrot.lane.b32.xlu0 %v12365_v18, %s14867_s1 }
 0xaac   :  { %v2828_v19 = vpop.permute.xlu0 %2827 }
 0xaad   :  { %v2830_v23 = vmul.f32 %v14759_v12, %v2828_v19 }
 0xaaf   :  { %2832 = vrot.lane.b32.xlu1 %v2830_v23, %s14868_s8 }
 0xb21   :  { %v2833_v32 = vpop.permute.xlu1 %2832 }
 0xb22   :  { %v15314_v36 = vadd.f32 %v2833_v32, %v2825_v31 }
 0xb24   :  { %14760 = vtanh.f32 %v15314_v36 }
 0xb2e   :  { %v14761_v37 = vpop.eup %14760 }
 0xb2f   :  { %2838 = vrot.lane.b32.xlu0 %v14761_v37, %s14869_s9 }
 0xba1   :  { %v2839_v3 = vpop.permute.xlu0 %2838 }
 0xba2   :  { %v15318_v10 = vmul.f32 %v14759_v12, %v2839_v3 }
 0xba4   :  { %2843 = vrot.lane.b32.xlu1 %v15318_v10, %s14870_s10 }
 0xc16   :  { %v2844_v11 = vpop.permute.xlu1 %2843 }
 0xc17   :  { %2846 = vst.msk [vmem:[#allocation3 + $0x18] sm:$0xff] %vm1315_vm4, %v2844_v11  ;;  %v2852_v16 = vsel %vm809_vm3, %v2844_v11, 0 }
 0xc18   :  { %v2922_v17 = vand.u32 4294901760, %v2852_v16 }
 0xc1a   :  { %v2923_v20 = vsub.f32 %v2852_v16, %v2922_v17  ;;  %13293 = vmatmul.mubr.f32.vlgmr.msra.gmra.mrb[40].mxu1 %v2922_v17 }
 0xc1b   :  { %14272 = vmatpush3.bf16.msra.mxu1 %v15025_v1  ;;  %13310 = vmatprep.mubr.msk.f32.mxu1 %vm14865_vm1, %v14866_v2 }
 0xc1c   :  { %v2924_v21 = vand.u32 4294901760, %v2923_v20  ;;  %13308 = vmatprep.subr.mxu1 %v14866_v2 }
 0xc1e   :  { %v2925_v22 = vsub.f32 %v2923_v20, %v2924_v21 }
 0xc1f   :  { %13309 = vmatpush3.msra.mxu1 %v15016_v60 }
 0xc20   :  { %13311 = vmatmul.mubr.f32.vlgmr.msra.gmra.mrb[42].mxu1 %v2924_v21  ;;  %14276 = vmatprep.subr.bf16.mxu1 %v14864_v9  ;;  %v2926_v24 = vand.u32 4294901760, %v2925_v22 }
 0xc21   :  { %14278 = vmatpush3.bf16.msra.mxu1 %v15025_v1  ;;  %13328 = vmatprep.mubr.msk.f32.mxu1 %vm14865_vm1, %v14866_v2 }
 0xc22   :  { %13284 = vmatmul.mubr.f32.vlgmr.msra.gmra.mrb[16].mxu0 %v2926_v24  ;;  %13326 = vmatprep.subr.mxu1 %v14866_v2 }
 0xc23   :  { %14269 = vmatpush3.bf16.msra.mxu0 %v15057_v42  ;;  %13301 = vmatprep.mubr.msk.f32.mxu0 %vm14865_vm1, %v14866_v2 }
 0xc24   :  { %13299 = vmatprep.subr.mxu0 %v14866_v2 }
 0xc25   :  { %13327 = vmatpush3.msra.mxu1 %v15016_v60 }
 0xc26   :  { %13329 = vmatmul.mubr.f32.vlgmr.msra.gmra.mrb[44].mxu1 %v2922_v17  ;;  %14282 = vmatprep.subr.bf16.mxu1 %v14864_v9 }
 0xc27   :  { %13300 = vmatpush3.msra.mxu0 %v15030_v5  ;;  %14284 = vmatpush3.bf16.msra.mxu1 %v15046_v40 }
 0xc28   :  { %13302 = vmatmul.mubr.f32.vlgmr.msra.gmra.mrb[18].mxu0 %v2923_v20  ;;  %14273 = vmatprep.subr.bf16.mxu0 %v14864_v9 }
 0xc29   :  { %14275 = vmatpush3.bf16.msra.mxu0 %v15082_v15  ;;  %13319 = vmatprep.mubr.msk.f32.mxu0 %vm14865_vm1, %v14866_v2 }
 0xc2a   :  { %13317 = vmatprep.subr.mxu0 %v14866_v2  ;;  %13344 = vmatprep.subr.mxu1 %v14866_v2 }
 0xc2b   :  { %13345 = vmatpush3.msra.mxu1 %v15051_v41  ;;  %13346 = vmatprep.mubr.msk.f32.mxu1 %vm14865_vm1, %v14866_v2 }
 0xc2c   :  { %14288 = vmatprep.subr.bf16.mxu1 %v14864_v9 }
 0xc2d   :  { %13318 = vmatpush3.msra.mxu0 %v15035_v13 }
 0xc2e   :  { %13320 = vmatmul.mubr.f32.vlgmr.msra.gmra.mrb[20].mxu0 %v2922_v17  ;;  %14279 = vmatprep.subr.bf16.mxu0 %v14864_v9 }
 0xc2f   :  { %14281 = vmatpush3.bf16.msra.mxu0 %v15025_v1  ;;  %13337 = vmatprep.mubr.msk.f32.mxu0 %vm14865_vm1, %v14866_v2 }
 0xc30   :  { %13335 = vmatprep.subr.mxu0 %v14866_v2 }
 0xc33   :  { %13336 = vmatpush3.msra.mxu0 %v15016_v60 }
 0xc34   :  { %14285 = vmatprep.subr.bf16.mxu0 %v14864_v9 }
 0xced   :  { %v3014_v25 = vpop.f32.mrb[40].mxu1 }
 0xcee   :  { %v13294_v26 = vpop.f32.mrb[41].mxu1 }
 0xcf3   :  { %v3168_v28 = vpop.f32.mrb[42].mxu1 }
 0xcf4   :  { %v13312_v27 = vpop.f32.mrb[43].mxu1 }
 0xcf5   :  { %v2928_v30 = vpop.f32.mrb[16].mxu0 }
 0xcf6   :  { %v3015_v33 = vadd.f32 %v3014_v25, %v2928_v30  ;;  %v13285_v34 = vpop.f32.mrb[17].mxu0 }
 0xcf9   :  { %v3322_v35 = vpop.f32.mrb[44].mxu1 }
 0xcfa   :  { %v13330_v38 = vpop.f32.mrb[45].mxu1 }
 0xcfb   :  { %v3092_v39 = vpop.f32.mrb[18].mxu0 }
 0xcfc   :  { %v3093_v43 = vadd.f32 %v3092_v39, %v3015_v33  ;;  %v13303_v44 = vpop.f32.mrb[19].mxu0 }
 0xcfe   :  { %v3169_v45 = vadd.f32 %v3168_v28, %v3093_v43 }
 0xd01   :  { %v3248_v46 = vpop.f32.mrb[20].mxu0 }
 0xd02   :  { %v3249_v47 = vadd.f32 %v3248_v46, %v3169_v45  ;;  %v13321_v48 = vpop.f32.mrb[21].mxu0 }
 0xd04   :  { %v3323_v50 = vadd.f32 %v3322_v35, %v3249_v47  ;;  %v3361_v35 = vld [vmem:[#allocation2 + $0x28] sm:$0xff] }
 0xd06   :  { %v3326_v52 = vadd.f32 %v3323_v50, %v2851_v51 }
 0xd08   :  { %v12366_v53 = vmul.f32 -1.442695, %v3326_v52 }
 0xd0a   :  { %14762 = vpow2.f32 %v12366_v53 }
 0xd14   :  { %v14763_v54 = vpop.eup %14762 }
 0xd15   :  { %v3330_v55 = vadd.f32 1.0, %v14763_v54 }
 0xd17   :  { %14764 = vrcp.f32 %v3330_v55 }
 0xd21   :  { %v14765_v56 = vpop.eup %14764 }
 0xd22   :  { %v3333_v57 = vmul.f32 2.0, %v14765_v56  ;;  %v3335_v62 = vmul.f32 %v14765_v56, %v15314_v36 }
 0xd24   :  { %v12367_v58 = vadd.f32 -1.0, %v3333_v57 }
 0xd26   :  { %3337 = vrot.lane.b32.xlu0 %v12367_v58, %s14867_s1 }
 0xd98   :  { %v3338_v59 = vpop.permute.xlu0 %3337 }
 0xd99   :  { %v3340_v61 = vmul.f32 %v14765_v56, %v3338_v59 }
 0xd9b   :  { %3342 = vrot.lane.b32.xlu1 %v3340_v61, %s14868_s8 }
 0xe0d   :  { %v3343_v63 = vpop.permute.xlu1 %3342 }
 0xe0e   :  { %v15363_v4 = vadd.f32 %v3343_v63, %v3335_v62 }
 0xe10   :  { %14766 = vtanh.f32 %v15363_v4 }
 0xe1a   :  { %v14767_v6 = vpop.eup %14766 }
 0xe1b   :  { %3348 = vrot.lane.b32.xlu0 %v14767_v6, %s14869_s9 }
 0xe8d   :  { %v3349_v7 = vpop.permute.xlu0 %3348 }
 0xe8e   :  { %v15367_v8 = vmul.f32 %v14765_v56, %v3349_v7 }
 0xe90   :  { %3353 = vrot.lane.b32.xlu1 %v15367_v8, %s14870_s10 }
 0xf02   :  { %v3354_v12 = vpop.permute.xlu1 %3353 }
 0xf03   :  { %3356 = vst.msk [vmem:[#allocation3 + $0x20] sm:$0xff] %vm1315_vm4, %v3354_v12  ;;  %v3362_v14 = vsel %vm809_vm3, %v3354_v12, 0 }
 0xf04   :  { %v3432_v18 = vand.u32 4294901760, %v3362_v14 }
 0xf06   :  { %v3433_v19 = vsub.f32 %v3362_v14, %v3432_v18  ;;  %13347 = vmatmul.mubr.f32.vlgmr.msra.gmra.mrb[46].mxu1 %v3432_v18 }
 0xf07   :  { %14290 = vmatpush3.bf16.msra.mxu1 %v15025_v1  ;;  %13364 = vmatprep.mubr.msk.f32.mxu1 %vm14865_vm1, %v14866_v2 }
 0xf08   :  { %v3434_v23 = vand.u32 4294901760, %v3433_v19  ;;  %13362 = vmatprep.subr.mxu1 %v14866_v2 }
 0xf0a   :  { %v3435_v31 = vsub.f32 %v3433_v19, %v3434_v23 }
 0xf0b   :  { %13363 = vmatpush3.msra.mxu1 %v15016_v60 }
 0xf0c   :  { %13365 = vmatmul.mubr.f32.vlgmr.msra.gmra.mrb[48].mxu1 %v3434_v23  ;;  %14294 = vmatprep.subr.bf16.mxu1 %v14864_v9  ;;  %v3436_v32 = vand.u32 4294901760, %v3435_v31 }
 0xf0d   :  { %14296 = vmatpush3.bf16.msra.mxu1 %v15025_v1  ;;  %13382 = vmatprep.mubr.msk.f32.mxu1 %vm14865_vm1, %v14866_v2 }
 0xf0e   :  { %13338 = vmatmul.mubr.f32.vlgmr.msra.gmra.mrb[22].mxu0 %v3436_v32  ;;  %13380 = vmatprep.subr.mxu1 %v14866_v2 }
 0xf0f   :  { %14287 = vmatpush3.bf16.msra.mxu0 %v15057_v42  ;;  %13355 = vmatprep.mubr.msk.f32.mxu0 %vm14865_vm1, %v14866_v2 }
 0xf10   :  { %13353 = vmatprep.subr.mxu0 %v14866_v2 }
 0xf11   :  { %13381 = vmatpush3.msra.mxu1 %v15016_v60 }
 0xf12   :  { %13383 = vmatmul.mubr.f32.vlgmr.msra.gmra.mrb[50].mxu1 %v3432_v18  ;;  %14300 = vmatprep.subr.bf16.mxu1 %v14864_v9 }
 0xf13   :  { %13354 = vmatpush3.msra.mxu0 %v15030_v5  ;;  %14302 = vmatpush3.bf16.msra.mxu1 %v15046_v40 }
 0xf14   :  { %13356 = vmatmul.mubr.f32.vlgmr.msra.gmra.mrb[24].mxu0 %v3433_v19  ;;  %14291 = vmatprep.subr.bf16.mxu0 %v14864_v9 }
 0xf15   :  { %14293 = vmatpush3.bf16.msra.mxu0 %v15082_v15  ;;  %13373 = vmatprep.mubr.msk.f32.mxu0 %vm14865_vm1, %v14866_v2 }
 0xf16   :  { %13371 = vmatprep.subr.mxu0 %v14866_v2  ;;  %13398 = vmatprep.subr.mxu1 %v14866_v2 }
 0xf17   :  { %13399 = vmatpush3.msra.mxu1 %v15051_v41  ;;  %13400 = vmatprep.mubr.msk.f32.mxu1 %vm14865_vm1, %v14866_v2 }
 0xf18   :  { %14306 = vmatprep.subr.bf16.mxu1 %v14864_v9 }
 0xf19   :  { %13372 = vmatpush3.msra.mxu0 %v15035_v13 }
 0xf1a   :  { %13374 = vmatmul.mubr.f32.vlgmr.msra.gmra.mrb[26].mxu0 %v3432_v18  ;;  %14297 = vmatprep.subr.bf16.mxu0 %v14864_v9 }
 0xf1b   :  { %14299 = vmatpush3.bf16.msra.mxu0 %v15025_v1  ;;  %13391 = vmatprep.mubr.msk.f32.mxu0 %vm14865_vm1, %v14866_v2 }
 0xf1c   :  { %13389 = vmatprep.subr.mxu0 %v14866_v2 }
 0xf1f   :  { %13390 = vmatpush3.msra.mxu0 %v15016_v60 }
 0xf20   :  { %14303 = vmatprep.subr.bf16.mxu0 %v14864_v9 }
 0xfd9   :  { %v3524_v36 = vpop.f32.mrb[46].mxu1 }
 0xfda   :  { %v13348_v37 = vpop.f32.mrb[47].mxu1 }
 0xfdf   :  { %v3678_v3 = vpop.f32.mrb[48].mxu1 }
 0xfe0   :  { %v13366_v11 = vpop.f32.mrb[49].mxu1 }
 0xfe1   :  { %v3438_v16 = vpop.f32.mrb[22].mxu0 }
 0xfe2   :  { %v3525_v17 = vadd.f32 %v3524_v36, %v3438_v16  ;;  %v13339_v20 = vpop.f32.mrb[23].mxu0 }
 0xfe3   :  { %v3871_v20 = vld [vmem:[#allocation2 + $0x30] sm:$0xff] }
 0xfe5   :  { %v3832_v21 = vpop.f32.mrb[50].mxu1 }
 0xfe6   :  { %v13384_v22 = vpop.f32.mrb[51].mxu1 }
 0xfe7   :  { %v3602_v24 = vpop.f32.mrb[24].mxu0 }
 0xfe8   :  { %v3603_v25 = vadd.f32 %v3602_v24, %v3525_v17  ;;  %v13357_v26 = vpop.f32.mrb[25].mxu0 }
 0xfea   :  { %v3679_v28 = vadd.f32 %v3678_v3, %v3603_v25 }
 0xfed   :  { %v3758_v27 = vpop.f32.mrb[26].mxu0 }
 0xfee   :  { %v3759_v30 = vadd.f32 %v3758_v27, %v3679_v28  ;;  %v13375_v33 = vpop.f32.mrb[27].mxu0 }
 0xff0   :  { %v3833_v34 = vadd.f32 %v3832_v21, %v3759_v30 }
 0xff2   :  { %v3836_v38 = vadd.f32 %v3833_v34, %v3361_v35 }
 0xff4   :  { %v12368_v39 = vmul.f32 -1.442695, %v3836_v38 }
 0xff6   :  { %14768 = vpow2.f32 %v12368_v39 }
0x1000   :  { %v14769_v43 = vpop.eup %14768 }
0x1001   :  { %v3840_v44 = vadd.f32 1.0, %v14769_v43 }
0x1003   :  { %14770 = vrcp.f32 %v3840_v44 }
0x100d   :  { %v14771_v45 = vpop.eup %14770 }
0x100e   :  { %v3843_v46 = vmul.f32 2.0, %v14771_v45  ;;  %v3845_v51 = vmul.f32 %v14771_v45, %v15363_v4 }
0x1010   :  { %v12369_v47 = vadd.f32 -1.0, %v3843_v46 }
0x1012   :  { %3847 = vrot.lane.b32.xlu0 %v12369_v47, %s14867_s1 }
0x1084   :  { %v3848_v48 = vpop.permute.xlu0 %3847 }
0x1085   :  { %v3850_v50 = vmul.f32 %v14771_v45, %v3848_v48 }
0x1087   :  { %3852 = vrot.lane.b32.xlu1 %v3850_v50, %s14868_s8 }
0x10f9   :  { %v3853_v52 = vpop.permute.xlu1 %3852 }
0x10fa   :  { %v15412_v53 = vadd.f32 %v3853_v52, %v3845_v51 }
0x10fc   :  { %14772 = vtanh.f32 %v15412_v53 }
0x1106   :  { %v14773_v54 = vpop.eup %14772 }
0x1107   :  { %3858 = vrot.lane.b32.xlu0 %v14773_v54, %s14869_s9 }
0x1179   :  { %v3859_v55 = vpop.permute.xlu0 %3858 }
0x117a   :  { %v15416_v56 = vmul.f32 %v14771_v45, %v3859_v55 }
0x117c   :  { %3863 = vrot.lane.b32.xlu1 %v15416_v56, %s14870_s10 }
0x11ee   :  { %v3864_v57 = vpop.permute.xlu1 %3863 }
0x11ef   :  { %3866 = vst.msk [vmem:[#allocation3 + $0x28] sm:$0xff] %vm1315_vm4, %v3864_v57  ;;  %v3872_v58 = vsel %vm809_vm3, %v3864_v57, 0 }
0x11f0   :  { %v3942_v59 = vand.u32 4294901760, %v3872_v58 }
0x11f2   :  { %v3943_v61 = vsub.f32 %v3872_v58, %v3942_v59  ;;  %13401 = vmatmul.mubr.f32.vlgmr.msra.gmra.mrb[52].mxu1 %v3942_v59 }
0x11f3   :  { %14308 = vmatpush3.bf16.msra.mxu1 %v15025_v1  ;;  %13418 = vmatprep.mubr.msk.f32.mxu1 %vm14865_vm1, %v14866_v2 }
0x11f4   :  { %v3944_v62 = vand.u32 4294901760, %v3943_v61  ;;  %13416 = vmatprep.subr.mxu1 %v14866_v2 }
0x11f6   :  { %v3945_v63 = vsub.f32 %v3943_v61, %v3944_v62 }
0x11f7   :  { %13417 = vmatpush3.msra.mxu1 %v15016_v60 }
0x11f8   :  { %13419 = vmatmul.mubr.f32.vlgmr.msra.gmra.mrb[54].mxu1 %v3944_v62  ;;  %14312 = vmatprep.subr.bf16.mxu1 %v14864_v9  ;;  %v3946_v4 = vand.u32 4294901760, %v3945_v63 }
0x11f9   :  { %14314 = vmatpush3.bf16.msra.mxu1 %v15025_v1  ;;  %13436 = vmatprep.mubr.msk.f32.mxu1 %vm14865_vm1, %v14866_v2 }
0x11fa   :  { %13392 = vmatmul.mubr.f32.vlgmr.msra.gmra.mrb[28].mxu0 %v3946_v4  ;;  %13434 = vmatprep.subr.mxu1 %v14866_v2 }
0x11fb   :  { %14305 = vmatpush3.bf16.msra.mxu0 %v15057_v42  ;;  %13409 = vmatprep.mubr.msk.f32.mxu0 %vm14865_vm1, %v14866_v2 }
0x11fc   :  { %13407 = vmatprep.subr.mxu0 %v14866_v2 }
0x11fd   :  { %13435 = vmatpush3.msra.mxu1 %v15016_v60 }
0x11fe   :  { %13437 = vmatmul.mubr.f32.vlgmr.msra.gmra.mrb[56].mxu1 %v3942_v59  ;;  %14318 = vmatprep.subr.bf16.mxu1 %v14864_v9 }
0x11ff   :  { %13408 = vmatpush3.msra.mxu0 %v15030_v5  ;;  %14320 = vmatpush3.bf16.msra.mxu1 %v15046_v40 }
0x1200   :  { %13410 = vmatmul.mubr.f32.vlgmr.msra.gmra.mrb[30].mxu0 %v3943_v61  ;;  %14309 = vmatprep.subr.bf16.mxu0 %v14864_v9 }
0x1201   :  { %14311 = vmatpush3.bf16.msra.mxu0 %v15082_v15  ;;  %13427 = vmatprep.mubr.msk.f32.mxu0 %vm14865_vm1, %v14866_v2 }
0x1202   :  { %13425 = vmatprep.subr.mxu0 %v14866_v2  ;;  %13452 = vmatprep.subr.mxu1 %v14866_v2 }
0x1203   :  { %13453 = vmatpush3.msra.mxu1 %v15051_v41  ;;  %13454 = vmatprep.mubr.msk.f32.mxu1 %vm14865_vm1, %v14866_v2 }
0x1204   :  { %14324 = vmatprep.subr.bf16.mxu1 %v14864_v9 }
0x1205   :  { %13426 = vmatpush3.msra.mxu0 %v15035_v13 }
0x1206   :  { %13428 = vmatmul.mubr.f32.vlgmr.msra.gmra.mrb[32].mxu0 %v3942_v59  ;;  %14315 = vmatprep.subr.bf16.mxu0 %v14864_v9 }
0x1207   :  { %14317 = vmatpush3.bf16.msra.mxu0 %v15025_v1  ;;  %13445 = vmatprep.mubr.msk.f32.mxu0 %vm14865_vm1, %v14866_v2 }
0x1208   :  { %13443 = vmatprep.subr.mxu0 %v14866_v2 }
0x120b   :  { %13444 = vmatpush3.msra.mxu0 %v15016_v60 }
0x120c   :  { %14321 = vmatprep.subr.bf16.mxu0 %v14864_v9 }
0x12c5   :  { %v4034_v40 = vpop.f32.mrb[52].mxu1 }
0x12c6   :  { %v13402_v41 = vpop.f32.mrb[53].mxu1 }
0x12cb   :  { %v4188_v6 = vpop.f32.mrb[54].mxu1 }
0x12cc   :  { %v13420_v7 = vpop.f32.mrb[55].mxu1 }
0x12cd   :  { %v3948_v12 = vpop.f32.mrb[28].mxu0 }
0x12ce   :  { %v4035_v14 = vadd.f32 %v4034_v40, %v3948_v12  ;;  %v13393_v18 = vpop.f32.mrb[29].mxu0 }
0x12d1   :  { %v4342_v19 = vpop.f32.mrb[56].mxu1 }
0x12d2   :  { %v13438_v23 = vpop.f32.mrb[57].mxu1 }
0x12d3   :  { %v4112_v31 = vpop.f32.mrb[30].mxu0 }
0x12d4   :  { %v4113_v32 = vadd.f32 %v4112_v31, %v4035_v14  ;;  %v13411_v36 = vpop.f32.mrb[31].mxu0 }
0x12d6   :  { %v4189_v37 = vadd.f32 %v4188_v6, %v4113_v32  ;;  %v4381_v6 = vld [vmem:[#allocation2 + $0x38] sm:$0xff] }
0x12d9   :  { %v4268_v3 = vpop.f32.mrb[32].mxu0 }
0x12da   :  { %v4269_v11 = vadd.f32 %v4268_v3, %v4189_v37  ;;  %v13429_v16 = vpop.f32.mrb[33].mxu0 }
0x12dc   :  { %v4343_v17 = vadd.f32 %v4342_v19, %v4269_v11 }
0x12de   :  { %v4346_v21 = vadd.f32 %v4343_v17, %v3871_v20  ;;  %v4894_v17 = vld [vmem:[%s16289_s2 + $0x14] sm:$0xf] }
0x12e0   :  { %v12370_v22 = vmul.f32 -1.442695, %v4346_v21  ;;  %v4893_v21 = vld [vmem:[%s16289_s2 + $0xc] sm:$0xff] }
0x12e2   :  { %14774 = vpow2.f32 %v12370_v22  ;;  %v4938_v22 = vsel %vm4936_vm5, %v4894_v17, 0 }
0x12ec   :  { %v14775_v24 = vpop.eup %14774 }
0x12ed   :  { %v4350_v25 = vadd.f32 1.0, %v14775_v24  ;;  %v4944_v24 = vand.u32 4294901760, %v4938_v22 }
0x12ef   :  { %14776 = vrcp.f32 %v4350_v25 }
0x12f9   :  { %v14777_v26 = vpop.eup %14776 }
0x12fa   :  { %v4353_v28 = vmul.f32 2.0, %v14777_v26  ;;  %v4355_v34 = vmul.f32 %v14777_v26, %v15412_v53 }
0x12fc   :  { %v12371_v27 = vadd.f32 -1.0, %v4353_v28 }
0x12fe   :  { %4357 = vrot.lane.b32.xlu0 %v12371_v27, %s14867_s1 }
0x1370   :  { %v4358_v30 = vpop.permute.xlu0 %4357 }
0x1371   :  { %v4360_v33 = vmul.f32 %v14777_v26, %v4358_v30 }
0x1373   :  { %4362 = vrot.lane.b32.xlu1 %v4360_v33, %s14868_s8 }
0x13e5   :  { %v4363_v35 = vpop.permute.xlu1 %4362 }
0x13e6   :  { %v15461_v38 = vadd.f32 %v4363_v35, %v4355_v34 }
0x13e8   :  { %14778 = vtanh.f32 %v15461_v38 }
0x13f2   :  { %v14779_v39 = vpop.eup %14778 }
0x13f3   :  { %4368 = vrot.lane.b32.xlu0 %v14779_v39, %s14869_s9 }
0x1465   :  { %v4369_v43 = vpop.permute.xlu0 %4368 }
0x1466   :  { %v15465_v44 = vmul.f32 %v14777_v26, %v4369_v43  ;;  %v6509_v26 = vld [vmem:[%s16289_s2 + $0x20] sm:$0xf] }
0x1467   :  { %v15531_v28 = vsel %vm4936_vm5, %v6509_v26, 0 }
0x1468   :  { %4373 = vrot.lane.b32.xlu1 %v15465_v44, %s14870_s10  ;;  %v6520_v33 = vand.u32 4294901760, %v15531_v28 }
0x14da   :  { %v4374_v45 = vpop.permute.xlu1 %4373 }
0x14db   :  { %4376 = vst.msk [vmem:[#allocation3 + $0x30] sm:$0xff] %vm1315_vm4, %v4374_v45  ;;  %v4382_v46 = vsel %vm809_vm3, %v4374_v45, 0 }
0x14dc   :  { %v4452_v47 = vand.u32 4294901760, %v4382_v46 }
0x14de   :  { %v4453_v48 = vsub.f32 %v4382_v46, %v4452_v47  ;;  %13455 = vmatmul.mubr.f32.vlgmr.msra.gmra.mrb[58].mxu1 %v4452_v47 }
0x14df   :  { %14326 = vmatpush3.bf16.msra.mxu1 %v15025_v1  ;;  %13472 = vmatprep.mubr.msk.f32.mxu1 %vm14865_vm1, %v14866_v2 }
0x14e0   :  { %v4454_v50 = vand.u32 4294901760, %v4453_v48  ;;  %13470 = vmatprep.subr.mxu1 %v14866_v2 }
0x14e2   :  { %v4455_v51 = vsub.f32 %v4453_v48, %v4454_v50 }
0x14e3   :  { %13471 = vmatpush3.msra.mxu1 %v15016_v60 }
0x14e4   :  { %13473 = vmatmul.mubr.f32.vlgmr.msra.gmra.mrb[60].mxu1 %v4454_v50  ;;  %14330 = vmatprep.subr.bf16.mxu1 %v14864_v9  ;;  %v4456_v52 = vand.u32 4294901760, %v4455_v51 }
0x14e5   :  { %14332 = vmatpush3.bf16.msra.mxu1 %v15025_v1  ;;  %13490 = vmatprep.mubr.msk.f32.mxu1 %vm14865_vm1, %v14866_v2 }
0x14e6   :  { %13446 = vmatmul.mubr.f32.vlgmr.msra.gmra.mrb[34].mxu0 %v4456_v52  ;;  %13488 = vmatprep.subr.mxu1 %v14866_v2 }
0x14e7   :  { %14323 = vmatpush3.bf16.msra.mxu0 %v15057_v42  ;;  %13463 = vmatprep.mubr.msk.f32.mxu0 %vm14865_vm1, %v14866_v2 }
0x14e8   :  { %13461 = vmatprep.subr.mxu0 %v14866_v2 }
0x14e9   :  { %13489 = vmatpush3.msra.mxu1 %v15016_v60 }
0x14ea   :  { %13491 = vmatmul.mubr.f32.vlgmr.msra.gmra.mrb[62].mxu1 %v4452_v47  ;;  %14381 = vmatprep.subr.bf16.mxu1 %v14864_v9 }
0x14eb   :  { %13462 = vmatpush3.msra.mxu0 %v15030_v5  ;;  %13689 = vmatprep.mubr.msk.f32.mxu1 %vm14865_vm1, %v14866_v2 }
0x14ec   :  { %13464 = vmatmul.mubr.f32.vlgmr.msra.gmra.mrb[36].mxu0 %v4453_v48  ;;  %14327 = vmatprep.subr.bf16.mxu0 %v14864_v9 }
0x14ed   :  { %14329 = vmatpush3.bf16.msra.mxu0 %v15082_v15  ;;  %13481 = vmatprep.mubr.msk.f32.mxu0 %vm14865_vm1, %v14866_v2 }
0x14ee   :  { %13479 = vmatprep.subr.mxu0 %v14866_v2 }
0x14f1   :  { %13480 = vmatpush3.msra.mxu0 %v15035_v13 }
0x14f2   :  { %13482 = vmatmul.mubr.f32.vlgmr.msra.gmra.mrb[38].mxu0 %v4452_v47 }
0x15b1   :  { %v4544_v60 = vpop.f32.mrb[58].mxu1 }
0x15b2   :  { %v13456_v1 = vpop.f32.mrb[59].mxu1 }
0x15b7   :  { %v4698_v42 = vpop.f32.mrb[60].mxu1 }
0x15b8   :  { %v13474_v5 = vpop.f32.mrb[61].mxu1 }
0x15b9   :  { %v4458_v53 = vpop.f32.mrb[34].mxu0 }
0x15ba   :  { %v4545_v54 = vadd.f32 %v4544_v60, %v4458_v53  ;;  %v13447_v55 = vpop.f32.mrb[35].mxu0 }
0x15bd   :  { %v4852_v57 = vpop.f32.mrb[62].mxu1 }
0x15be   :  { %v13492_v58 = vpop.f32.mrb[63].mxu1 }
0x15bf   :  { %v4622_v59 = vpop.f32.mrb[36].mxu0 }
0x15c0   :  { %v4623_v61 = vadd.f32 %v4622_v59, %v4545_v54  ;;  %v13465_v15 = vpop.f32.mrb[37].mxu0 }
0x15c2   :  { %v4699_v62 = vadd.f32 %v4698_v42, %v4623_v61 }
0x15c5   :  { %v4778_v63 = vpop.f32.mrb[38].mxu0 }
0x15c6   :  { %v4779_v4 = vadd.f32 %v4778_v63, %v4699_v62  ;;  %v13483_v40 = vpop.f32.mrb[39].mxu0 }
0x15c8   :  { %v4853_v41 = vadd.f32 %v4852_v57, %v4779_v4 }
0x15ca   :  { %v4856_v13 = vadd.f32 %v4853_v41, %v4381_v6 }
0x15cc   :  { %v12372_v7 = vmul.f32 -1.442695, %v4856_v13 }
0x15ce   :  { %14780 = vpow2.f32 %v12372_v7 }
0x15d8   :  { %v14781_v12 = vpop.eup %14780 }
0x15d9   :  { %v4860_v14 = vadd.f32 1.0, %v14781_v12 }
0x15db   :  { %14782 = vrcp.f32 %v4860_v14 }
0x15e5   :  { %v14783_v18 = vpop.eup %14782 }
0x15e6   :  { %v4863_v19 = vmul.f32 2.0, %v14783_v18  ;;  %v4865_v36 = vmul.f32 %v14783_v18, %v15461_v38 }
0x15e8   :  { %v12373_v23 = vadd.f32 -1.0, %v4863_v19 }
0x15ea   :  { %4867 = vrot.lane.b32.xlu0 %v12373_v23, %s14867_s1 }
0x165c   :  { %v4868_v31 = vpop.permute.xlu0 %4867 }
0x165d   :  { %v4870_v32 = vmul.f32 %v14783_v18, %v4868_v31 }
0x165f   :  { %4872 = vrot.lane.b32.xlu1 %v4870_v32, %s14868_s8 }
0x16d1   :  { %v4873_v37 = vpop.permute.xlu1 %4872 }
0x16d2   :  { %v4875_v3 = vadd.f32 %v4873_v37, %v4865_v36 }
0x16d4   :  { %14784 = vtanh.f32 %v4875_v3 }
0x16de   :  { %v14785_v11 = vpop.eup %14784 }
0x16df   :  { %4878 = vrot.lane.b32.xlu0 %v14785_v11, %s14869_s9 }
0x16e3   :  { %4377 = vrot.lane.b32.xlu0 %v15465_v44, %s14871_s11 }
0x16e7   :  { %3357 = vrot.lane.b32.xlu0 %v15367_v8, %s14871_s11  ;;  %v4941_v8 = vand.u32 4294901760, %v4893_v21 }
0x16e9   :  { %v15516_v25 = vpack.c.bf16 %v4944_v24, %v4941_v8  ;;  %v5089_v35 = vsub.f32 %v4893_v21, %v4941_v8 }
0x16eb   :  { %2337 = vrot.lane.b32.xlu0 %v15269_v29, %s14871_s11  ;;  %14334 = vmatprep.subr.bf16.mxu0 %v15516_v25  ;;  %v5090_v39 = vand.u32 4294901760, %v5089_v35 }
0x16ec   :  { %14336 = vmatpush3.bf16.msra.mxu0 %v15516_v25 }
0x16ed   :  { %v5091_v44 = vsub.f32 %v5089_v35, %v5090_v39 }
0x16ef   :  { %1317 = vrot.lane.b32.xlu0 %v15171_v0, %s14871_s11  ;;  %v15523_v0 = vld [vmem:[%s16289_s2 + $0x18] sm:$0xff]  ;;  %v5092_v47 = vand.u32 4294901760, %v5091_v44 }
0x16f0   :  { %v6517_v30 = vand.u32 4294901760, %v15523_v0 }
0x16f2   :  { %v15541_v34 = vpack.c.bf16 %v6520_v33, %v6517_v30 }
0x16f4   :  { %14383 = vmatpush3.bf16.msra.mxu1 %v15541_v34 }
0x16f5   :  { %14384 = vmatprep.subr.bf16.mxu1 %v14864_v9 }
0x16f7   :  { %13690 = vmatmul.mubr.f32.vlgmr.msra.gmra.mrb[64].mxu1 %v14866_v2 }
0x16f8   :  { %13696 = vmatprep.mubr.msk.f32.mxu1 %vm14865_vm1, %v14866_v2 }
0x1751   :  { %v4879_v16 = vpop.permute.xlu0 %4878 }
0x1752   :  { %v4881_v20 = vmul.f32 %v14783_v18, %v4879_v16 }
0x1754   :  { %4887 = vrot.lane.b32.xlu1 %v4881_v20, %s14871_s11 }
0x1755   :  { %v4378_v29 = vpop.permute.xlu0 %4377 }
0x1756   :  { %4380 = vst.msk [vmem:[#allocation4 + $0x8] sm:$0xff] %vm1315_vm4, %v4378_v29 }
0x1758   :  { %3867 = vrot.lane.b32.xlu1 %v15416_v56, %s14871_s11  ;;  %v5096_v56 = vsub.f32 %v4938_v22, %v4944_v24 }
0x1759   :  { %v3358_v27 = vpop.permute.xlu0 %3357 }
0x175a   :  { %3360 = vst.msk [vmem:[#allocation4 + $0x18] sm:$0xff] %vm1315_vm4, %v3358_v27  ;;  %v5097_v43 = vand.u32 4294901760, %v5096_v56  ;;  %v15555_v50 = vpack.c.bf16 %v5096_v56, %v5089_v35 }
0x175c   :  { %2847 = vrot.lane.b32.xlu1 %v15318_v10, %s14871_s11  ;;  %v5098_v45 = vsub.f32 %v5096_v56, %v5097_v43  ;;  %v15557_v51 = vpack.c.bf16 %v5097_v43, %v5090_v39 }
0x175d   :  { %v2338_v38 = vpop.permute.xlu0 %2337  ;;  %v4905_v52 = vld [vmem:[#allocation4 + $0x8] sm:$0xff] }
0x175e   :  { %2340 = vst.msk [vmem:[#allocation4 + $0x28] sm:$0xff] %vm1315_vm4, %v2338_v38  ;;  %v5099_v48 = vand.u32 4294901760, %v5098_v45  ;;  %v4916_v60 = vsel %vm1315_vm4, %v4905_v52, 0 }
0x175f   :  { %v15561_v42 = vand.u32 4294901760, %v4916_v60 }
0x1760   :  { %1827 = vrot.lane.b32.xlu1 %v15220_v49, %s14871_s11  ;;  %v14337_v10 = vpack.c.bf16 %v5099_v48, %v5092_v47  ;;  %s14875_s11 = smov 36  }
0x1761   :  { %v1318_v46 = vpop.permute.xlu0 %1317  ;;  %v4907_v1 = vld [vmem:[#allocation4 + $0x18] sm:$0xff]  ;;  %v15566_v55 = vsub.f32 %v4916_v60, %v15561_v42 }
0x1762   :  { %1320 = vst.msk [vmem:[#allocation4 + $0x38] sm:$0xff] %vm1315_vm4, %v1318_v46  ;;  %14338 = vmatprep.subr.bf16.mxu0 %v14337_v10  ;;  %v4922_v53 = vsel %vm1315_vm4, %v4907_v1, 0 }
0x1763   :  { %v15568_v57 = vand.u32 4294901760, %v4922_v53  ;;  %v5019_v4 = vand.u32 4294901760, %v15566_v55 }
0x1764   :  { %4883 = vrot.lane.b32.xlu1 %v4881_v20, %s14870_s10 }
0x1765   :  { %v4909_v54 = vld [vmem:[#allocation4 + $0x28] sm:$0xff]  ;;  %v15577_v40 = vsub.f32 %v4922_v53, %v15568_v57  ;;  %v5020_v23 = vsub.f32 %v15566_v55, %v5019_v4 }
0x1766   :  { %v4928_v61 = vsel %vm1315_vm4, %v4909_v54, 0 }
0x1767   :  { %v15579_v41 = vand.u32 4294901760, %v4928_v61  ;;  %v5039_v31 = vand.u32 4294901760, %v15577_v40  ;;  %v5021_v8 = vand.u32 4294901760, %v5020_v23 }
0x1769   :  { %v4911_v62 = vld [vmem:[#allocation4 + $0x38] sm:$0xff]  ;;  %v15595_v32 = vsub.f32 %v4928_v61, %v15579_v41  ;;  %v5040_v24 = vsub.f32 %v15577_v40, %v5039_v31 }
0x176a   :  { %v4934_v12 = vsel %vm1315_vm4, %v4911_v62, 0 }
0x176b   :  { %v15597_v36 = vand.u32 4294901760, %v4934_v12  ;;  %v5059_v29 = vand.u32 4294901760, %v15595_v32  ;;  %v5041_v45 = vand.u32 4294901760, %v5040_v24  ;;  %v4899_v24 = vld [vmem:[#allocation3 + $0x18] sm:$0xff] }
0x176d   :  { %v15615_v26 = vsub.f32 %v4934_v12, %v15597_v36  ;;  %v5060_v46 = vsub.f32 %v15595_v32, %v5059_v29 }
0x176f   :  { %v5079_v47 = vand.u32 4294901760, %v15615_v26  ;;  %v5061_v60 = vand.u32 4294901760, %v5060_v46 }
0x1771   :  { %v5080_v1 = vsub.f32 %v15615_v26, %v5079_v47 }
0x1773   :  { %v5081_v54 = vand.u32 4294901760, %v5080_v1 }
0x17c6   :  { %v4888_v49 = vpop.permute.xlu1 %4887 }
0x17c7   :  { %4890 = vst.msk [vmem:[#allocation4] sm:$0xff] %vm1315_vm4, %v4888_v49 }
0x17ca   :  { %v3868_v5 = vpop.permute.xlu1 %3867 }
0x17cb   :  { %3870 = vst.msk [vmem:[#allocation4 + $0x10] sm:$0xff] %vm1315_vm4, %v3868_v5 }
0x17ce   :  { %v2848_v58 = vpop.permute.xlu1 %2847  ;;  %v4904_v59 = vld [vmem:[#allocation4] sm:$0xff] }
0x17cf   :  { %2850 = vst.msk [vmem:[#allocation4 + $0x20] sm:$0xff] %vm1315_vm4, %v2848_v58  ;;  %v4913_v15 = vsel %vm1315_vm4, %v4904_v59, 0  ;;  %v6595_v58 = vsub.f32 %v15523_v0, %v6517_v30  ;;  %v6602_v59 = vsub.f32 %v15531_v28, %v6520_v33 }
0x17d0   :  { %v15573_v63 = vand.u32 4294901760, %v4913_v15 }
0x17d1   :  { %v6596_v61 = vand.u32 4294901760, %v6595_v58  ;;  %v15665_v28 = vpack.c.bf16 %v6602_v59, %v6595_v58 }
0x17d2   :  { %v1828_v6 = vpop.permute.xlu1 %1827  ;;  %v15582_v13 = vsub.f32 %v4913_v15, %v15573_v63  ;;  %v4906_v7 = vld [vmem:[#allocation4 + $0x10] sm:$0xff]  ;;  %v6603_v15 = vand.u32 4294901760, %v6602_v59 }
0x17d3   :  { %1830 = vst.msk [vmem:[#allocation4 + $0x30] sm:$0xff] %vm1315_vm4, %v1828_v6  ;;  %v4919_v14 = vsel %vm1315_vm4, %v4906_v7, 0  ;;  %v6597_v62 = vsub.f32 %v6595_v58, %v6596_v61  ;;  %v15803_v58 = vpop.f32.mrb[64].mxu1 }
0x17d4   :  { %v5009_v18 = vand.u32 4294901760, %v15582_v13  ;;  %v15588_v19 = vand.u32 4294901760, %v4919_v14  ;;  %v6604_v6 = vsub.f32 %v6602_v59, %v6603_v15  ;;  %v15683_v33 = vpack.c.bf16 %v6603_v15, %v6596_v61  ;;  %v13691_v61 = vpop.f32.mrb[65].mxu1 }
0x17d5   :  { %v6598_v7 = vand.u32 4294901760, %v6597_v62 }
0x17d6   :  { %v4884_v37 = vpop.permute.xlu1 %4883  ;;  %v5010_v3 = vsub.f32 %v15582_v13, %v5009_v18  ;;  %v15603_v11 = vsub.f32 %v4919_v14, %v15588_v19  ;;  %v4908_v16 = vld [vmem:[#allocation4 + $0x20] sm:$0xff]  ;;  %v6605_v0 = vand.u32 4294901760, %v6604_v6 }
0x17d7   :  { %4886 = vst.msk [vmem:[#allocation3 + $0x38] sm:$0xff] %vm1315_vm4, %v4884_v37  ;;  %v4925_v17 = vsel %vm1315_vm4, %v4908_v16, 0 }
0x17d8   :  { %v5011_v20 = vand.u32 4294901760, %v5010_v3  ;;  %v5029_v21 = vand.u32 4294901760, %v15603_v11  ;;  %v15608_v22 = vand.u32 4294901760, %v4925_v17  ;;  %v15659_v30 = vpack.c.bf16 %v6605_v0, %v6598_v7  ;;  %v4897_v3 = vld [vmem:[#allocation3 + $0x8] sm:$0xff] }
0x17da   :  { %13497 = vmatprep.mubr.f32.mxu0 %v5011_v20  ;;  %v5030_v27 = vsub.f32 %v15603_v11, %v5029_v21  ;;  %v15621_v35 = vsub.f32 %v4925_v17, %v15608_v22  ;;  %v4910_v56 = vld [vmem:[#allocation4 + $0x30] sm:$0xff]  ;;  %14386 = vmatpush3.bf16.msra.mxu1 %v15659_v30  ;;  %v5704_v17 = vsel %vm1315_vm4, %v4897_v3, 0 }
0x17db   :  { %13498 = vmatmul.mubr.f32.vlgmr.msra.gmra.mrb[40].mxu0 %v5021_v8  ;;  %v4931_v38 = vsel %vm1315_vm4, %v4910_v56, 0  ;;  %14387 = vmatprep.subr.bf16.mxu1 %v14864_v9 }
0x17dc   :  { %14340 = vmatpush3.bf16.msra.mxu0 %v14337_v10  ;;  %v5031_v39 = vand.u32 4294901760, %v5030_v27  ;;  %v5049_v43 = vand.u32 4294901760, %v15621_v35  ;;  %v15625_v44 = vand.u32 4294901760, %v4931_v38 }
0x17dd   :  { %14342 = vmatprep.subr.bf16.mxu0 %v15555_v50  ;;  %13697 = vmatmul.mubr.f32.vlgmr.msra.gmra.mrb[66].mxu1 %v14866_v2 }
0x17de   :  { %13500 = vmatprep.mubr.f32.mxu0 %v5031_v39  ;;  %v5050_v48 = vsub.f32 %v15621_v35, %v5049_v43  ;;  %v15636_v10 = vsub.f32 %v4931_v38, %v15625_v44  ;;  %14389 = vmatpush3.bf16.msra.mxu1 %v15665_v28  ;;  %v5710_v38 = vsel %vm1315_vm4, %v4899_v24, 0 }
0x17df   :  { %13501 = vmatmul.mubr.f32.gmra.mrb[42].mxu0 %v5041_v45  ;;  %13703 = vmatprep.mubr.msk.f32.mxu1 %vm14865_vm1, %v14866_v2  ;;  %v4902_v45 = vld [vmem:[#allocation3 + $0x30] sm:$0xff] }
0x17e0   :  { %v5051_v52 = vand.u32 4294901760, %v5050_v48  ;;  %v5069_v49 = vand.u32 4294901760, %v15636_v10  ;;  %14390 = vmatprep.subr.bf16.mxu1 %v14864_v9 }
0x17e1   :  { %13704 = vmatmul.mubr.f32.vlgmr.msra.gmra.mrb[68].mxu1 %v14866_v2 }
0x17e2   :  { %13503 = vmatprep.mubr.f32.mxu0 %v5051_v52  ;;  %v5070_v5 = vsub.f32 %v15636_v10, %v5069_v49  ;;  %14392 = vmatpush3.bf16.msra.mxu1 %v15541_v34  ;;  %v4903_v52 = vld [vmem:[#allocation3 + $0x38] sm:$0xff] }
0x17e3   :  { %13504 = vmatmul.mubr.f32.gmra.mrb[44].mxu0 %v5061_v60  ;;  %13710 = vmatprep.mubr.msk.f32.mxu1 %vm14865_vm1, %v14866_v2 }
0x17e4   :  { %v5071_v53 = vand.u32 4294901760, %v5070_v5  ;;  %14393 = vmatprep.subr.bf16.mxu1 %v14864_v9 }
0x17e5   :  { %13711 = vmatmul.mubr.f32.vlgmr.msra.gmra.mrb[70].mxu1 %v14866_v2 }
0x17e6   :  { %13506 = vmatprep.mubr.f32.mxu0 %v5071_v53  ;;  %14395 = vmatpush3.bf16.msra.mxu1 %v15683_v33 }
0x17e7   :  { %13507 = vmatmul.mubr.f32.gmra.mrb[46].mxu0 %v5081_v54  ;;  %13717 = vmatprep.mubr.msk.f32.mxu1 %vm14865_vm1, %v14866_v2 }
0x17e8   :  { %13513 = vmatprep.mubr.f32.mxu0 %v15573_v63  ;;  %14396 = vmatprep.subr.bf16.mxu1 %v14864_v9 }
0x17e9   :  { %13718 = vmatmul.mubr.f32.vlgmr.msra.gmra.mrb[72].mxu1 %v14866_v2 }
0x17ea   :  { %14398 = vmatpush3.bf16.msra.mxu1 %v15541_v34  ;;  %13724 = vmatprep.mubr.msk.f32.mxu1 %vm14865_vm1, %v14866_v2 }
0x17eb   :  { %13514 = vmatmul.mubr.f32.vlgmr.msra.gmra.mrb[40].mxu0 %v15561_v42  ;;  %14399 = vmatprep.subr.bf16.mxu1 %v14864_v9 }
0x17ec   :  { %13516 = vmatprep.mubr.f32.mxu0 %v15588_v19  ;;  %14344 = vmatpush3.bf16.msra.mxu0 %v15555_v50  ;;  %v4892_v50 = vld [vmem:[%s16289_s2 + $0x8] sm:$0xf] }
0x17ed   :  { %14346 = vmatprep.subr.bf16.mxu0 %v15516_v25  ;;  %13725 = vmatmul.mubr.f32.vlgmr.msra.gmra.mrb[74].mxu1 %v14866_v2 }
0x17ee   :  { %14401 = vmatpush3.bf16.msra.mxu1 %v15541_v34  ;;  %13731 = vmatprep.mubr.msk.f32.mxu1 %vm14865_vm1, %v14866_v2 }
0x17ef   :  { %13517 = vmatmul.mubr.f32.gmra.mrb[42].mxu0 %v15568_v57  ;;  %14402 = vmatprep.subr.bf16.mxu1 %v14864_v9 }
0x17f0   :  { %13519 = vmatprep.mubr.f32.mxu0 %v15608_v22 }
0x17f3   :  { %13520 = vmatmul.mubr.f32.gmra.mrb[44].mxu0 %v15579_v41 }
0x17f4   :  { %13522 = vmatprep.mubr.f32.mxu0 %v15625_v44 }
0x17f7   :  { %13523 = vmatmul.mubr.f32.gmra.mrb[46].mxu0 %v15597_v36 }
0x17f8   :  { %13529 = vmatprep.mubr.f32.mxu0 %v15582_v13 }
0x17fb   :  { %13530 = vmatmul.mubr.f32.vlgmr.msra.gmra.mrb[40].mxu0 %v15566_v55  ;;  %v4891_v55 = vld [vmem:[%s16289_s2] sm:$0xff] }
0x17fc   :  { %13532 = vmatprep.mubr.f32.mxu0 %v15603_v11  ;;  %14348 = vmatpush3.bf16.msra.mxu0 %v15516_v25  ;;  %v4898_v11 = vld [vmem:[#allocation3 + $0x10] sm:$0xff] }
0x17fd   :  { %14350 = vmatprep.subr.bf16.mxu0 %v15557_v51  ;;  %v5707_v8 = vsel %vm1315_vm4, %v4898_v11, 0 }
0x17fe   :  { %v15764_v56 = vand.u32 4294901760, %v5707_v8 }
0x17ff   :  { %13533 = vmatmul.mubr.f32.gmra.mrb[42].mxu0 %v15577_v40 }
0x1800   :  { %13535 = vmatprep.mubr.f32.mxu0 %v15621_v35  ;;  %v15778_v48 = vsub.f32 %v5707_v8, %v15764_v56 }
0x1802   :  { %v5816_v53 = vand.u32 4294901760, %v15778_v48 }
0x1803   :  { %13536 = vmatmul.mubr.f32.gmra.mrb[44].mxu0 %v15595_v32 }
0x1804   :  { %13538 = vmatprep.mubr.f32.mxu0 %v15636_v10 }
0x1807   :  { %13539 = vmatmul.mubr.f32.gmra.mrb[46].mxu0 %v15615_v26  ;;  %v4900_v26 = vld [vmem:[#allocation3 + $0x20] sm:$0xff] }
0x1808   :  { %13545 = vmatprep.mubr.f32.mxu0 %v5009_v18  ;;  %v5713_v39 = vsel %vm1315_vm4, %v4900_v26, 0 }
0x180b   :  { %13546 = vmatmul.mubr.f32.vlgmr.msra.gmra.mrb[40].mxu0 %v5019_v4  ;;  %v5725_v4 = vsel %vm4936_vm5, %v4892_v50, 0 }
0x180c   :  { %13548 = vmatprep.mubr.f32.mxu0 %v5029_v21  ;;  %14352 = vmatpush3.bf16.msra.mxu0 %v15557_v51  ;;  %v5728_v51 = vand.u32 4294901760, %v4891_v55  ;;  %v5731_v40 = vand.u32 4294901760, %v5725_v4 }
0x180d   :  { %14354 = vmatprep.subr.bf16.mxu0 %v15516_v25 }
0x180e   :  { %v15730_v13 = vpack.c.bf16 %v5731_v40, %v5728_v51  ;;  %v15732_v12 = vsub.f32 %v4891_v55, %v5728_v51  ;;  %v15734_v14 = vsub.f32 %v5725_v4, %v5731_v40 }
0x180f   :  { %13549 = vmatmul.mubr.f32.gmra.mrb[42].mxu0 %v5039_v31  ;;  %v4896_v31 = vld [vmem:[#allocation3] sm:$0xff] }
0x1810   :  { %13551 = vmatprep.mubr.f32.mxu0 %v5049_v43  ;;  %v5877_v18 = vand.u32 4294901760, %v15732_v12  ;;  %v5884_v23 = vand.u32 4294901760, %v15734_v14  ;;  %v4901_v43 = vld [vmem:[#allocation3 + $0x28] sm:$0xff]  ;;  %v14365_v40 = vpack.c.bf16 %v15734_v14, %v15732_v12 }
0x1811   :  { %v5716_v10 = vsel %vm1315_vm4, %v4901_v43, 0 }
0x1812   :  { %v5878_v32 = vsub.f32 %v15732_v12, %v5877_v18  ;;  %v5885_v37 = vsub.f32 %v15734_v14, %v5884_v23  ;;  %v15793_v5 = vand.u32 4294901760, %v5716_v10  ;;  %v14373_v26 = vpack.c.bf16 %v5884_v23, %v5877_v18 }
0x1813   :  { %13552 = vmatmul.mubr.f32.gmra.mrb[44].mxu0 %v5059_v29  ;;  %v15759_v29 = vand.u32 4294901760, %v5704_v17 }
0x1814   :  { %13554 = vmatprep.mubr.f32.mxu0 %v5069_v49  ;;  %v5879_v20 = vand.u32 4294901760, %v5878_v32  ;;  %v5886_v21 = vand.u32 4294901760, %v5885_v37  ;;  %v5845_v62 = vsub.f32 %v5716_v10, %v15793_v5 }
0x1816   :  { %v14361_v35 = vpack.c.bf16 %v5886_v21, %v5879_v20  ;;  %v5846_v4 = vand.u32 4294901760, %v5845_v62 }
0x1817   :  { %13555 = vmatmul.mubr.f32.gmra.mrb[46].mxu0 %v5079_v47  ;;  %v15775_v47 = vand.u32 4294901760, %v5710_v38 }
0x1818   :  { %13561 = vmatprep.mubr.f32.mxu0 %v15573_v63  ;;  %v5847_v3 = vsub.f32 %v5845_v62, %v5846_v4 }
0x1819   :  { %v15791_v1 = vsub.f32 %v5710_v38, %v15775_v47 }
0x181a   :  { %v5848_v20 = vand.u32 4294901760, %v5847_v3 }
0x181b   :  { %13562 = vmatmul.mubr.f32.vlgmr.msra.gmra.mrb[40].mxu0 %v15561_v42  ;;  %v5826_v15 = vand.u32 4294901760, %v15791_v1 }
0x181c   :  { %13564 = vmatprep.mubr.f32.mxu0 %v15588_v19  ;;  %14356 = vmatpush3.bf16.msra.mxu0 %v15516_v25  ;;  %v5701_v25 = vsel %vm1315_vm4, %v4896_v31, 0 }
0x181d   :  { %14358 = vmatprep.subr.bf16.mxu0 %v15730_v13  ;;  %v15753_v16 = vand.u32 4294901760, %v5701_v25  ;;  %v5827_v55 = vsub.f32 %v15791_v1, %v5826_v15 }
0x181f   :  { %13565 = vmatmul.mubr.f32.gmra.mrb[42].mxu0 %v15568_v57  ;;  %v15762_v27 = vsub.f32 %v5701_v25, %v15753_v16  ;;  %v5828_v25 = vand.u32 4294901760, %v5827_v55 }
0x1820   :  { %13567 = vmatprep.mubr.f32.mxu0 %v15608_v22 }
0x1821   :  { %v5796_v46 = vand.u32 4294901760, %v15762_v27 }
0x1823   :  { %13568 = vmatmul.mubr.f32.gmra.mrb[44].mxu0 %v15579_v41  ;;  %v5797_v60 = vsub.f32 %v15762_v27, %v5796_v46 }
0x1824   :  { %13570 = vmatprep.mubr.f32.mxu0 %v15625_v44 }
0x1825   :  { %v5798_v7 = vand.u32 4294901760, %v5797_v60 }
0x1827   :  { %13571 = vmatmul.mubr.f32.gmra.mrb[46].mxu0 %v15597_v36 }
0x1828   :  { %13577 = vmatprep.mubr.f32.mxu0 %v15573_v63  ;;  %v15772_v63 = vsub.f32 %v5704_v17, %v15759_v29 }
0x182a   :  { %v5806_v49 = vand.u32 4294901760, %v15772_v63 }
0x182b   :  { %13578 = vmatmul.mubr.f32.vlgmr.msra.gmra.mrb[40].mxu0 %v15561_v42  ;;  %v15780_v42 = vand.u32 4294901760, %v5713_v39 }
0x182c   :  { %13580 = vmatprep.mubr.f32.mxu0 %v15588_v19  ;;  %14360 = vmatpush3.bf16.msra.mxu0 %v15730_v13  ;;  %v5719_v19 = vsel %vm1315_vm4, %v4902_v45, 0  ;;  %v5807_v59 = vsub.f32 %v15772_v63, %v5806_v49 }
0x182d   :  { %14362 = vmatprep.subr.bf16.mxu0 %v14361_v35  ;;  %v15799_v54 = vand.u32 4294901760, %v5719_v19 }
0x182e   :  { %v5808_v50 = vand.u32 4294901760, %v5807_v59 }
0x182f   :  { %13581 = vmatmul.mubr.f32.gmra.mrb[42].mxu0 %v15568_v57  ;;  %v15797_v57 = vsub.f32 %v5713_v39, %v15780_v42 }
0x1830   :  { %13583 = vmatprep.mubr.f32.mxu0 %v15608_v22  ;;  %v5722_v22 = vsel %vm1315_vm4, %v4903_v52, 0 }
0x1831   :  { %v15811_v6 = vand.u32 4294901760, %v5722_v22  ;;  %v5836_v0 = vand.u32 4294901760, %v15797_v57 }
0x1833   :  { %13584 = vmatmul.mubr.f32.gmra.mrb[44].mxu0 %v15579_v41  ;;  %v5817_v41 = vsub.f32 %v15778_v48, %v5816_v53  ;;  %v5865_v51 = vsub.f32 %v5722_v22, %v15811_v6  ;;  %v5837_v32 = vsub.f32 %v15797_v57, %v5836_v0 }
0x1834   :  { %13586 = vmatprep.mubr.f32.mxu0 %v15625_v44  ;;  %v5855_v44 = vsub.f32 %v5719_v19, %v15799_v54 }
0x1835   :  { %v5818_v31 = vand.u32 4294901760, %v5817_v41  ;;  %v5838_v11 = vand.u32 4294901760, %v5837_v32 }
0x1836   :  { %v5856_v37 = vand.u32 4294901760, %v5855_v44 }
0x1837   :  { %13587 = vmatmul.mubr.f32.gmra.mrb[46].mxu0 %v15597_v36  ;;  %v5866_v36 = vand.u32 4294901760, %v5865_v51 }
0x1838   :  { %13593 = vmatprep.mubr.f32.mxu0 %v5798_v7  ;;  %v5857_v17 = vsub.f32 %v5855_v44, %v5856_v37 }
0x1839   :  { %v5867_v21 = vsub.f32 %v5865_v51, %v5866_v36 }
0x183a   :  { %v5858_v8 = vand.u32 4294901760, %v5857_v17 }
0x183b   :  { %13594 = vmatmul.mubr.f32.vlgmr.msra.gmra.mrb[40].mxu0 %v5808_v50  ;;  %v5868_v24 = vand.u32 4294901760, %v5867_v21 }
0x183c   :  { %13596 = vmatprep.mubr.f32.mxu0 %v5818_v31  ;;  %14364 = vmatpush3.bf16.msra.mxu0 %v14361_v35 }
0x183d   :  { %14366 = vmatprep.subr.bf16.mxu0 %v14365_v40 }
0x183f   :  { %13597 = vmatmul.mubr.f32.gmra.mrb[42].mxu0 %v5828_v25 }
0x1840   :  { %13599 = vmatprep.mubr.f32.mxu0 %v5838_v11 }
0x1843   :  { %13600 = vmatmul.mubr.f32.gmra.mrb[44].mxu0 %v5848_v20 }
0x1844   :  { %13602 = vmatprep.mubr.f32.mxu0 %v5858_v8 }
0x1847   :  { %13603 = vmatmul.mubr.f32.gmra.mrb[46].mxu0 %v5868_v24 }
0x1848   :  { %13609 = vmatprep.mubr.f32.mxu0 %v15753_v16 }
0x184b   :  { %13610 = vmatmul.mubr.f32.vlgmr.msra.gmra.mrb[40].mxu0 %v15759_v29 }
0x184c   :  { %13612 = vmatprep.mubr.f32.mxu0 %v15764_v56  ;;  %14368 = vmatpush3.bf16.msra.mxu0 %v14365_v40 }
0x184d   :  { %14370 = vmatprep.subr.bf16.mxu0 %v15730_v13 }
0x184f   :  { %13613 = vmatmul.mubr.f32.gmra.mrb[42].mxu0 %v15775_v47 }
0x1850   :  { %13615 = vmatprep.mubr.f32.mxu0 %v15780_v42 }
0x1853   :  { %13616 = vmatmul.mubr.f32.gmra.mrb[44].mxu0 %v15793_v5 }
0x1854   :  { %13618 = vmatprep.mubr.f32.mxu0 %v15799_v54 }
0x1857   :  { %13619 = vmatmul.mubr.f32.gmra.mrb[46].mxu0 %v15811_v6 }
0x1858   :  { %13625 = vmatprep.mubr.f32.mxu0 %v15762_v27 }
0x185b   :  { %13626 = vmatmul.mubr.f32.vlgmr.msra.gmra.mrb[40].mxu0 %v15772_v63 }
0x185c   :  { %13628 = vmatprep.mubr.f32.mxu0 %v15778_v48  ;;  %14372 = vmatpush3.bf16.msra.mxu0 %v15730_v13 }
0x185d   :  { %14374 = vmatprep.subr.bf16.mxu0 %v14373_v26 }
0x185f   :  { %13629 = vmatmul.mubr.f32.gmra.mrb[42].mxu0 %v15791_v1 }
0x1860   :  { %13631 = vmatprep.mubr.f32.mxu0 %v15797_v57 }
0x1863   :  { %13632 = vmatmul.mubr.f32.gmra.mrb[44].mxu0 %v5845_v62 }
0x1864   :  { %13634 = vmatprep.mubr.f32.mxu0 %v5855_v44 }
0x1867   :  { %13635 = vmatmul.mubr.f32.gmra.mrb[46].mxu0 %v5865_v51 }
0x1868   :  { %13641 = vmatprep.mubr.f32.mxu0 %v5796_v46  ;;  %v12374_v46 = vld [vmem:[%s16289_s2 + $0x58] ss:$0 sm:$0xff] }
0x186b   :  { %13642 = vmatmul.mubr.f32.vlgmr.msra.gmra.mrb[40].mxu0 %v5806_v49 }
0x186c   :  { %13644 = vmatprep.mubr.f32.mxu0 %v5816_v53  ;;  %14376 = vmatpush3.bf16.msra.mxu0 %v14373_v26 }
0x186d   :  { %14378 = vmatprep.subr.bf16.mxu0 %v15730_v13 }
0x186f   :  { %13645 = vmatmul.mubr.f32.gmra.mrb[42].mxu0 %v5826_v15 }
0x1870   :  { %13647 = vmatprep.mubr.f32.mxu0 %v5836_v0 }
0x1873   :  { %13648 = vmatmul.mubr.f32.gmra.mrb[44].mxu0 %v5846_v4 }
0x1874   :  { %13650 = vmatprep.mubr.f32.mxu0 %v5856_v37 }
0x1877   :  { %13651 = vmatmul.mubr.f32.gmra.mrb[46].mxu0 %v5866_v36 }
0x1878   :  { %13657 = vmatprep.mubr.f32.mxu0 %v15753_v16 }
0x187b   :  { %13658 = vmatmul.mubr.f32.vlgmr.msra.gmra.mrb[40].mxu0 %v15759_v29 }
0x187c   :  { %13660 = vmatprep.mubr.f32.mxu0 %v15764_v56  ;;  %14380 = vmatpush3.bf16.msra.mxu0 %v15730_v13 }
0x187d   :  { %14522 = vmatprep.subr.bf16.mxu0 %v14864_v9 }
0x187f   :  { %13661 = vmatmul.mubr.f32.gmra.mrb[42].mxu0 %v15775_v47 }
0x1880   :  { %13663 = vmatprep.mubr.f32.mxu0 %v15780_v42 }
0x1883   :  { %13664 = vmatmul.mubr.f32.gmra.mrb[44].mxu0 %v15793_v5 }
0x1884   :  { %13666 = vmatprep.mubr.f32.mxu0 %v15799_v54 }
0x1887   :  { %13667 = vmatmul.mubr.f32.gmra.mrb[46].mxu0 %v15811_v6 }
0x1888   :  { %13673 = vmatprep.mubr.f32.mxu0 %v15753_v16 }
0x188b   :  { %13674 = vmatmul.mubr.f32.vlgmr.msra.gmra.mrb[40].mxu0 %v15759_v29 }
0x188c   :  { %13676 = vmatprep.mubr.f32.mxu0 %v15764_v56  ;;  %14524 = vmatpush3.bf16.msra.mxu0 %v15541_v34 }
0x188d   :  { %14528 = vmatprep.subr.bf16.mxu0 %v14864_v9 }
0x188f   :  { %13677 = vmatmul.mubr.f32.gmra.mrb[42].mxu0 %v15775_v47 }
0x1890   :  { %13679 = vmatprep.mubr.f32.mxu0 %v15780_v42 }
0x1893   :  { %13680 = vmatmul.mubr.f32.gmra.mrb[44].mxu0 %v15793_v5 }
0x1894   :  { %13682 = vmatprep.mubr.f32.mxu0 %v15799_v54 }
0x1897   :  { %13683 = vmatmul.mubr.f32.gmra.mrb[46].mxu0 %v15811_v6 }
0x1898   :  { %14018 = vmatprep.mubr.msk.f32.mxu0 %vm14865_vm1, %v14866_v2 }
0x18b0   :  { %v6670_v13 = vpop.f32.mrb[66].mxu1 }
0x18b1   :  { %v6671_v12 = vadd.f32 %v6670_v13, %v15803_v58  ;;  %v13698_v14 = vpop.f32.mrb[67].mxu1 }
0x18b4   :  { %v6746_v18 = vpop.f32.mrb[68].mxu1 }
0x18b5   :  { %v6747_v23 = vadd.f32 %v6746_v18, %v6671_v12  ;;  %v13705_v16 = vpop.f32.mrb[69].mxu1 }
0x18b8   :  { %v6821_v29 = vpop.f32.mrb[70].mxu1 }
0x18b9   :  { %v6822_v27 = vadd.f32 %v6821_v29, %v6747_v23  ;;  %v13712_v35 = vpop.f32.mrb[71].mxu1 }
0x18bc   :  { %v6898_v56 = vpop.f32.mrb[72].mxu1 }
0x18bd   :  { %v6899_v38 = vadd.f32 %v6898_v56, %v6822_v27  ;;  %v13719_v39 = vpop.f32.mrb[73].mxu1 }
0x18c0   :  { %v6971_v43 = vpop.f32.mrb[74].mxu1 }
0x18c1   :  { %v6972_v63 = vadd.f32 %v6971_v43, %v6899_v38  ;;  %v13726_v45 = vpop.f32.mrb[75].mxu1 }
0x195e   :  { %v13675_v47 = vpop.f32.mrb[40].mxu0 }
0x195f   :  { %v6492_v48 = vadd.f32 %v13675_v47, %v12374_v46  ;;  %v6441_v42 = vpop.f32.mrb[41].mxu0 }
0x1960   :  { %v6491_v10 = vadd.f32 %v12374_v46, %v6441_v42 }
0x1961   :  { %6501 = vst.msk [vmem:[#allocation5 + $0x8] sm:$0xff] %vm6499_vm6, %v6492_v48 }
0x1962   :  { %6500 = vst.msk [vmem:[#allocation5] sm:$0xff] %vm6499_vm6, %v6491_v10  ;;  %v13678_v19 = vpop.f32.mrb[42].mxu0 }
0x1963   :  { %v6494_v52 = vadd.f32 %v13678_v19, %v12374_v46  ;;  %v6453_v49 = vpop.f32.mrb[43].mxu0 }
0x1964   :  { %v6493_v60 = vadd.f32 %v12374_v46, %v6453_v49 }
0x1965   :  { %6503 = vst.msk [vmem:[#allocation5 + $0x18] sm:$0xff] %vm6499_vm6, %v6494_v52 }
0x1966   :  { %6502 = vst.msk [vmem:[#allocation5 + $0x10] sm:$0xff] %vm6499_vm6, %v6493_v60  ;;  %v13681_v1 = vpop.f32.mrb[44].mxu0 }
0x1967   :  { %v6496_v5 = vadd.f32 %v13681_v1, %v12374_v46  ;;  %v6465_v53 = vpop.f32.mrb[45].mxu0 }
0x1968   :  { %v6495_v57 = vadd.f32 %v12374_v46, %v6465_v53  ;;  %v7001_v45 = vld [vmem:[#allocation5 + $0x8] sm:$0xff] }
0x1969   :  { %v6510_v54 = vld [vmem:[#allocation5] sm:$0xff]  ;;  %6505 = vst.msk [vmem:[#allocation5 + $0x28] sm:$0xff] %vm6499_vm6, %v6496_v5 }
0x196a   :  { %v6975_v22 = vadd.f32 %v6972_v63, %v6510_v54  ;;  %6504 = vst.msk [vmem:[#allocation5 + $0x20] sm:$0xff] %vm6499_vm6, %v6495_v57  ;;  %v13684_v58 = vpop.f32.mrb[46].mxu0 }
0x196b   :  { %v6498_v59 = vadd.f32 %v13684_v58, %v12374_v46  ;;  %v6477_v61 = vpop.f32.mrb[47].mxu0 }
0x196c   :  { %v12375_v15 = vmul.f32 -1.442695, %v6975_v22  ;;  %v6497_v62 = vadd.f32 %v12374_v46, %v6477_v61 }
0x196d   :  { %6507 = vst.msk [vmem:[#allocation5 + $0x38] sm:$0xff] %vm6499_vm6, %v6498_v59 }
0x196e   :  { %14786 = vpow2.f32 %v12375_v15  ;;  %6506 = vst.msk [vmem:[#allocation5 + $0x30] sm:$0xff] %vm6499_vm6, %v6497_v62 }
0x1978   :  { %v14787_v6 = vpop.eup %14786 }
0x1979   :  { %v6979_v7 = vadd.f32 1.0, %v14787_v6 }
0x197b   :  { %14788 = vrcp.f32 %v6979_v7 }
0x1985   :  { %v14789_v41 = vpop.eup %14788 }
0x1986   :  { %v6982_v0 = vmul.f32 2.0, %v14789_v41  ;;  %v6984_v4 = vmul.f32 0.0, %v14789_v41 }
0x1988   :  { %v12376_v44 = vadd.f32 -1.0, %v6982_v0 }
0x198a   :  { %6986 = vrot.lane.b32.xlu0 %v12376_v44, %s14872_s26 }
0x19fc   :  { %v6987_v50 = vpop.permute.xlu0 %6986 }
0x19fd   :  { %v6989_v55 = vmul.f32 %v14789_v41, %v6987_v50 }
0x19ff   :  { %6991 = vrot.lane.b32.xlu1 %v6989_v55, %s14873_s27 }
0x1a71   :  { %v6992_v51 = vpop.permute.xlu1 %6991 }
0x1a72   :  { %v15886_v40 = vadd.f32 %v6992_v51, %v6984_v4 }
0x1a74   :  { %14790 = vtanh.f32 %v15886_v40 }
0x1a7e   :  { %v14791_v31 = vpop.eup %14790 }
0x1a7f   :  { %6997 = vrot.lane.b32.xlu0 %v14791_v31, %s14868_s8 }
0x1af1   :  { %v6998_v32 = vpop.permute.xlu0 %6997 }
0x1af2   :  { %v7000_v37 = vmul.f32 %v14789_v41, %v6998_v32 }
0x1af4   :  { %7003 = vrot.lane.b32.xlu1 %v7000_v37, %s14874_s28 }
0x1b66   :  { %v7004_v25 = vpop.permute.xlu1 %7003 }
0x1b67   :  { %v7005_v3 = vsel %vm1315_vm4, %v7004_v25, 0 }
0x1b68   :  { %v7074_v36 = vand.u32 4294901760, %v7005_v3 }
0x1b6a   :  { %v7075_v11 = vsub.f32 %v7005_v3, %v7074_v36 }
0x1b6c   :  { %v7076_v17 = vand.u32 4294901760, %v7075_v11 }
0x1b6e   :  { %v7077_v20 = vsub.f32 %v7075_v11, %v7076_v17 }
0x1b70   :  { %v7078_v21 = vand.u32 4294901760, %v7077_v20 }
0x1b72   :  { %13732 = vmatmul.mubr.f32.vlgmr.msra.gmra.mrb[76].mxu1 %v7078_v21  ;;  %v7492_v21 = vld [vmem:[#allocation5 + $0x10] sm:$0xff] }
0x1b73   :  { %14404 = vmatpush3.bf16.msra.mxu1 %v15659_v30  ;;  %13738 = vmatprep.mubr.msk.f32.mxu1 %vm14865_vm1, %v14866_v2 }
0x1b74   :  { %14405 = vmatprep.subr.bf16.mxu1 %v14864_v9 }
0x1b76   :  { %13739 = vmatmul.mubr.f32.vlgmr.msra.gmra.mrb[78].mxu1 %v7074_v36 }
0x1b77   :  { %14407 = vmatpush3.bf16.msra.mxu1 %v15665_v28  ;;  %13745 = vmatprep.mubr.msk.f32.mxu1 %vm14865_vm1, %v14866_v2 }
0x1b78   :  { %14408 = vmatprep.subr.bf16.mxu1 %v14864_v9 }
0x1b7a   :  { %13746 = vmatmul.mubr.f32.vlgmr.msra.gmra.mrb[80].mxu1 %v7075_v11 }
0x1b7b   :  { %14410 = vmatpush3.bf16.msra.mxu1 %v15541_v34  ;;  %13752 = vmatprep.mubr.msk.f32.mxu1 %vm14865_vm1, %v14866_v2 }
0x1b7c   :  { %14411 = vmatprep.subr.bf16.mxu1 %v14864_v9 }
0x1b7e   :  { %13753 = vmatmul.mubr.f32.vlgmr.msra.gmra.mrb[82].mxu1 %v7076_v17 }
0x1b7f   :  { %14413 = vmatpush3.bf16.msra.mxu1 %v15683_v33  ;;  %13759 = vmatprep.mubr.msk.f32.mxu1 %vm14865_vm1, %v14866_v2 }
0x1b80   :  { %14414 = vmatprep.subr.bf16.mxu1 %v14864_v9 }
0x1b82   :  { %13760 = vmatmul.mubr.f32.vlgmr.msra.gmra.mrb[84].mxu1 %v7074_v36 }
0x1b83   :  { %14416 = vmatpush3.bf16.msra.mxu1 %v15541_v34  ;;  %13766 = vmatprep.mubr.msk.f32.mxu1 %vm14865_vm1, %v14866_v2 }
0x1b84   :  { %14417 = vmatprep.subr.bf16.mxu1 %v14864_v9 }
0x1b86   :  { %13767 = vmatmul.mubr.f32.vlgmr.msra.gmra.mrb[86].mxu1 %v7074_v36 }
0x1b87   :  { %14419 = vmatpush3.bf16.msra.mxu1 %v15541_v34  ;;  %13773 = vmatprep.mubr.msk.f32.mxu1 %vm14865_vm1, %v14866_v2 }
0x1b88   :  { %14420 = vmatprep.subr.bf16.mxu1 %v14864_v9 }
0x1c45   :  { %v7080_v8 = vpop.f32.mrb[76].mxu1 }
0x1c46   :  { %v13733_v24 = vpop.f32.mrb[77].mxu1 }
0x1c49   :  { %v7161_v26 = vpop.f32.mrb[78].mxu1 }
0x1c4a   :  { %v7162_v13 = vadd.f32 %v7161_v26, %v7080_v8  ;;  %v13740_v12 = vpop.f32.mrb[79].mxu1 }
0x1c4d   :  { %v7237_v14 = vpop.f32.mrb[80].mxu1 }
0x1c4e   :  { %v7238_v18 = vadd.f32 %v7237_v14, %v7162_v13  ;;  %v13747_v23 = vpop.f32.mrb[81].mxu1 }
0x1c51   :  { %v7312_v16 = vpop.f32.mrb[82].mxu1 }
0x1c52   :  { %v7313_v29 = vadd.f32 %v7312_v16, %v7238_v18  ;;  %v13754_v27 = vpop.f32.mrb[83].mxu1 }
0x1c55   :  { %v7389_v35 = vpop.f32.mrb[84].mxu1 }
0x1c56   :  { %v7390_v56 = vadd.f32 %v7389_v35, %v7313_v29  ;;  %v13761_v38 = vpop.f32.mrb[85].mxu1 }
0x1c59   :  { %v7462_v39 = vpop.f32.mrb[86].mxu1 }
0x1c5a   :  { %v7463_v43 = vadd.f32 %v7462_v39, %v7390_v56  ;;  %v13768_v63 = vpop.f32.mrb[87].mxu1 }
0x1c5c   :  { %v7466_v46 = vadd.f32 %v7463_v43, %v7001_v45 }
0x1c5e   :  { %v12377_v47 = vmul.f32 -1.442695, %v7466_v46 }
0x1c60   :  { %14792 = vpow2.f32 %v12377_v47 }
0x1c6a   :  { %v14793_v48 = vpop.eup %14792 }
0x1c6b   :  { %v7470_v42 = vadd.f32 1.0, %v14793_v48 }
0x1c6d   :  { %14794 = vrcp.f32 %v7470_v42 }
0x1c77   :  { %v14795_v10 = vpop.eup %14794 }
0x1c78   :  { %v7473_v19 = vmul.f32 2.0, %v14795_v10  ;;  %v7475_v1 = vmul.f32 %v14795_v10, %v15886_v40 }
0x1c7a   :  { %v12378_v52 = vadd.f32 -1.0, %v7473_v19 }
0x1c7c   :  { %7477 = vrot.lane.b32.xlu0 %v12378_v52, %s14872_s26 }
0x1cee   :  { %v7478_v49 = vpop.permute.xlu0 %7477 }
0x1cef   :  { %v7480_v60 = vmul.f32 %v14795_v10, %v7478_v49 }
0x1cf1   :  { %7482 = vrot.lane.b32.xlu1 %v7480_v60, %s14873_s27 }
0x1d63   :  { %v7483_v5 = vpop.permute.xlu1 %7482 }
0x1d64   :  { %v15919_v53 = vadd.f32 %v7483_v5, %v7475_v1 }
0x1d66   :  { %14796 = vtanh.f32 %v15919_v53 }
0x1d70   :  { %v14797_v57 = vpop.eup %14796 }
0x1d71   :  { %7488 = vrot.lane.b32.xlu0 %v14797_v57, %s14868_s8 }
0x1de3   :  { %v7489_v54 = vpop.permute.xlu0 %7488 }
0x1de4   :  { %v7491_v22 = vmul.f32 %v14795_v10, %v7489_v54 }
0x1de6   :  { %7494 = vrot.lane.b32.xlu1 %v7491_v22, %s14874_s28 }
0x1e58   :  { %v7495_v58 = vpop.permute.xlu1 %7494 }
0x1e59   :  { %v7496_v59 = vsel %vm1315_vm4, %v7495_v58, 0 }
0x1e5a   :  { %v7565_v61 = vand.u32 4294901760, %v7496_v59 }
0x1e5c   :  { %v7566_v15 = vsub.f32 %v7496_v59, %v7565_v61 }
0x1e5e   :  { %v7567_v62 = vand.u32 4294901760, %v7566_v15 }
0x1e60   :  { %v7568_v6 = vsub.f32 %v7566_v15, %v7567_v62 }
0x1e62   :  { %v7569_v7 = vand.u32 4294901760, %v7568_v6 }
0x1e64   :  { %13774 = vmatmul.mubr.f32.vlgmr.msra.gmra.mrb[88].mxu1 %v7569_v7  ;;  %v7983_v7 = vld [vmem:[#allocation5 + $0x18] sm:$0xff] }
0x1e65   :  { %14422 = vmatpush3.bf16.msra.mxu1 %v15659_v30  ;;  %13780 = vmatprep.mubr.msk.f32.mxu1 %vm14865_vm1, %v14866_v2 }
0x1e66   :  { %14423 = vmatprep.subr.bf16.mxu1 %v14864_v9 }
0x1e68   :  { %13781 = vmatmul.mubr.f32.vlgmr.msra.gmra.mrb[90].mxu1 %v7565_v61 }
0x1e69   :  { %14425 = vmatpush3.bf16.msra.mxu1 %v15665_v28  ;;  %13787 = vmatprep.mubr.msk.f32.mxu1 %vm14865_vm1, %v14866_v2 }
0x1e6a   :  { %14426 = vmatprep.subr.bf16.mxu1 %v14864_v9 }
0x1e6c   :  { %13788 = vmatmul.mubr.f32.vlgmr.msra.gmra.mrb[92].mxu1 %v7566_v15 }
0x1e6d   :  { %14428 = vmatpush3.bf16.msra.mxu1 %v15541_v34  ;;  %13794 = vmatprep.mubr.msk.f32.mxu1 %vm14865_vm1, %v14866_v2 }
0x1e6e   :  { %14429 = vmatprep.subr.bf16.mxu1 %v14864_v9 }
0x1e70   :  { %13795 = vmatmul.mubr.f32.vlgmr.msra.gmra.mrb[94].mxu1 %v7567_v62 }
0x1e71   :  { %14431 = vmatpush3.bf16.msra.mxu1 %v15683_v33  ;;  %13801 = vmatprep.mubr.msk.f32.mxu1 %vm14865_vm1, %v14866_v2 }
0x1e72   :  { %14432 = vmatprep.subr.bf16.mxu1 %v14864_v9 }
0x1e74   :  { %13802 = vmatmul.mubr.f32.vlgmr.msra.gmra.mrb[96].mxu1 %v7565_v61 }
0x1e75   :  { %14434 = vmatpush3.bf16.msra.mxu1 %v15541_v34  ;;  %13808 = vmatprep.mubr.msk.f32.mxu1 %vm14865_vm1, %v14866_v2 }
0x1e76   :  { %14435 = vmatprep.subr.bf16.mxu1 %v14864_v9 }
0x1e78   :  { %13809 = vmatmul.mubr.f32.vlgmr.msra.gmra.mrb[98].mxu1 %v7565_v61 }
0x1e79   :  { %14437 = vmatpush3.bf16.msra.mxu1 %v15541_v34  ;;  %13815 = vmatprep.mubr.msk.f32.mxu1 %vm14865_vm1, %v14866_v2 }
0x1e7a   :  { %14438 = vmatprep.subr.bf16.mxu1 %v14864_v9 }
0x1f37   :  { %v7571_v41 = vpop.f32.mrb[88].mxu1 }
0x1f38   :  { %v13775_v0 = vpop.f32.mrb[89].mxu1 }
0x1f3b   :  { %v7652_v44 = vpop.f32.mrb[90].mxu1 }
0x1f3c   :  { %v7653_v50 = vadd.f32 %v7652_v44, %v7571_v41  ;;  %v13782_v55 = vpop.f32.mrb[91].mxu1 }
0x1f3f   :  { %v7728_v4 = vpop.f32.mrb[92].mxu1 }
0x1f40   :  { %v7729_v51 = vadd.f32 %v7728_v4, %v7653_v50  ;;  %v13789_v40 = vpop.f32.mrb[93].mxu1 }
0x1f43   :  { %v7803_v31 = vpop.f32.mrb[94].mxu1 }
0x1f44   :  { %v7804_v32 = vadd.f32 %v7803_v31, %v7729_v51  ;;  %v13796_v37 = vpop.f32.mrb[95].mxu1 }
0x1f47   :  { %v7880_v25 = vpop.f32.mrb[96].mxu1 }
0x1f48   :  { %v7881_v3 = vadd.f32 %v7880_v25, %v7804_v32  ;;  %v13803_v36 = vpop.f32.mrb[97].mxu1 }
0x1f4b   :  { %v7953_v11 = vpop.f32.mrb[98].mxu1 }
0x1f4c   :  { %v7954_v17 = vadd.f32 %v7953_v11, %v7881_v3  ;;  %v13810_v20 = vpop.f32.mrb[99].mxu1 }
0x1f4e   :  { %v7957_v8 = vadd.f32 %v7954_v17, %v7492_v21 }
0x1f50   :  { %v12379_v24 = vmul.f32 -1.442695, %v7957_v8 }
0x1f52   :  { %14798 = vpow2.f32 %v12379_v24 }
0x1f5c   :  { %v14799_v26 = vpop.eup %14798 }
0x1f5d   :  { %v7961_v13 = vadd.f32 1.0, %v14799_v26 }
0x1f5f   :  { %14800 = vrcp.f32 %v7961_v13 }
0x1f69   :  { %v14801_v12 = vpop.eup %14800 }
0x1f6a   :  { %v7964_v14 = vmul.f32 2.0, %v14801_v12  ;;  %v7966_v29 = vmul.f32 %v14801_v12, %v15919_v53 }
0x1f6c   :  { %v12380_v18 = vadd.f32 -1.0, %v7964_v14 }
0x1f6e   :  { %7968 = vrot.lane.b32.xlu0 %v12380_v18, %s14872_s26 }
0x1fe0   :  { %v7969_v23 = vpop.permute.xlu0 %7968 }
0x1fe1   :  { %v7971_v16 = vmul.f32 %v14801_v12, %v7969_v23 }
0x1fe3   :  { %7973 = vrot.lane.b32.xlu1 %v7971_v16, %s14873_s27 }
0x2055   :  { %v7974_v27 = vpop.permute.xlu1 %7973 }
0x2056   :  { %v15952_v35 = vadd.f32 %v7974_v27, %v7966_v29 }
0x2058   :  { %14802 = vtanh.f32 %v15952_v35 }
0x2062   :  { %v14803_v56 = vpop.eup %14802 }
0x2063   :  { %7979 = vrot.lane.b32.xlu0 %v14803_v56, %s14868_s8 }
0x20d5   :  { %v7980_v38 = vpop.permute.xlu0 %7979 }
0x20d6   :  { %v7982_v39 = vmul.f32 %v14801_v12, %v7980_v38 }
0x20d8   :  { %7985 = vrot.lane.b32.xlu1 %v7982_v39, %s14874_s28 }
0x214a   :  { %v7986_v43 = vpop.permute.xlu1 %7985 }
0x214b   :  { %v7987_v63 = vsel %vm1315_vm4, %v7986_v43, 0 }
0x214c   :  { %v8056_v45 = vand.u32 4294901760, %v7987_v63 }
0x214e   :  { %v8057_v46 = vsub.f32 %v7987_v63, %v8056_v45 }
0x2150   :  { %v8058_v47 = vand.u32 4294901760, %v8057_v46 }
0x2152   :  { %v8059_v48 = vsub.f32 %v8057_v46, %v8058_v47 }
0x2154   :  { %v8060_v42 = vand.u32 4294901760, %v8059_v48 }
0x2156   :  { %13816 = vmatmul.mubr.f32.vlgmr.msra.gmra.mrb[100].mxu1 %v8060_v42  ;;  %v8474_v42 = vld [vmem:[#allocation5 + $0x20] sm:$0xff] }
0x2157   :  { %14440 = vmatpush3.bf16.msra.mxu1 %v15659_v30  ;;  %13822 = vmatprep.mubr.msk.f32.mxu1 %vm14865_vm1, %v14866_v2 }
0x2158   :  { %14441 = vmatprep.subr.bf16.mxu1 %v14864_v9 }
0x215a   :  { %13823 = vmatmul.mubr.f32.vlgmr.msra.gmra.mrb[102].mxu1 %v8056_v45 }
0x215b   :  { %14443 = vmatpush3.bf16.msra.mxu1 %v15665_v28  ;;  %13829 = vmatprep.mubr.msk.f32.mxu1 %vm14865_vm1, %v14866_v2 }
0x215c   :  { %14444 = vmatprep.subr.bf16.mxu1 %v14864_v9 }
0x215e   :  { %13830 = vmatmul.mubr.f32.vlgmr.msra.gmra.mrb[104].mxu1 %v8057_v46 }
0x215f   :  { %14446 = vmatpush3.bf16.msra.mxu1 %v15541_v34  ;;  %13836 = vmatprep.mubr.msk.f32.mxu1 %vm14865_vm1, %v14866_v2 }
0x2160   :  { %14447 = vmatprep.subr.bf16.mxu1 %v14864_v9 }
0x2162   :  { %13837 = vmatmul.mubr.f32.vlgmr.msra.gmra.mrb[106].mxu1 %v8058_v47 }
0x2163   :  { %14449 = vmatpush3.bf16.msra.mxu1 %v15683_v33  ;;  %13843 = vmatprep.mubr.msk.f32.mxu1 %vm14865_vm1, %v14866_v2 }
0x2164   :  { %14450 = vmatprep.subr.bf16.mxu1 %v14864_v9 }
0x2166   :  { %13844 = vmatmul.mubr.f32.vlgmr.msra.gmra.mrb[108].mxu1 %v8056_v45 }
0x2167   :  { %14452 = vmatpush3.bf16.msra.mxu1 %v15541_v34  ;;  %13850 = vmatprep.mubr.msk.f32.mxu1 %vm14865_vm1, %v14866_v2 }
0x2168   :  { %14453 = vmatprep.subr.bf16.mxu1 %v14864_v9 }
0x216a   :  { %13851 = vmatmul.mubr.f32.vlgmr.msra.gmra.mrb[110].mxu1 %v8056_v45 }
0x216b   :  { %14455 = vmatpush3.bf16.msra.mxu1 %v15541_v34  ;;  %13857 = vmatprep.mubr.msk.f32.mxu1 %vm14865_vm1, %v14866_v2 }
0x216c   :  { %14456 = vmatprep.subr.bf16.mxu1 %v14864_v9 }
0x2229   :  { %v8062_v10 = vpop.f32.mrb[100].mxu1 }
0x222a   :  { %v13817_v19 = vpop.f32.mrb[101].mxu1 }
0x222d   :  { %v8143_v52 = vpop.f32.mrb[102].mxu1 }
0x222e   :  { %v8144_v49 = vadd.f32 %v8143_v52, %v8062_v10  ;;  %v13824_v60 = vpop.f32.mrb[103].mxu1 }
0x2231   :  { %v8219_v1 = vpop.f32.mrb[104].mxu1 }
0x2232   :  { %v8220_v5 = vadd.f32 %v8219_v1, %v8144_v49  ;;  %v13831_v53 = vpop.f32.mrb[105].mxu1 }
0x2235   :  { %v8294_v57 = vpop.f32.mrb[106].mxu1 }
0x2236   :  { %v8295_v54 = vadd.f32 %v8294_v57, %v8220_v5  ;;  %v13838_v22 = vpop.f32.mrb[107].mxu1 }
0x2239   :  { %v8371_v58 = vpop.f32.mrb[108].mxu1 }
0x223a   :  { %v8372_v59 = vadd.f32 %v8371_v58, %v8295_v54  ;;  %v13845_v61 = vpop.f32.mrb[109].mxu1 }
0x223d   :  { %v8444_v15 = vpop.f32.mrb[110].mxu1 }
0x223e   :  { %v8445_v62 = vadd.f32 %v8444_v15, %v8372_v59  ;;  %v13852_v6 = vpop.f32.mrb[111].mxu1 }
0x2240   :  { %v8448_v41 = vadd.f32 %v8445_v62, %v7983_v7 }
0x2242   :  { %v12381_v0 = vmul.f32 -1.442695, %v8448_v41 }
0x2244   :  { %14804 = vpow2.f32 %v12381_v0 }
0x224e   :  { %v14805_v44 = vpop.eup %14804 }
0x224f   :  { %v8452_v50 = vadd.f32 1.0, %v14805_v44 }
0x2251   :  { %14806 = vrcp.f32 %v8452_v50 }
0x225b   :  { %v14807_v55 = vpop.eup %14806 }
0x225c   :  { %v8455_v4 = vmul.f32 2.0, %v14807_v55  ;;  %v8457_v32 = vmul.f32 %v14807_v55, %v15952_v35 }
0x225e   :  { %v12382_v51 = vadd.f32 -1.0, %v8455_v4 }
0x2260   :  { %8459 = vrot.lane.b32.xlu0 %v12382_v51, %s14872_s26 }
0x22d2   :  { %v8460_v40 = vpop.permute.xlu0 %8459 }
0x22d3   :  { %v8462_v31 = vmul.f32 %v14807_v55, %v8460_v40 }
0x22d5   :  { %8464 = vrot.lane.b32.xlu1 %v8462_v31, %s14873_s27 }
0x2347   :  { %v8465_v37 = vpop.permute.xlu1 %8464 }
0x2348   :  { %v15985_v25 = vadd.f32 %v8465_v37, %v8457_v32 }
0x234a   :  { %14808 = vtanh.f32 %v15985_v25 }
0x2354   :  { %v14809_v3 = vpop.eup %14808 }
0x2355   :  { %8470 = vrot.lane.b32.xlu0 %v14809_v3, %s14868_s8 }
0x23c7   :  { %v8471_v36 = vpop.permute.xlu0 %8470 }
0x23c8   :  { %v8473_v11 = vmul.f32 %v14807_v55, %v8471_v36 }
0x23ca   :  { %8476 = vrot.lane.b32.xlu1 %v8473_v11, %s14874_s28 }
0x243c   :  { %v8477_v17 = vpop.permute.xlu1 %8476 }
0x243d   :  { %v8478_v20 = vsel %vm1315_vm4, %v8477_v17, 0 }
0x243e   :  { %v8547_v21 = vand.u32 4294901760, %v8478_v20 }
0x2440   :  { %v8548_v8 = vsub.f32 %v8478_v20, %v8547_v21 }
0x2442   :  { %v8549_v24 = vand.u32 4294901760, %v8548_v8 }
0x2444   :  { %v8550_v26 = vsub.f32 %v8548_v8, %v8549_v24 }
0x2446   :  { %v8551_v13 = vand.u32 4294901760, %v8550_v26 }
0x2448   :  { %13858 = vmatmul.mubr.f32.vlgmr.msra.gmra.mrb[112].mxu1 %v8551_v13  ;;  %v8965_v13 = vld [vmem:[#allocation5 + $0x28] sm:$0xff] }
0x2449   :  { %14458 = vmatpush3.bf16.msra.mxu1 %v15659_v30  ;;  %13864 = vmatprep.mubr.msk.f32.mxu1 %vm14865_vm1, %v14866_v2 }
0x244a   :  { %14459 = vmatprep.subr.bf16.mxu1 %v14864_v9 }
0x244c   :  { %13865 = vmatmul.mubr.f32.vlgmr.msra.gmra.mrb[114].mxu1 %v8547_v21 }
0x244d   :  { %14461 = vmatpush3.bf16.msra.mxu1 %v15665_v28  ;;  %13871 = vmatprep.mubr.msk.f32.mxu1 %vm14865_vm1, %v14866_v2 }
0x244e   :  { %14462 = vmatprep.subr.bf16.mxu1 %v14864_v9 }
0x2450   :  { %13872 = vmatmul.mubr.f32.vlgmr.msra.gmra.mrb[116].mxu1 %v8548_v8 }
0x2451   :  { %14464 = vmatpush3.bf16.msra.mxu1 %v15541_v34  ;;  %13878 = vmatprep.mubr.msk.f32.mxu1 %vm14865_vm1, %v14866_v2 }
0x2452   :  { %14465 = vmatprep.subr.bf16.mxu1 %v14864_v9 }
0x2454   :  { %13879 = vmatmul.mubr.f32.vlgmr.msra.gmra.mrb[118].mxu1 %v8549_v24 }
0x2455   :  { %14467 = vmatpush3.bf16.msra.mxu1 %v15683_v33  ;;  %13885 = vmatprep.mubr.msk.f32.mxu1 %vm14865_vm1, %v14866_v2 }
0x2456   :  { %14468 = vmatprep.subr.bf16.mxu1 %v14864_v9 }
0x2458   :  { %13886 = vmatmul.mubr.f32.vlgmr.msra.gmra.mrb[120].mxu1 %v8547_v21 }
0x2459   :  { %14470 = vmatpush3.bf16.msra.mxu1 %v15541_v34  ;;  %13892 = vmatprep.mubr.msk.f32.mxu1 %vm14865_vm1, %v14866_v2 }
0x245a   :  { %14471 = vmatprep.subr.bf16.mxu1 %v14864_v9 }
0x245c   :  { %13893 = vmatmul.mubr.f32.vlgmr.msra.gmra.mrb[122].mxu1 %v8547_v21 }
0x245d   :  { %14473 = vmatpush3.bf16.msra.mxu1 %v15541_v34  ;;  %13899 = vmatprep.mubr.msk.f32.mxu1 %vm14865_vm1, %v14866_v2 }
0x245e   :  { %14474 = vmatprep.subr.bf16.mxu1 %v14864_v9 }
0x251b   :  { %v8553_v12 = vpop.f32.mrb[112].mxu1 }
0x251c   :  { %v13859_v14 = vpop.f32.mrb[113].mxu1 }
0x251f   :  { %v8634_v18 = vpop.f32.mrb[114].mxu1 }
0x2520   :  { %v8635_v23 = vadd.f32 %v8634_v18, %v8553_v12  ;;  %v13866_v16 = vpop.f32.mrb[115].mxu1 }
0x2523   :  { %v8710_v29 = vpop.f32.mrb[116].mxu1 }
0x2524   :  { %v8711_v27 = vadd.f32 %v8710_v29, %v8635_v23  ;;  %v13873_v35 = vpop.f32.mrb[117].mxu1 }
0x2527   :  { %v8785_v56 = vpop.f32.mrb[118].mxu1 }
0x2528   :  { %v8786_v38 = vadd.f32 %v8785_v56, %v8711_v27  ;;  %v13880_v39 = vpop.f32.mrb[119].mxu1 }
0x252b   :  { %v8862_v43 = vpop.f32.mrb[120].mxu1 }
0x252c   :  { %v8863_v63 = vadd.f32 %v8862_v43, %v8786_v38  ;;  %v13887_v45 = vpop.f32.mrb[121].mxu1 }
0x252f   :  { %v8935_v46 = vpop.f32.mrb[122].mxu1 }
0x2530   :  { %v8936_v47 = vadd.f32 %v8935_v46, %v8863_v63  ;;  %v13894_v48 = vpop.f32.mrb[123].mxu1 }
0x2532   :  { %v8939_v10 = vadd.f32 %v8936_v47, %v8474_v42 }
0x2534   :  { %v12383_v19 = vmul.f32 -1.442695, %v8939_v10 }
0x2536   :  { %14810 = vpow2.f32 %v12383_v19 }
0x2540   :  { %v14811_v52 = vpop.eup %14810 }
0x2541   :  { %v8943_v49 = vadd.f32 1.0, %v14811_v52 }
0x2543   :  { %14812 = vrcp.f32 %v8943_v49 }
0x254d   :  { %v14813_v60 = vpop.eup %14812 }
0x254e   :  { %v8946_v1 = vmul.f32 2.0, %v14813_v60  ;;  %v8948_v54 = vmul.f32 %v14813_v60, %v15985_v25 }
0x2550   :  { %v12384_v5 = vadd.f32 -1.0, %v8946_v1 }
0x2552   :  { %8950 = vrot.lane.b32.xlu0 %v12384_v5, %s14872_s26 }
0x25c4   :  { %v8951_v53 = vpop.permute.xlu0 %8950 }
0x25c5   :  { %v8953_v57 = vmul.f32 %v14813_v60, %v8951_v53 }
0x25c7   :  { %8955 = vrot.lane.b32.xlu1 %v8953_v57, %s14873_s27 }
0x2639   :  { %v8956_v22 = vpop.permute.xlu1 %8955 }
0x263a   :  { %v16018_v58 = vadd.f32 %v8956_v22, %v8948_v54 }
0x263c   :  { %14814 = vtanh.f32 %v16018_v58 }
0x2646   :  { %v14815_v59 = vpop.eup %14814 }
0x2647   :  { %8961 = vrot.lane.b32.xlu0 %v14815_v59, %s14868_s8 }
0x26b9   :  { %v8962_v61 = vpop.permute.xlu0 %8961 }
0x26ba   :  { %v8964_v15 = vmul.f32 %v14813_v60, %v8962_v61 }
0x26bc   :  { %8967 = vrot.lane.b32.xlu1 %v8964_v15, %s14874_s28 }
0x272e   :  { %v8968_v62 = vpop.permute.xlu1 %8967 }
0x272f   :  { %v8969_v6 = vsel %vm1315_vm4, %v8968_v62, 0 }
0x2730   :  { %v9038_v7 = vand.u32 4294901760, %v8969_v6 }
0x2732   :  { %v9039_v41 = vsub.f32 %v8969_v6, %v9038_v7 }
0x2734   :  { %v9040_v0 = vand.u32 4294901760, %v9039_v41 }
0x2736   :  { %v9041_v44 = vsub.f32 %v9039_v41, %v9040_v0 }
0x2738   :  { %v9042_v50 = vand.u32 4294901760, %v9041_v44 }
0x273a   :  { %13900 = vmatmul.mubr.f32.vlgmr.msra.gmra.mrb[124].mxu1 %v9042_v50  ;;  %v9456_v50 = vld [vmem:[#allocation5 + $0x30] sm:$0xff] }
0x273b   :  { %14476 = vmatpush3.bf16.msra.mxu1 %v15659_v30  ;;  %13906 = vmatprep.mubr.msk.f32.mxu1 %vm14865_vm1, %v14866_v2 }
0x273c   :  { %14477 = vmatprep.subr.bf16.mxu1 %v14864_v9 }
0x273e   :  { %13907 = vmatmul.mubr.f32.vlgmr.msra.gmra.mrb[126].mxu1 %v9038_v7 }
0x273f   :  { %14479 = vmatpush3.bf16.msra.mxu1 %v15665_v28  ;;  %13913 = vmatprep.mubr.msk.f32.mxu1 %vm14865_vm1, %v14866_v2 }
0x2740   :  { %14480 = vmatprep.subr.bf16.mxu1 %v14864_v9 }
0x2742   :  { %13914 = vmatmul.mubr.f32.vlgmr.msra.gmra.mrb[128].mxu1 %v9039_v41 }
0x2743   :  { %14482 = vmatpush3.bf16.msra.mxu1 %v15541_v34  ;;  %13920 = vmatprep.mubr.msk.f32.mxu1 %vm14865_vm1, %v14866_v2 }
0x2744   :  { %14483 = vmatprep.subr.bf16.mxu1 %v14864_v9 }
0x2746   :  { %13921 = vmatmul.mubr.f32.vlgmr.msra.gmra.mrb[130].mxu1 %v9040_v0 }
0x2747   :  { %14485 = vmatpush3.bf16.msra.mxu1 %v15683_v33  ;;  %13927 = vmatprep.mubr.msk.f32.mxu1 %vm14865_vm1, %v14866_v2 }
0x2748   :  { %14486 = vmatprep.subr.bf16.mxu1 %v14864_v9 }
0x274a   :  { %13928 = vmatmul.mubr.f32.vlgmr.msra.gmra.mrb[132].mxu1 %v9038_v7 }
0x274b   :  { %14488 = vmatpush3.bf16.msra.mxu1 %v15541_v34  ;;  %13934 = vmatprep.mubr.msk.f32.mxu1 %vm14865_vm1, %v14866_v2 }
0x274c   :  { %14489 = vmatprep.subr.bf16.mxu1 %v14864_v9 }
0x274e   :  { %13935 = vmatmul.mubr.f32.vlgmr.msra.gmra.mrb[134].mxu1 %v9038_v7 }
0x274f   :  { %14491 = vmatpush3.bf16.msra.mxu1 %v15541_v34  ;;  %13941 = vmatprep.mubr.msk.f32.mxu1 %vm14865_vm1, %v14866_v2 }
0x2750   :  { %14492 = vmatprep.subr.bf16.mxu1 %v14864_v9 }
0x280d   :  { %v9044_v55 = vpop.f32.mrb[124].mxu1 }
0x280e   :  { %v13901_v4 = vpop.f32.mrb[125].mxu1 }
0x2811   :  { %v9125_v51 = vpop.f32.mrb[126].mxu1 }
0x2812   :  { %v9126_v40 = vadd.f32 %v9125_v51, %v9044_v55  ;;  %v13908_v31 = vpop.f32.mrb[127].mxu1 }
0x2815   :  { %v9201_v32 = vpop.f32.mrb[128].mxu1 }
0x2816   :  { %v9202_v37 = vadd.f32 %v9201_v32, %v9126_v40  ;;  %v13915_v25 = vpop.f32.mrb[129].mxu1 }
0x2819   :  { %v9276_v3 = vpop.f32.mrb[130].mxu1 }
0x281a   :  { %v9277_v36 = vadd.f32 %v9276_v3, %v9202_v37  ;;  %v13922_v11 = vpop.f32.mrb[131].mxu1 }
0x281d   :  { %v9353_v17 = vpop.f32.mrb[132].mxu1 }
0x281e   :  { %v9354_v20 = vadd.f32 %v9353_v17, %v9277_v36  ;;  %v13929_v21 = vpop.f32.mrb[133].mxu1 }
0x2821   :  { %v9426_v8 = vpop.f32.mrb[134].mxu1 }
0x2822   :  { %v9427_v24 = vadd.f32 %v9426_v8, %v9354_v20  ;;  %v13936_v26 = vpop.f32.mrb[135].mxu1 }
0x2823   :  { %v10440_v26 = vld [vmem:[%s16289_s2 + $0x34] sm:$0xff] }
0x2824   :  { %v9430_v12 = vadd.f32 %v9427_v24, %v8965_v13  ;;  %v10441_v24 = vld [vmem:[%s16289_s2 + $0x3c] sm:$0xf] }
0x2825   :  { %v10449_v13 = vsel %vm4936_vm5, %v10441_v24, 0 }
0x2826   :  { %v12385_v14 = vmul.f32 -1.442695, %v9430_v12  ;;  %v10452_v12 = vand.u32 4294901760, %v10440_v26 }
0x2828   :  { %14816 = vpow2.f32 %v12385_v14  ;;  %v10455_v14 = vand.u32 4294901760, %v10449_v13 }
0x2832   :  { %v14817_v18 = vpop.eup %14816 }
0x2833   :  { %v9434_v23 = vadd.f32 1.0, %v14817_v18  ;;  %v16096_v18 = vsub.f32 %v10440_v26, %v10452_v12 }
0x2835   :  { %14818 = vrcp.f32 %v9434_v23  ;;  %v16098_v23 = vsub.f32 %v10449_v13, %v10455_v14 }
0x283f   :  { %v14819_v16 = vpop.eup %14818 }
0x2840   :  { %v9437_v29 = vmul.f32 2.0, %v14819_v16  ;;  %v9439_v38 = vmul.f32 %v14819_v16, %v16018_v58 }
0x2842   :  { %v12386_v27 = vadd.f32 -1.0, %v9437_v29  ;;  %v10531_v29 = vand.u32 4294901760, %v16096_v18 }
0x2844   :  { %9441 = vrot.lane.b32.xlu0 %v12386_v27, %s14872_s26  ;;  %v10538_v27 = vand.u32 4294901760, %v16098_v23 }
0x28b6   :  { %v9442_v35 = vpop.permute.xlu0 %9441 }
0x28b7   :  { %v9444_v56 = vmul.f32 %v14819_v16, %v9442_v35  ;;  %v10438_v35 = vld [vmem:[%s16289_s2 + $0x28] sm:$0xff] }
0x28b9   :  { %9446 = vrot.lane.b32.xlu1 %v9444_v56, %s14873_s27 }
0x292b   :  { %v9447_v39 = vpop.permute.xlu1 %9446 }
0x292c   :  { %v16051_v43 = vadd.f32 %v9447_v39, %v9439_v38  ;;  %v10532_v38 = vsub.f32 %v16096_v18, %v10531_v29  ;;  %v10539_v39 = vsub.f32 %v16098_v23, %v10538_v27 }
0x292e   :  { %14820 = vtanh.f32 %v16051_v43 }
0x2938   :  { %v14821_v63 = vpop.eup %14820 }
0x2939   :  { %9452 = vrot.lane.b32.xlu0 %v14821_v63, %s14868_s8 }
0x29ab   :  { %v9453_v45 = vpop.permute.xlu0 %9452 }
0x29ac   :  { %v9455_v46 = vmul.f32 %v14819_v16, %v9453_v45  ;;  %v10439_v16 = vld [vmem:[%s16289_s2 + $0x30] sm:$0xf]  ;;  %v10444_v45 = vld [vmem:[#allocation4 + $0x38] sm:$0xff] }
0x29ad   :  { %v10914_v56 = vsel %vm4936_vm5, %v10439_v16, 0 }
0x29ae   :  { %9458 = vrot.lane.b32.xlu1 %v9455_v46, %s14874_s28  ;;  %v10920_v63 = vand.u32 4294901760, %v10914_v56  ;;  %v10533_v46 = vand.u32 4294901760, %v10532_v38 }
0x2a20   :  { %v9459_v47 = vpop.permute.xlu1 %9458 }
0x2a21   :  { %v9460_v48 = vsel %vm1315_vm4, %v9459_v47, 0  ;;  %v10540_v47 = vand.u32 4294901760, %v10539_v39 }
0x2a22   :  { %v9529_v42 = vand.u32 4294901760, %v9460_v48 }
0x2a24   :  { %v9530_v10 = vsub.f32 %v9460_v48, %v9529_v42 }
0x2a26   :  { %v9531_v19 = vand.u32 4294901760, %v9530_v10 }
0x2a28   :  { %v9532_v52 = vsub.f32 %v9530_v10, %v9531_v19 }
0x2a2a   :  { %v9533_v49 = vand.u32 4294901760, %v9532_v52 }
0x2a2c   :  { %13942 = vmatmul.mubr.f32.vlgmr.msra.gmra.mrb[136].mxu1 %v9533_v49  ;;  %v14529_v49 = vpack.c.bf16 %v10540_v47, %v10533_v46 }
0x2a2d   :  { %14494 = vmatpush3.bf16.msra.mxu1 %v15659_v30  ;;  %13948 = vmatprep.mubr.msk.f32.mxu1 %vm14865_vm1, %v14866_v2 }
0x2a2e   :  { %14495 = vmatprep.subr.bf16.mxu1 %v14864_v9 }
0x2a30   :  { %13949 = vmatmul.mubr.f32.vlgmr.msra.gmra.mrb[138].mxu1 %v9529_v42 }
0x2a31   :  { %14497 = vmatpush3.bf16.msra.mxu1 %v15665_v28  ;;  %13955 = vmatprep.mubr.msk.f32.mxu1 %vm14865_vm1, %v14866_v2 }
0x2a32   :  { %14498 = vmatprep.subr.bf16.mxu1 %v14864_v9 }
0x2a34   :  { %13956 = vmatmul.mubr.f32.vlgmr.msra.gmra.mrb[140].mxu1 %v9530_v10  ;;  %v10446_v10 = vsel %vm1315_vm4, %v10444_v45, 0 }
0x2a35   :  { %14500 = vmatpush3.bf16.msra.mxu1 %v15541_v34  ;;  %13962 = vmatprep.mubr.msk.f32.mxu1 %vm14865_vm1, %v14866_v2 }
0x2a36   :  { %14501 = vmatprep.subr.bf16.mxu1 %v14864_v9 }
0x2a38   :  { %13963 = vmatmul.mubr.f32.vlgmr.msra.gmra.mrb[142].mxu1 %v9531_v19 }
0x2a39   :  { %14503 = vmatpush3.bf16.msra.mxu1 %v15683_v33  ;;  %13969 = vmatprep.mubr.msk.f32.mxu1 %vm14865_vm1, %v14866_v2 }
0x2a3a   :  { %14504 = vmatprep.subr.bf16.mxu1 %v14864_v9 }
0x2a3c   :  { %13970 = vmatmul.mubr.f32.vlgmr.msra.gmra.mrb[144].mxu1 %v9529_v42 }
0x2a3d   :  { %14506 = vmatpush3.bf16.msra.mxu1 %v15541_v34  ;;  %13976 = vmatprep.mubr.msk.f32.mxu1 %vm14865_vm1, %v14866_v2 }
0x2a3e   :  { %14507 = vmatprep.subr.bf16.mxu1 %v14864_v9 }
0x2a40   :  { %13977 = vmatmul.mubr.f32.vlgmr.msra.gmra.mrb[146].mxu1 %v9529_v42  ;;  %v16117_v42 = vsub.f32 %v10914_v56, %v10920_v63 }
0x2a41   :  { %14509 = vmatpush3.bf16.msra.mxu1 %v15541_v34  ;;  %13983 = vmatprep.mubr.msk.f32.mxu1 %vm14865_vm1, %v14866_v2 }
0x2a42   :  { %14510 = vmatprep.subr.bf16.mxu1 %v14864_v9 }
0x2aff   :  { %v9535_v60 = vpop.f32.mrb[136].mxu1 }
0x2b00   :  { %v13943_v1 = vpop.f32.mrb[137].mxu1 }
0x2b01   :  { %v11003_v1 = vand.u32 4294901760, %v16117_v42 }
0x2b03   :  { %v9616_v5 = vpop.f32.mrb[138].mxu1 }
0x2b04   :  { %v9617_v53 = vadd.f32 %v9616_v5, %v9535_v60  ;;  %v13950_v57 = vpop.f32.mrb[139].mxu1 }
0x2b07   :  { %v9692_v54 = vpop.f32.mrb[140].mxu1 }
0x2b08   :  { %v9693_v22 = vadd.f32 %v9692_v54, %v9617_v53  ;;  %v13957_v58 = vpop.f32.mrb[141].mxu1  ;;  %v16123_v53 = vand.u32 4294901760, %v10446_v10  ;;  %v14526_v54 = vpack.c.bf16 %v10455_v14, %v10452_v12 }
0x2b09   :  { %v11004_v58 = vsub.f32 %v16117_v42, %v11003_v1 }
0x2b0b   :  { %v9767_v59 = vpop.f32.mrb[142].mxu1 }
0x2b0c   :  { %v9768_v61 = vadd.f32 %v9767_v59, %v9693_v22  ;;  %v13964_v15 = vpop.f32.mrb[143].mxu1 }
0x2b0f   :  { %v9844_v62 = vpop.f32.mrb[144].mxu1 }
0x2b10   :  { %v9845_v6 = vadd.f32 %v9844_v62, %v9768_v61  ;;  %v13971_v7 = vpop.f32.mrb[145].mxu1  ;;  %v16134_v61 = vsub.f32 %v10446_v10, %v16123_v53  ;;  %v10443_v62 = vld [vmem:[#allocation3 + $0x38] sm:$0xff] }
0x2b11   :  { %v11005_v7 = vand.u32 4294901760, %v11004_v58 }
0x2b13   :  { %v9917_v41 = vpop.f32.mrb[146].mxu1 }
0x2b14   :  { %v9918_v0 = vadd.f32 %v9917_v41, %v9845_v6  ;;  %v13978_v44 = vpop.f32.mrb[147].mxu1 }
0x2b15   :  { %v10911_v44 = vsel %vm1315_vm4, %v10443_v62, 0 }
0x2b16   :  { %v9921_v55 = vadd.f32 %v9918_v0, %v9456_v50  ;;  %v10520_v0 = vand.u32 4294901760, %v16134_v61 }
0x2b18   :  { %v12387_v4 = vmul.f32 -1.442695, %v9921_v55  ;;  %v16148_v55 = vand.u32 4294901760, %v10911_v44 }
0x2b1a   :  { %14822 = vpow2.f32 %v12387_v4  ;;  %v10984_v4 = vsub.f32 %v10911_v44, %v16148_v55 }
0x2b24   :  { %v14823_v51 = vpop.eup %14822 }
0x2b25   :  { %v9925_v40 = vadd.f32 1.0, %v14823_v51 }
0x2b27   :  { %14824 = vrcp.f32 %v9925_v40  ;;  %v14538_v40 = vpack.c.bf16 %v10538_v27, %v10531_v29 }
0x2b31   :  { %v14825_v31 = vpop.eup %14824 }
0x2b32   :  { %v9928_v32 = vmul.f32 2.0, %v14825_v31  ;;  %v9930_v36 = vmul.f32 %v14825_v31, %v16051_v43  ;;  %v10917_v43 = vand.u32 4294901760, %v10438_v35 }
0x2b34   :  { %v12388_v37 = vadd.f32 -1.0, %v9928_v32  ;;  %v16115_v48 = vsub.f32 %v10438_v35, %v10917_v43 }
0x2b36   :  { %9932 = vrot.lane.b32.xlu0 %v12388_v37, %s14872_s26  ;;  %v10996_v60 = vand.u32 4294901760, %v16115_v48  ;;  %v14550_v32 = vpack.c.bf16 %v16117_v42, %v16115_v48 }
0x2b38   :  { %v10997_v22 = vsub.f32 %v16115_v48, %v10996_v60 }
0x2b3a   :  { %v10998_v6 = vand.u32 4294901760, %v10997_v22 }
0x2b3c   :  { %v14547_v50 = vpack.c.bf16 %v11005_v7, %v10998_v6 }
0x2ba8   :  { %v9933_v25 = vpop.permute.xlu0 %9932 }
0x2ba9   :  { %v9935_v3 = vmul.f32 %v14825_v31, %v9933_v25  ;;  %v14556_v25 = vpack.c.bf16 %v11003_v1, %v10996_v60 }
0x2bab   :  { %9937 = vrot.lane.b32.xlu1 %v9935_v3, %s14873_s27 }
0x2c1d   :  { %v9938_v11 = vpop.permute.xlu1 %9937 }
0x2c1e   :  { %v16084_v17 = vadd.f32 %v9938_v11, %v9930_v36 }
0x2c20   :  { %14826 = vtanh.f32 %v16084_v17 }
0x2c2a   :  { %v14827_v20 = vpop.eup %14826 }
0x2c2b   :  { %9943 = vrot.lane.b32.xlu0 %v14827_v20, %s14868_s8 }
0x2c9d   :  { %v9944_v21 = vpop.permute.xlu0 %9943 }
0x2c9e   :  { %v9946_v8 = vmul.f32 %v14825_v31, %v9944_v21 }
0x2ca0   :  { %9949 = vrot.lane.b32.xlu1 %v9946_v8, %s14874_s28 }
0x2d12   :  { %v9950_v19 = vpop.permute.xlu1 %9949 }
0x2d13   :  { %v9951_v52 = vsel %vm1315_vm4, %v9950_v19, 0 }
0x2d14   :  { %v10020_v5 = vand.u32 4294901760, %v9951_v52 }
0x2d16   :  { %v10021_v57 = vsub.f32 %v9951_v52, %v10020_v5  ;;  %14019 = vmatmul.mubr.f32.vlgmr.msra.gmra.mrb[48].mxu0 %v10020_v5  ;;  %v9947_v52 = vld [vmem:[#allocation5 + $0x38] sm:$0xff] }
0x2d17   :  { %14530 = vmatpush3.bf16.msra.mxu0 %v14529_v49  ;;  %14032 = vmatprep.mubr.msk.f32.mxu0 %vm14865_vm1, %v14866_v2 }
0x2d18   :  { %v10022_v59 = vand.u32 4294901760, %v10021_v57  ;;  %14534 = vmatprep.subr.bf16.mxu0 %v14864_v9 }
0x2d1a   :  { %v10023_v15 = vsub.f32 %v10021_v57, %v10022_v59  ;;  %14033 = vmatmul.mubr.f32.vlgmr.msra.gmra.mrb[50].mxu0 %v16123_v53 }
0x2d1b   :  { %14536 = vmatpush3.bf16.msra.mxu0 %v14526_v54  ;;  %14046 = vmatprep.mubr.msk.f32.mxu0 %vm14865_vm1, %v14866_v2 }
0x2d1c   :  { %v10024_v41 = vand.u32 4294901760, %v10023_v15  ;;  %14540 = vmatprep.subr.bf16.mxu0 %v14864_v9 }
0x2d1e   :  { %13984 = vmatmul.mubr.f32.vlgmr.msra.gmra.mrb[148].mxu1 %v10024_v41  ;;  %14047 = vmatmul.mubr.f32.vlgmr.msra.gmra.mrb[52].mxu0 %v10520_v0 }
0x2d1f   :  { %14512 = vmatpush3.bf16.msra.mxu1 %v15659_v30  ;;  %14542 = vmatpush3.bf16.msra.mxu0 %v14526_v54  ;;  %v14544_v30 = vpack.c.bf16 %v10920_v63, %v10917_v43 }
0x2d20   :  { %13990 = vmatprep.mubr.msk.f32.mxu1 %vm14865_vm1, %v14866_v2  ;;  %14060 = vmatprep.mubr.msk.f32.mxu0 %vm14865_vm1, %v14866_v2 }
0x2d21   :  { %14513 = vmatprep.subr.bf16.mxu1 %v14864_v9  ;;  %14546 = vmatprep.subr.bf16.mxu0 %v14864_v9 }
0x2d22   :  { %13991 = vmatmul.mubr.f32.vlgmr.msra.gmra.mrb[150].mxu1 %v10020_v5  ;;  %14061 = vmatmul.mubr.f32.vlgmr.msra.gmra.mrb[54].mxu0 %v16123_v53 }
0x2d23   :  { %14515 = vmatpush3.bf16.msra.mxu1 %v15665_v28  ;;  %14548 = vmatpush3.bf16.msra.mxu0 %v14547_v50  ;;  %v10985_v28 = vand.u32 4294901760, %v10984_v4 }
0x2d24   :  { %13997 = vmatprep.mubr.msk.f32.mxu1 %vm14865_vm1, %v14866_v2  ;;  %14074 = vmatprep.mubr.msk.f32.mxu0 %vm14865_vm1, %v14866_v2 }
0x2d25   :  { %14516 = vmatprep.subr.bf16.mxu1 %v14864_v9  ;;  %14552 = vmatprep.subr.bf16.mxu0 %v14864_v9  ;;  %v10986_v31 = vsub.f32 %v10984_v4, %v10985_v28 }
0x2d26   :  { %13998 = vmatmul.mubr.f32.vlgmr.msra.gmra.mrb[152].mxu1 %v10021_v57  ;;  %14075 = vmatmul.mubr.f32.vlgmr.msra.gmra.mrb[56].mxu0 %v16148_v55 }
0x2d27   :  { %14518 = vmatpush3.bf16.msra.mxu1 %v15541_v34  ;;  %14554 = vmatpush3.bf16.msra.mxu0 %v14544_v30  ;;  %v10521_v34 = vsub.f32 %v16134_v61, %v10520_v0  ;;  %v10987_v37 = vand.u32 4294901760, %v10986_v31 }
0x2d28   :  { %14004 = vmatprep.mubr.msk.f32.mxu1 %vm14865_vm1, %v14866_v2  ;;  %14088 = vmatprep.mubr.msk.f32.mxu0 %vm14865_vm1, %v14866_v2 }
0x2d29   :  { %14519 = vmatprep.subr.bf16.mxu1 %v14864_v9  ;;  %14558 = vmatprep.subr.bf16.mxu0 %v14864_v9  ;;  %v10522_v51 = vand.u32 4294901760, %v10521_v34 }
0x2d2a   :  { %14005 = vmatmul.mubr.f32.vlgmr.msra.gmra.mrb[154].mxu1 %v10022_v59  ;;  %14089 = vmatmul.mubr.f32.vlgmr.msra.gmra.mrb[58].mxu0 %v10985_v28 }
0x2d2b   :  { %14521 = vmatpush3.bf16.msra.mxu1 %v15683_v33  ;;  %14560 = vmatpush3.bf16.msra.mxu0 %v14544_v30  ;;  %v14532_v33 = vpack.c.bf16 %v16098_v23, %v16096_v18 }
0x2d2c   :  { %14011 = vmatprep.mubr.msk.f32.mxu1 %vm14865_vm1, %v14866_v2  ;;  %14102 = vmatprep.mubr.msk.f32.mxu0 %vm14865_vm1, %v14866_v2 }
0x2d2d   :  { %14525 = vmatprep.subr.bf16.mxu1 %v14864_v9  ;;  %14564 = vmatprep.subr.bf16.mxu0 %v14864_v9 }
0x2d2e   :  { %14012 = vmatmul.mubr.f32.vlgmr.msra.gmra.mrb[156].mxu1 %v10020_v5  ;;  %14103 = vmatmul.mubr.f32.vlgmr.msra.gmra.mrb[60].mxu0 %v16148_v55 }
0x2d2f   :  { %14527 = vmatpush3.bf16.msra.mxu1 %v14526_v54  ;;  %14025 = vmatprep.mubr.msk.f32.mxu1 %vm14865_vm1, %v14866_v2 }
0x2d30   :  { %14531 = vmatprep.subr.bf16.mxu1 %v14864_v9  ;;  %14116 = vmatprep.mubr.msk.f32.mxu0 %vm14865_vm1, %v14866_v2 }
0x2d32   :  { %14026 = vmatmul.mubr.f32.vlgmr.msra.gmra.mrb[158].mxu1 %v10522_v51 }
0x2d33   :  { %14533 = vmatpush3.bf16.msra.mxu1 %v14532_v33  ;;  %14039 = vmatprep.mubr.msk.f32.mxu1 %vm14865_vm1, %v14866_v2 }
0x2d34   :  { %14537 = vmatprep.subr.bf16.mxu1 %v14864_v9 }
0x2d36   :  { %14040 = vmatmul.mubr.f32.vlgmr.msra.gmra.mrb[160].mxu1 %v16134_v61 }
0x2d37   :  { %14539 = vmatpush3.bf16.msra.mxu1 %v14538_v40  ;;  %14053 = vmatprep.mubr.msk.f32.mxu1 %vm14865_vm1, %v14866_v2  ;;  %v12391_v40 = vld [vmem:[%s16289_s2 + $0x60] ss:$0 sm:$0xff] }
0x2d38   :  { %14543 = vmatprep.subr.bf16.mxu1 %v14864_v9 }
0x2d3a   :  { %14054 = vmatmul.mubr.f32.vlgmr.msra.gmra.mrb[162].mxu1 %v16123_v53 }
0x2d3b   :  { %14545 = vmatpush3.bf16.msra.mxu1 %v14544_v30  ;;  %14067 = vmatprep.mubr.msk.f32.mxu1 %vm14865_vm1, %v14866_v2 }
0x2d3c   :  { %14549 = vmatprep.subr.bf16.mxu1 %v14864_v9 }
0x2d3e   :  { %14068 = vmatmul.mubr.f32.vlgmr.msra.gmra.mrb[164].mxu1 %v10987_v37 }
0x2d3f   :  { %14551 = vmatpush3.bf16.msra.mxu1 %v14550_v32  ;;  %14081 = vmatprep.mubr.msk.f32.mxu1 %vm14865_vm1, %v14866_v2 }
0x2d40   :  { %14555 = vmatprep.subr.bf16.mxu1 %v14864_v9 }
0x2d42   :  { %14082 = vmatmul.mubr.f32.vlgmr.msra.gmra.mrb[166].mxu1 %v10984_v4 }
0x2d43   :  { %14557 = vmatpush3.bf16.msra.mxu1 %v14556_v25  ;;  %14095 = vmatprep.mubr.msk.f32.mxu1 %vm14865_vm1, %v14866_v2 }
0x2d44   :  { %14561 = vmatprep.subr.bf16.mxu1 %v14864_v9 }
0x2d46   :  { %14096 = vmatmul.mubr.f32.vlgmr.msra.gmra.mrb[168].mxu1 %v16148_v55 }
0x2d47   :  { %14109 = vmatprep.mubr.msk.f32.mxu1 %vm14865_vm1, %v14866_v2 }
0x2de9   :  { %v10408_v3 = vpop.f32.mrb[48].mxu0 }
0x2dea   :  { %v14020_v36 = vpop.f32.mrb[49].mxu0 }
0x2ded   :  { %v10605_v11 = vpop.f32.mrb[50].mxu0 }
0x2dee   :  { %v14034_v20 = vpop.f32.mrb[51].mxu0 }
0x2df1   :  { %v10026_v21 = vpop.f32.mrb[148].mxu1  ;;  %v10756_v8 = vpop.f32.mrb[52].mxu0 }
0x2df2   :  { %v13985_v24 = vpop.f32.mrb[149].mxu1  ;;  %v14048_v26 = vpop.f32.mrb[53].mxu0 }
0x2df5   :  { %v10107_v13 = vpop.f32.mrb[150].mxu1  ;;  %v10906_v12 = vpop.f32.mrb[54].mxu0 }
0x2df6   :  { %v10108_v14 = vadd.f32 %v10107_v13, %v10026_v21  ;;  %v13992_v18 = vpop.f32.mrb[151].mxu1  ;;  %v14062_v23 = vpop.f32.mrb[55].mxu0 }
0x2df9   :  { %v10183_v16 = vpop.f32.mrb[152].mxu1  ;;  %v11070_v29 = vpop.f32.mrb[56].mxu0 }
0x2dfa   :  { %v10184_v27 = vadd.f32 %v10183_v16, %v10108_v14  ;;  %v13999_v35 = vpop.f32.mrb[153].mxu1  ;;  %v14076_v56 = vpop.f32.mrb[57].mxu0 }
0x2dfb   :  { %v11401_v56 = vld [vmem:[%s16289_s2 + $0x4c] sm:$0xff] }
0x2dfd   :  { %v10258_v38 = vpop.f32.mrb[154].mxu1  ;;  %v11221_v39 = vpop.f32.mrb[58].mxu0 }
0x2dfe   :  { %v10259_v43 = vadd.f32 %v10258_v38, %v10184_v27  ;;  %v14006_v63 = vpop.f32.mrb[155].mxu1  ;;  %v14090_v45 = vpop.f32.mrb[59].mxu0  ;;  %v11402_v27 = vld [vmem:[%s16289_s2 + $0x54] sm:$0xf] }
0x2dff   :  { %v11410_v38 = vsel %vm4936_vm5, %v11402_v27, 0 }
0x2e01   :  { %v10335_v46 = vpop.f32.mrb[156].mxu1  ;;  %v11371_v47 = vpop.f32.mrb[60].mxu0 }
0x2e02   :  { %v10336_v48 = vadd.f32 %v10335_v46, %v10259_v43  ;;  %v14013_v42 = vpop.f32.mrb[157].mxu1  ;;  %v14104_v10 = vpop.f32.mrb[61].mxu0  ;;  %v11416_v43 = vand.u32 4294901760, %v11410_v38 }
0x2e04   :  { %v10409_v19 = vadd.f32 %v10408_v3, %v10336_v48 }
0x2e05   :  { %v10524_v49 = vpop.f32.mrb[158].mxu1 }
0x2e06   :  { %v10412_v60 = vadd.f32 %v10409_v19, %v9947_v52  ;;  %v10606_v1 = vadd.f32 %v10605_v11, %v10524_v49  ;;  %v14027_v5 = vpop.f32.mrb[159].mxu1 }
0x2e08   :  { %v12389_v53 = vmul.f32 -1.442695, %v10412_v60 }
0x2e09   :  { %v10681_v57 = vpop.f32.mrb[160].mxu1 }
0x2e0a   :  { %14828 = vpow2.f32 %v12389_v53  ;;  %v10682_v54 = vadd.f32 %v10681_v57, %v10606_v1  ;;  %v14041_v22 = vpop.f32.mrb[161].mxu1  ;;  %v11400_v53 = vld [vmem:[%s16289_s2 + $0x48] sm:$0xf]  ;;  %v11399_v57 = vld [vmem:[%s16289_s2 + $0x40] sm:$0xff] }
0x2e0b   :  { %v11880_v22 = vand.u32 4294901760, %v11399_v57 }
0x2e0c   :  { %v10757_v58 = vadd.f32 %v10756_v8, %v10682_v54  ;;  %v11877_v54 = vsel %vm4936_vm5, %v11400_v53, 0 }
0x2e0d   :  { %v10833_v59 = vpop.f32.mrb[162].mxu1 }
0x2e0e   :  { %v10834_v61 = vadd.f32 %v10833_v59, %v10757_v58  ;;  %v14055_v15 = vpop.f32.mrb[163].mxu1  ;;  %v11883_v58 = vand.u32 4294901760, %v11877_v54  ;;  %v11958_v59 = vsub.f32 %v11399_v57, %v11880_v22 }
0x2e10   :  { %v10907_v62 = vadd.f32 %v10906_v12, %v10834_v61  ;;  %v11965_v61 = vsub.f32 %v11877_v54, %v11883_v58 }
0x2e11   :  { %v10989_v6 = vpop.f32.mrb[164].mxu1 }
0x2e12   :  { %v10990_v7 = vadd.f32 %v10989_v6, %v10907_v62  ;;  %v14069_v41 = vpop.f32.mrb[165].mxu1  ;;  %v14586_v6 = vpack.c.bf16 %v11965_v61, %v11958_v59 }
0x2e13   :  { %v11966_v41 = vand.u32 4294901760, %v11965_v61 }
0x2e14   :  { %v14829_v0 = vpop.eup %14828  ;;  %v11071_v44 = vadd.f32 %v11070_v29, %v10990_v7  ;;  %v11959_v7 = vand.u32 4294901760, %v11958_v59 }
0x2e15   :  { %v10416_v50 = vadd.f32 1.0, %v14829_v0  ;;  %v11146_v55 = vpop.f32.mrb[166].mxu1 }
0x2e16   :  { %v11147_v30 = vadd.f32 %v11146_v55, %v11071_v44  ;;  %v14083_v4 = vpop.f32.mrb[167].mxu1  ;;  %v14592_v0 = vpack.c.bf16 %v11966_v41, %v11959_v7 }
0x2e17   :  { %14830 = vrcp.f32 %v10416_v50  ;;  %v11967_v4 = vsub.f32 %v11965_v61, %v11966_v41 }
0x2e18   :  { %v11222_v28 = vadd.f32 %v11221_v39, %v11147_v30  ;;  %v11413_v39 = vand.u32 4294901760, %v11401_v56  ;;  %v11960_v30 = vsub.f32 %v11958_v59, %v11959_v7 }
0x2e19   :  { %v11298_v34 = vpop.f32.mrb[168].mxu1 }
0x2e1a   :  { %v11299_v33 = vadd.f32 %v11298_v34, %v11222_v28  ;;  %v14097_v51 = vpop.f32.mrb[169].mxu1  ;;  %v11491_v63 = vsub.f32 %v11401_v56, %v11413_v39  ;;  %v14562_v52 = vpack.c.bf16 %v11416_v43, %v11413_v39 }
0x2e1b   :  { %v11968_v51 = vand.u32 4294901760, %v11967_v4 }
0x2e1c   :  { %v11372_v31 = vadd.f32 %v11371_v47, %v11299_v33  ;;  %v11492_v45 = vand.u32 4294901760, %v11491_v63  ;;  %14563 = vmatpush3.bf16.msra.mxu1 %v14562_v52  ;;  %v11961_v33 = vand.u32 4294901760, %v11960_v30 }
0x2e1d   :  { %14567 = vmatprep.subr.bf16.mxu1 %v14864_v9 }
0x2e1e   :  { %v11379_v32 = vadd.f32 %v12391_v40, %v11372_v31  ;;  %v11493_v47 = vsub.f32 %v11491_v63, %v11492_v45 }
0x2e20   :  { %v12392_v37 = vmul.f32 -1.442695, %v11379_v32  ;;  %v11494_v42 = vand.u32 4294901760, %v11493_v47  ;;  %v14583_v32 = vpack.c.bf16 %v11968_v51, %v11961_v33 }
0x2e21   :  { %v14831_v25 = vpop.eup %14830 }
0x2e22   :  { %14832 = vpow2.f32 %v12392_v37  ;;  %v10419_v3 = vmul.f32 2.0, %v14831_v25  ;;  %v10421_v23 = vmul.f32 %v14831_v25, %v16084_v17  ;;  %v11498_v17 = vsub.f32 %v11410_v38, %v11416_v43 }
0x2e23   :  { %v14580_v37 = vpack.c.bf16 %v11883_v58, %v11880_v22  ;;  %v12394_v22 = vld [vmem:[%s16289_s2 + $0x68] ss:$0 sm:$0xff] }
0x2e24   :  { %v12390_v36 = vadd.f32 -1.0, %v10419_v3  ;;  %v11499_v46 = vand.u32 4294901760, %v11498_v17  ;;  %v14568_v1 = vpack.c.bf16 %v11498_v17, %v11491_v63 }
0x2e26   :  { %10423 = vrot.lane.b32.xlu0 %v12390_v36, %s14872_s26  ;;  %v11500_v48 = vsub.f32 %v11498_v17, %v11499_v46  ;;  %v14574_v5 = vpack.c.bf16 %v11499_v46, %v11492_v45 }
0x2e28   :  { %v11501_v10 = vand.u32 4294901760, %v11500_v48 }
0x2e2a   :  { %v14565_v19 = vpack.c.bf16 %v11501_v10, %v11494_v42 }
0x2e2c   :  { %v14833_v11 = vpop.eup %14832  ;;  %14566 = vmatpush3.bf16.msra.mxu0 %v14565_v19 }
0x2e2d   :  { %v11383_v20 = vadd.f32 1.0, %v14833_v11  ;;  %14570 = vmatprep.subr.bf16.mxu0 %v14864_v9 }
0x2e2f   :  { %14834 = vrcp.f32 %v11383_v20 }
0x2e39   :  { %v14835_v21 = vpop.eup %14834 }
0x2e3a   :  { %v11386_v8 = vmul.f32 2.0, %v14835_v21 }
0x2e3c   :  { %v12393_v24 = vadd.f32 -1.0, %v11386_v8 }
0x2e3e   :  { %11389 = vrot.lane.b32.xlu1 %v12393_v24, %s14872_s26 }
0x2e98   :  { %v10424_v26 = vpop.permute.xlu0 %10423 }
0x2e99   :  { %v10426_v13 = vmul.f32 %v14831_v25, %v10424_v26 }
0x2e9b   :  { %10428 = vrot.lane.b32.xlu0 %v10426_v13, %s14873_s27 }
0x2eb0   :  { %v11390_v12 = vpop.permute.xlu1 %11389 }
0x2eb1   :  { %v11392_v14 = vmul.f32 %v14835_v21, %v11390_v12 }
0x2eb3   :  { %14836 = vtanh.f32 %v11392_v14 }
0x2ebd   :  { %v14837_v18 = vpop.eup %14836 }
0x2ebe   :  { %11395 = vrot.lane.b32.xlu1 %v14837_v18, %s14875_s11 }
0x2f0d   :  { %v10429_v16 = vpop.permute.xlu0 %10428 }
0x2f0e   :  { %v10431_v29 = vadd.f32 %v10429_v16, %v10421_v23 }
0x2f10   :  { %14838 = vtanh.f32 %v10431_v29 }
0x2f1a   :  { %v14839_v35 = vpop.eup %14838 }
0x2f1b   :  { %10434 = vrot.lane.b32.xlu0 %v14839_v35, %s14868_s8 }
0x2f30   :  { %v11396_v49 = vpop.permute.xlu1 %11395 }
0x2f31   :  { %v11398_v60 = vmul.f32 %v14835_v21, %v11396_v49 }
0x2f33   :  { %11405 = vrot.lane.b32.xlu1 %v11398_v60, %s14874_s28 }
0x2f8d   :  { %v10435_v15 = vpop.permute.xlu0 %10434 }
0x2f8e   :  { %v10437_v62 = vmul.f32 %v14831_v25, %v10435_v15 }
0x2f90   :  { %11872 = vrot.lane.b32.xlu0 %v10437_v62, %s14874_s28 }
0x2fa5   :  { %v11406_v44 = vpop.permute.xlu1 %11405 }
0x2fa6   :  { %v11407_v50 = vsel %vm1315_vm4, %v11406_v44, 0 }
0x2fa7   :  { %v11479_v55 = vand.u32 4294901760, %v11407_v50 }
0x2fa9   :  { %v11480_v28 = vsub.f32 %v11407_v50, %v11479_v55  ;;  %14117 = vmatmul.mubr.f32.vlgmr.msra.gmra.mrb[62].mxu0 %v11479_v55 }
0x2faa   :  { %14572 = vmatpush3.bf16.msra.mxu0 %v14562_v52  ;;  %14130 = vmatprep.mubr.msk.f32.mxu0 %vm14865_vm1, %v14866_v2 }
0x2fab   :  { %v11481_v34 = vand.u32 4294901760, %v11480_v28  ;;  %14576 = vmatprep.subr.bf16.mxu0 %v14864_v9 }
0x2fad   :  { %v11482_v40 = vsub.f32 %v11480_v28, %v11481_v34  ;;  %14131 = vmatmul.mubr.f32.vlgmr.msra.gmra.mrb[64].mxu0 %v11481_v34 }
0x2fae   :  { %14578 = vmatpush3.bf16.msra.mxu0 %v14562_v52  ;;  %14144 = vmatprep.mubr.msk.f32.mxu0 %vm14865_vm1, %v14866_v2 }
0x2faf   :  { %v11483_v31 = vand.u32 4294901760, %v11482_v40  ;;  %14582 = vmatprep.subr.bf16.mxu0 %v14864_v9 }
0x2fb1   :  { %14110 = vmatmul.mubr.f32.vlgmr.msra.gmra.mrb[170].mxu1 %v11483_v31  ;;  %14145 = vmatmul.mubr.f32.vlgmr.msra.gmra.mrb[66].mxu0 %v11479_v55 }
0x2fb2   :  { %14569 = vmatpush3.bf16.msra.mxu1 %v14568_v1  ;;  %14123 = vmatprep.mubr.msk.f32.mxu1 %vm14865_vm1, %v14866_v2 }
0x2fb3   :  { %14573 = vmatprep.subr.bf16.mxu1 %v14864_v9  ;;  %14584 = vmatpush3.bf16.msra.mxu0 %v14583_v32 }
0x2fb4   :  { %14158 = vmatprep.mubr.msk.f32.mxu0 %vm14865_vm1, %v14866_v2  ;;  %14588 = vmatprep.subr.bf16.mxu0 %v14864_v9 }
0x2fb5   :  { %14124 = vmatmul.mubr.f32.vlgmr.msra.gmra.mrb[172].mxu1 %v11480_v28 }
0x2fb6   :  { %14575 = vmatpush3.bf16.msra.mxu1 %v14574_v5  ;;  %14137 = vmatprep.mubr.msk.f32.mxu1 %vm14865_vm1, %v14866_v2 }
0x2fb7   :  { %14579 = vmatprep.subr.bf16.mxu1 %v14864_v9 }
0x2fb9   :  { %14138 = vmatmul.mubr.f32.vlgmr.msra.gmra.mrb[174].mxu1 %v11479_v55 }
0x2fba   :  { %14581 = vmatpush3.bf16.msra.mxu1 %v14580_v37  ;;  %14151 = vmatprep.mubr.msk.f32.mxu1 %vm14865_vm1, %v14866_v2 }
0x2fbb   :  { %14585 = vmatprep.subr.bf16.mxu1 %v14864_v9 }
0x3002   :  { %v11873_v25 = vpop.permute.xlu0 %11872 }
0x3003   :  { %v11874_v3 = vsel %vm1315_vm4, %v11873_v25, 0 }
0x3004   :  { %v11946_v36 = vand.u32 4294901760, %v11874_v3 }
0x3006   :  { %v11947_v11 = vsub.f32 %v11874_v3, %v11946_v36  ;;  %14159 = vmatmul.mubr.f32.vlgmr.msra.gmra.mrb[68].mxu0 %v11946_v36 }
0x3007   :  { %14590 = vmatpush3.bf16.msra.mxu0 %v14580_v37  ;;  %14172 = vmatprep.mubr.msk.f32.mxu0 %vm14865_vm1, %v14866_v2 }
0x3008   :  { %v11948_v20 = vand.u32 4294901760, %v11947_v11  ;;  %14594 = vmatprep.subr.bf16.mxu0 %v14864_v9 }
0x300a   :  { %v11949_v21 = vsub.f32 %v11947_v11, %v11948_v20  ;;  %14173 = vmatmul.mubr.f32.vlgmr.msra.gmra.mrb[70].mxu0 %v11948_v20 }
0x300b   :  { %14596 = vmatpush3.bf16.msra.mxu0 %v14580_v37  ;;  %14186 = vmatprep.mubr.msk.f32.mxu0 %vm14865_vm1, %v14866_v2 }
0x300c   :  { %v11950_v8 = vand.u32 4294901760, %v11949_v21 }
0x300e   :  { %14152 = vmatmul.mubr.f32.vlgmr.msra.gmra.mrb[176].mxu1 %v11950_v8  ;;  %14187 = vmatmul.mubr.f32.vlgmr.msra.gmra.mrb[72].mxu0 %v11946_v36 }
0x300f   :  { %14587 = vmatpush3.bf16.msra.mxu1 %v14586_v6  ;;  %14165 = vmatprep.mubr.msk.f32.mxu1 %vm14865_vm1, %v14866_v2 }
0x3010   :  { %14591 = vmatprep.subr.bf16.mxu1 %v14864_v9 }
0x3012   :  { %14166 = vmatmul.mubr.f32.vlgmr.msra.gmra.mrb[178].mxu1 %v11947_v11 }
0x3013   :  { %14593 = vmatpush3.bf16.msra.mxu1 %v14592_v0  ;;  %14179 = vmatprep.mubr.msk.f32.mxu1 %vm14865_vm1, %v14866_v2 }
0x3016   :  { %14180 = vmatmul.mubr.f32.vlgmr.msra.gmra.mrb[180].mxu1 %v11946_v36 }
0x307c   :  { %v11566_v24 = vpop.f32.mrb[62].mxu0 }
0x307d   :  { %v14118_v26 = vpop.f32.mrb[63].mxu0 }
0x3080   :  { %v11717_v13 = vpop.f32.mrb[64].mxu0 }
0x3081   :  { %v14132_v12 = vpop.f32.mrb[65].mxu0 }
0x3084   :  { %v11485_v14 = vpop.f32.mrb[170].mxu1  ;;  %v11867_v18 = vpop.f32.mrb[66].mxu0 }
0x3085   :  { %v11567_v23 = vadd.f32 %v11566_v24, %v11485_v14  ;;  %v14111_v16 = vpop.f32.mrb[171].mxu1  ;;  %v14146_v29 = vpop.f32.mrb[67].mxu0 }
0x3088   :  { %v11642_v27 = vpop.f32.mrb[172].mxu1 }
0x3089   :  { %v11643_v35 = vadd.f32 %v11642_v27, %v11567_v23  ;;  %v14125_v56 = vpop.f32.mrb[173].mxu1 }
0x308b   :  { %v11718_v38 = vadd.f32 %v11717_v13, %v11643_v35 }
0x308c   :  { %v11794_v9 = vpop.f32.mrb[174].mxu1 }
0x308d   :  { %v11795_v39 = vadd.f32 %v11794_v9, %v11718_v38  ;;  %v14139_v43 = vpop.f32.mrb[175].mxu1 }
0x308f   :  { %v11868_v63 = vadd.f32 %v11867_v18, %v11795_v39 }
0x30d9   :  { %v12033_v17 = vpop.f32.mrb[68].mxu0 }
0x30da   :  { %v14160_v2 = vpop.f32.mrb[69].mxu0 }
0x30dd   :  { %v12184_v45 = vpop.f32.mrb[70].mxu0 }
0x30de   :  { %v14174_v46 = vpop.f32.mrb[71].mxu0 }
0x30e1   :  { %v11952_v47 = vpop.f32.mrb[176].mxu1  ;;  %v12334_v48 = vpop.f32.mrb[72].mxu0 }
0x30e2   :  { %v11953_v42 = vadd.f32 %v11952_v47, %v11868_v63  ;;  %v14153_v10 = vpop.f32.mrb[177].mxu1  ;;  %v14188_v19 = vpop.f32.mrb[73].mxu0 }
0x30e4   :  { %v12034_v52 = vadd.f32 %v12033_v17, %v11953_v42 }
0x30e5   :  { %v12109_v49 = vpop.f32.mrb[178].mxu1 }
0x30e6   :  { %v12110_v60 = vadd.f32 %v12109_v49, %v12034_v52  ;;  %v14167_v1 = vpop.f32.mrb[179].mxu1 }
0x30e8   :  { %v12185_v5 = vadd.f32 %v12184_v45, %v12110_v60 }
0x30e9   :  { %v12261_v53 = vpop.f32.mrb[180].mxu1 }
0x30ea   :  { %v12262_v57 = vadd.f32 %v12261_v53, %v12185_v5  ;;  %v14181_v54 = vpop.f32.mrb[181].mxu1 }
0x30ec   :  { %v12335_v58 = vadd.f32 %v12334_v48, %v12262_v57 }
0x30ee   :  { %v12342_v59 = vadd.f32 %v12394_v22, %v12335_v58 }
0x30f0   :  { %12343 = vst.msk [vmem:[#allocation6] sm:$0xff] %vm1315_vm4, %v12342_v59 }
0x30f1   :  { %14851 = shalt.err (!%p14848_p4)
}
0x30f2   :  { %s14852_s26 = scalar_lea.hbm %s16290_s3, 128 }
0x30f3   :  { %p14853_p5 = scmp.ne.s32.totalorder %s16290_s3, %s14852_s26  ;;  %p14856_p6 = scmp.lt.u32.totalorder %s14852_s26, %s16290_s3 }
0x30f5   :  { %p14858_p7 = pnand %p14856_p6, %p14853_p5 }
0x30f7   :  { %14861 = shalt.err (!%p14858_p7)
}
0x30f8   :  { %12353 = dma.vmem_to_hbm [thread:$0]  %s12351_s22, 128, %s16290_s3, [#allocation7]  }
0x30f9   :  { %14862 = dma.done.wait [#allocation7], 128  }
0x30fa   :  { %14863 = vsyncadd [#allocation7], 4294967168 }
0x30fb   :  { %12357 = vsyncpa [#allocation7], 1 }

</bundles_post_ra>
